<compile_context>
chip_gen: v7x
topology: tpu7x:2x2x1
jax: 0.10.0
libtpu: 0.0.40
codegen_flags: <defaults>
</compile_context>

<pallas_src>
import functools
import math

import jax
import jax.numpy as jnp
from jax.experimental import pallas as pl
from jax.experimental.pallas import tpu as pltpu

_CP = 128  # lane-dense padded channel width for the final store


def _pick_batch_tile(n, spatial):
    """Batch tile: ~4k output rows per grid step, but keep grid >= 2 (v7x megacore)."""
    nb = max(1, min(n, 4096 // max(spatial, 1)))
    if n >= 2:
        nb = min(nb, n // 2)          # grid >= 2 so both v7x TensorCores get work
    while n % nb:
        nb -= 1
    return nb


# ---------------------------------------------------------------------------
# Fused kernel: full conv stack (conv + bias + LeakyReLU per layer), all
# intermediate activations kept as values in VMEM.  meta is a static tuple of
# per-layer (kh, kw, stride, pad, h_in, w_in, h_out, w_out).
# ---------------------------------------------------------------------------
def _fused_block_kernel(x_ref, b_ref, *refs, meta, cin_pads, cout_pads, leak, cdt):
    num_layers = len(meta)
    w_refs = refs[:num_layers]
    o_ref = refs[num_layers]
    nb = x_ref.shape[0]

    b_all = b_ref[...]                        # (L, 128) f32 bias, loaded once
    cur = x_ref[...]                          # layer-0 input (spatially pre-padded), cdt

    for l, (kh, kw, stride, pad, h_in, w_in, h_out, w_out) in enumerate(meta):
        cin_p, cout_p = cin_pads[l], cout_pads[l]
        m = nb * h_out * w_out

        if stride == 1:
            if l > 0 and pad > 0:
                # Halo-pad the previous activation as a value (stays in VMEM,
                # no persistent scratch -> no cross-core init hazard).
                zr = jnp.zeros((nb, pad, w_in, cin_p), cur.dtype)
                cur = jnp.concatenate([zr, cur, zr], axis=1)
                zc = jnp.zeros((nb, h_in + 2 * pad, pad, cin_p), cur.dtype)
                cur = jnp.concatenate([zc, cur, zc], axis=2)
            taps = [cur[:, di:di + h_out, dj:dj + w_out, :]
                    for di in range(kh) for dj in range(kw)]
        else:
            # Downscale conv: kernel == stride, pad == 0 -> non-overlapping windows
            # sliced straight off the activation value (no scratch round trip).
            s = stride
            v6 = cur.reshape(nb, h_out, s, w_out, s, cin_p)
            taps = [v6[:, :, di, :, dj, :] for di in range(kh) for dj in range(kw)]

        # One matmul per layer with K = kh*kw*cin_p (instead of kh*kw accumulating
        # K=cin_p dots, each draining a full (m, N) result from the MXU FIFO).
        lhs = jnp.concatenate(taps, axis=-1).reshape(m, kh * kw * cin_p)
        acc = jnp.dot(lhs, w_refs[l][...], preferred_element_type=jnp.float32)
        acc = acc + b_all[l:l + 1, :cout_p]                 # bias (f32)
        acc = jnp.where(acc >= 0.0, acc, leak * acc)        # LeakyReLU (f32)
        cur = acc.astype(cdt).reshape(nb, h_out, w_out, cout_p)  # carry in bf16

    o_ref[...] = cur.astype(o_ref.dtype)      # single lane-dense (.., 128) store


# ---------------------------------------------------------------------------
# Conv block (conv stack + LeakyReLU + optional downscale conv + rgb avg-pool),
# PyTorch-style deterministic init.  NCHW in / NCHW out; NHWC inside.
# ---------------------------------------------------------------------------
class CriticBlockPallas:
    def __init__(self, key, scale=1, inp_channels=0, channels=(), dims=(),
                 paddings=(), leakiness=0.2, compute_dtype=jnp.bfloat16):
        self.scale = int(scale)
        self.inp_channels = int(inp_channels)
        self.leak = float(leakiness)
        self.cdt = compute_dtype

        chans = (inp_channels + 3,) + tuple(channels)
        raw = []  # (weight OIHW, bias, stride, padding)
        for i in range(len(dims)):
            dim, padding = int(dims[i]), int(paddings[i])
            cin, cout = chans[i], chans[i + 1]
            key, kw_, kb_ = jax.random.split(key, 3)
            bound = 1.0 / math.sqrt(cin * dim * dim)
            w = jax.random.uniform(kw_, (cout, cin, dim, dim), jnp.float32, -bound, bound)
            b = jax.random.uniform(kb_, (cout,), jnp.float32, -bound, bound)
            raw.append((w, b, 1, padding))
        if self.scale > 1:
            cin = cout = chans[-1]
            key, kw_, kb_ = jax.random.split(key, 3)
            bound = 1.0 / math.sqrt(cin * self.scale * self.scale)
            w = jax.random.uniform(kw_, (cout, cin, self.scale, self.scale),
                                   jnp.float32, -bound, bound)
            b = jax.random.uniform(kb_, (cout,), jnp.float32, -bound, bound)
            raw.append((w, b, self.scale, 0))

        # cin padded only to the dtype sublane pack (16 bf16 / 8 f32), NOT to 128.
        pack = 16 if compute_dtype == jnp.bfloat16 else 8
        cins = [w.shape[1] for (w, _, _, _) in raw]
        couts = [w.shape[0] for (w, _, _, _) in raw]
        cin_pads = [-(-c // pack) * pack for c in cins]
        # Intermediate layers keep cout at the next layer's (small) cin pad; only
        # the final layer is padded to 128 lanes for the lane-dense output store.
        cout_pads = [cin_pads[l + 1] for l in range(len(raw) - 1)] + ([_CP] if raw else [])

        self.layer_geo = []   # (kh, kw, stride, pad, cin, cout)
        self.w_mats = []      # per layer (kh*kw*cin_pad, cout_pad), compute dtype
        biases = []
        for l, (w, b, stride, pad) in enumerate(raw):
            cout, cin, kh, kw = w.shape
            assert cout <= _CP, "output channels exceed padded lane width"
            assert cout <= cout_pads[l]
            wt = jnp.transpose(w, (2, 3, 1, 0))                       # (kh,kw,cin,cout)
            wt = jnp.pad(wt, ((0, 0), (0, 0),
                              (0, cin_pads[l] - cin), (0, cout_pads[l] - cout)))
            self.w_mats.append(
                wt.reshape(kh * kw * cin_pads[l], cout_pads[l]).astype(compute_dtype))
            biases.append(jnp.pad(b, (0, _CP - cout)))
            self.layer_geo.append((kh, kw, stride, pad, cin, cout))
        self.cin_pads = tuple(cin_pads)
        self.cout_pads = tuple(cout_pads)
        self.c0_pad = cin_pads[0] if raw else 0
        self.bias = (jnp.stack(biases).astype(jnp.float32)
                     if biases else jnp.zeros((0, _CP), jnp.float32))
        self.out_channels = couts[-1] if raw else None

    # --- one fused pallas_call for the whole conv stack ----------------------
    def _conv_stack(self, x_cat_nhwc):
        n, h, w, c0 = x_cat_nhwc.shape
        cdt = self.cdt
        pad0 = self.layer_geo[0][3] if self.layer_geo[0][2] == 1 else 0
        x_in = jnp.pad(x_cat_nhwc,
                       ((0, 0), (pad0, pad0), (pad0, pad0), (0, self.c0_pad - c0))
                       ).astype(cdt)
        nb = _pick_batch_tile(n, h * w)

        metas = []
        hi, wi = h, w
        for (kh, kw, stride, pad, cin, cout) in self.layer_geo:
            ho = (hi + 2 * pad - kh) // stride + 1
            wo = (wi + 2 * pad - kw) // stride + 1
            if stride > 1:
                assert kh == kw == stride and pad == 0, \
                    "downscale conv must have kernel == stride and no padding"
                assert hi % stride == 0 and wi % stride == 0
            metas.append((kh, kw, stride, pad, hi, wi, ho, wo))
            hi, wi = ho, wo
        h_f, w_f = hi, wi

        kernel = functools.partial(
            _fused_block_kernel, meta=tuple(metas), cin_pads=self.cin_pads,
            cout_pads=self.cout_pads, leak=self.leak, cdt=cdt)

        in_specs = [pl.BlockSpec((nb, h + 2 * pad0, w + 2 * pad0, self.c0_pad),
                                 lambda i: (i, 0, 0, 0)),
                    pl.BlockSpec(self.bias.shape, lambda i: (0, 0))]
        for wm in self.w_mats:
            in_specs.append(pl.BlockSpec(wm.shape, lambda i: (0, 0)))

        out = pl.pallas_call(
            kernel,
            # output emitted in the compute dtype (bf16): halves HBM writeback of a
            # slab that is already wider than the real channel count
            out_shape=jax.ShapeDtypeStruct((n, h_f, w_f, _CP), cdt),
            grid=(n // nb,),
            in_specs=in_specs,
            out_specs=pl.BlockSpec((nb, h_f, w_f, _CP), lambda i: (i, 0, 0, 0)),
            compiler_params=pltpu.CompilerParams(
                dimension_semantics=("parallel",),
                # explicit scoped-VMEM budget: headroom over the 16/32 MiB defaults,
                # still below v7x's 64 MiB physical (re-derive for huge resolutions)
                vmem_limit_bytes=48 * 1024 * 1024),
        )(x_in, self.bias, *self.w_mats)
        return out[..., :self.out_channels]   # slice folds into following transpose

    def __call__(self, x_nchw, rgb_nchw=None):
        x = jnp.transpose(x_nchw, (0, 2, 3, 1)).astype(jnp.float32)
        rgb = None if rgb_nchw is None else \
            jnp.transpose(rgb_nchw, (0, 2, 3, 1)).astype(jnp.float32)
        if self.inp_channels == 0:
            x_cat, rgb_src = x, x
        else:
            x_cat, rgb_src = jnp.concatenate([x, rgb], axis=-1), rgb

        feat = self._conv_stack(x_cat) if self.layer_geo else x_cat

        if self.scale > 1:
            s = self.scale
            n_, hh, ww, cc = rgb_src.shape
            rgb_out = rgb_src.reshape(n_, hh // s, s, ww // s, s, cc).mean(axis=(2, 4))
        else:
            rgb_out = rgb_src
        return (jnp.transpose(feat, (0, 3, 1, 2)),
                jnp.transpose(rgb_out, (0, 3, 1, 2)))


class GeneratorPallas:
    """csigan.Generator forward: pure composition over per-resolution blocks."""
    # TODO(synk): the per-resolution generator (upsampling + torgb) blocks referenced
    # by csigan.Generator are external modules not defined in the spec; the fused
    # conv block above is the Pallas building block used for the demo.
    def __init__(self, layers):
        self.layers = list(layers)

    def __call__(self, z):
        z = z[:, :, None, None]              # z.unsqueeze(2).unsqueeze(3)
        x, rgb = self.layers[0](z)
        for layer in self.layers[1:]:
            x, rgb = layer(x, rgb)
        return rgb


if __name__ == "__main__":
    key = jax.random.PRNGKey(0)
    kp, kx, kr = jax.random.split(key, 3)

    # scale=2, inp_channels=4, channels=(8,8), dims=(3,3), paddings=(1,1)
    block = CriticBlockPallas(kp, scale=2, inp_channels=4,
                              channels=(8, 8), dims=(3, 3),
                              paddings=(1, 1), leakiness=0.2)

    x = jax.random.normal(kx, (2, 4, 16, 16), jnp.float32)    # features (NCHW)
    rgb = jax.random.normal(kr, (2, 3, 16, 16), jnp.float32)  # rgb (NCHW)

    fwd = jax.jit(lambda a, b: block(a, b))
    out_x, out_rgb = fwd(x, rgb)
    jax.block_until_ready((out_x, out_rgb))

    assert out_x.shape == (2, 8, 8, 8), out_x.shape      # downscaled features
    assert out_rgb.shape == (2, 3, 8, 8), out_rgb.shape  # avg-pooled rgb
    assert bool(jnp.all(jnp.isfinite(out_x.astype(jnp.float32))))
    assert bool(jnp.all(jnp.isfinite(out_rgb)))
    print("KERNEL_OK")
</pallas_src>

<mosaic_0001>
module attributes {stable_mosaic.version = 11 : i64} {
  func.func @_fused_block_kernel(%arg0: i32, %arg1: memref<1x18x18x16xbf16, #tpu.memory_space<vmem>>, %arg2: memref<3x128xf32, #tpu.memory_space<vmem>>, %arg3: memref<144x16xbf16, #tpu.memory_space<vmem>>, %arg4: memref<144x16xbf16, #tpu.memory_space<vmem>>, %arg5: memref<64x128xbf16, #tpu.memory_space<vmem>>, %arg6: memref<1x8x8x128xbf16, #tpu.memory_space<vmem>>) attributes {dimension_semantics = [#tpu.dimension_semantics<parallel>], iteration_bounds = array<i64: 2>, scalar_prefetch = 0 : i64, scratch_operands = 0 : i64, tpu.core_type = #tpu.core_type<tc>, window_params = [{transform_indices = @transform_0, window_bounds = array<i64: 1, 18, 18, 16>}, {pipeline_mode = #tpu.pipeline_mode<synchronous>, transform_indices = @transform_1, window_bounds = array<i64: 3, 128>}, {pipeline_mode = #tpu.pipeline_mode<synchronous>, transform_indices = @transform_2, window_bounds = array<i64: 144, 16>}, {pipeline_mode = #tpu.pipeline_mode<synchronous>, transform_indices = @transform_3, window_bounds = array<i64: 144, 16>}, {pipeline_mode = #tpu.pipeline_mode<synchronous>, transform_indices = @transform_4, window_bounds = array<i64: 64, 128>}, {transform_indices = @transform_5, window_bounds = array<i64: 1, 8, 8, 128>}]} {
    %c0 = arith.constant 0 : index
    %c0_0 = arith.constant 0 : index
    %0 = vector.load %arg2[%c0, %c0_0] : memref<3x128xf32, #tpu.memory_space<vmem>>, vector<3x128xf32>
    %c0_1 = arith.constant 0 : index
    %c0_2 = arith.constant 0 : index
    %c0_3 = arith.constant 0 : index
    %c0_4 = arith.constant 0 : index
    %1 = vector.load %arg1[%c0_1, %c0_2, %c0_3, %c0_4] : memref<1x18x18x16xbf16, #tpu.memory_space<vmem>>, vector<1x18x18x16xbf16>
    %2 = vector.extract_strided_slice %1 {offsets = [0, 0, 0, 0], sizes = [1, 16, 16, 16], strides = [1, 1, 1, 1]} : vector<1x18x18x16xbf16> to vector<1x16x16x16xbf16>
    %3 = vector.extract_strided_slice %1 {offsets = [0, 0, 1, 0], sizes = [1, 16, 16, 16], strides = [1, 1, 1, 1]} : vector<1x18x18x16xbf16> to vector<1x16x16x16xbf16>
    %4 = vector.extract_strided_slice %1 {offsets = [0, 0, 2, 0], sizes = [1, 16, 16, 16], strides = [1, 1, 1, 1]} : vector<1x18x18x16xbf16> to vector<1x16x16x16xbf16>
    %5 = vector.extract_strided_slice %1 {offsets = [0, 1, 0, 0], sizes = [1, 16, 16, 16], strides = [1, 1, 1, 1]} : vector<1x18x18x16xbf16> to vector<1x16x16x16xbf16>
    %6 = vector.extract_strided_slice %1 {offsets = [0, 1, 1, 0], sizes = [1, 16, 16, 16], strides = [1, 1, 1, 1]} : vector<1x18x18x16xbf16> to vector<1x16x16x16xbf16>
    %7 = vector.extract_strided_slice %1 {offsets = [0, 1, 2, 0], sizes = [1, 16, 16, 16], strides = [1, 1, 1, 1]} : vector<1x18x18x16xbf16> to vector<1x16x16x16xbf16>
    %8 = vector.extract_strided_slice %1 {offsets = [0, 2, 0, 0], sizes = [1, 16, 16, 16], strides = [1, 1, 1, 1]} : vector<1x18x18x16xbf16> to vector<1x16x16x16xbf16>
    %9 = vector.extract_strided_slice %1 {offsets = [0, 2, 1, 0], sizes = [1, 16, 16, 16], strides = [1, 1, 1, 1]} : vector<1x18x18x16xbf16> to vector<1x16x16x16xbf16>
    %10 = vector.extract_strided_slice %1 {offsets = [0, 2, 2, 0], sizes = [1, 16, 16, 16], strides = [1, 1, 1, 1]} : vector<1x18x18x16xbf16> to vector<1x16x16x16xbf16>
    %11 = tpu.concatenate %2, %3, %4, %5, %6, %7, %8, %9, %10 in 3 : vector<1x16x16x16xbf16>, vector<1x16x16x16xbf16>, vector<1x16x16x16xbf16>, vector<1x16x16x16xbf16>, vector<1x16x16x16xbf16>, vector<1x16x16x16xbf16>, vector<1x16x16x16xbf16>, vector<1x16x16x16xbf16>, vector<1x16x16x16xbf16> -> vector<1x16x16x144xbf16>
    %12 = vector.shape_cast %11 : vector<1x16x16x144xbf16> to vector<256x144xbf16>
    %c0_5 = arith.constant 0 : index
    %c0_6 = arith.constant 0 : index
    %13 = vector.load %arg3[%c0_5, %c0_6] : memref<144x16xbf16, #tpu.memory_space<vmem>>, vector<144x16xbf16>
    %cst = arith.constant dense<0.000000e+00> : vector<256x16xf32>
    %14 = tpu.matmul %12, %13, %cst {dimension_numbers = #tpu.dot_dimension_numbers<[1], [0], [0], [1], [0, 0, 1, 1], [], []>} : vector<256x144xbf16>, vector<144x16xbf16>, vector<256x16xf32> -> vector<256x16xf32>
    %15 = vector.extract_strided_slice %0 {offsets = [0, 0], sizes = [1, 16], strides = [1, 1]} : vector<3x128xf32> to vector<1x16xf32>
    %16 = vector.broadcast %15 : vector<1x16xf32> to vector<256x16xf32>
    %17 = arith.addf %14, %16 : vector<256x16xf32>
    %cst_7 = arith.constant 0.000000e+00 : f32
    %18 = vector.broadcast %cst_7 : f32 to vector<256x16xf32>
    %19 = arith.cmpf oge, %17, %18 : vector<256x16xf32>
    %cst_8 = arith.constant 2.000000e-01 : f32
    %20 = vector.broadcast %cst_8 : f32 to vector<256x16xf32>
    %21 = arith.mulf %20, %17 : vector<256x16xf32>
    %22 = arith.select %19, %17, %21 : vector<256x16xi1>, vector<256x16xf32>
    %23 = arith.truncf %22 : vector<256x16xf32> to vector<256x16xbf16>
    %24 = vector.shape_cast %23 : vector<256x16xbf16> to vector<1x16x16x16xbf16>
    %cst_9 = arith.constant 0.000000e+00 : bf16
    %25 = vector.broadcast %cst_9 : bf16 to vector<1x1x16x16xbf16>
    %26 = tpu.concatenate %25, %24, %25 in 1 : vector<1x1x16x16xbf16>, vector<1x16x16x16xbf16>, vector<1x1x16x16xbf16> -> vector<1x18x16x16xbf16>
    %cst_10 = arith.constant 0.000000e+00 : bf16
    %27 = vector.broadcast %cst_10 : bf16 to vector<1x18x1x16xbf16>
    %28 = tpu.concatenate %27, %26, %27 in 2 : vector<1x18x1x16xbf16>, vector<1x18x16x16xbf16>, vector<1x18x1x16xbf16> -> vector<1x18x18x16xbf16>
    %29 = vector.extract_strided_slice %28 {offsets = [0, 0, 0, 0], sizes = [1, 16, 16, 16], strides = [1, 1, 1, 1]} : vector<1x18x18x16xbf16> to vector<1x16x16x16xbf16>
    %30 = vector.extract_strided_slice %28 {offsets = [0, 0, 1, 0], sizes = [1, 16, 16, 16], strides = [1, 1, 1, 1]} : vector<1x18x18x16xbf16> to vector<1x16x16x16xbf16>
    %31 = vector.extract_strided_slice %28 {offsets = [0, 0, 2, 0], sizes = [1, 16, 16, 16], strides = [1, 1, 1, 1]} : vector<1x18x18x16xbf16> to vector<1x16x16x16xbf16>
    %32 = vector.extract_strided_slice %28 {offsets = [0, 1, 0, 0], sizes = [1, 16, 16, 16], strides = [1, 1, 1, 1]} : vector<1x18x18x16xbf16> to vector<1x16x16x16xbf16>
    %33 = vector.extract_strided_slice %28 {offsets = [0, 1, 1, 0], sizes = [1, 16, 16, 16], strides = [1, 1, 1, 1]} : vector<1x18x18x16xbf16> to vector<1x16x16x16xbf16>
    %34 = vector.extract_strided_slice %28 {offsets = [0, 1, 2, 0], sizes = [1, 16, 16, 16], strides = [1, 1, 1, 1]} : vector<1x18x18x16xbf16> to vector<1x16x16x16xbf16>
    %35 = vector.extract_strided_slice %28 {offsets = [0, 2, 0, 0], sizes = [1, 16, 16, 16], strides = [1, 1, 1, 1]} : vector<1x18x18x16xbf16> to vector<1x16x16x16xbf16>
    %36 = vector.extract_strided_slice %28 {offsets = [0, 2, 1, 0], sizes = [1, 16, 16, 16], strides = [1, 1, 1, 1]} : vector<1x18x18x16xbf16> to vector<1x16x16x16xbf16>
    %37 = vector.extract_strided_slice %28 {offsets = [0, 2, 2, 0], sizes = [1, 16, 16, 16], strides = [1, 1, 1, 1]} : vector<1x18x18x16xbf16> to vector<1x16x16x16xbf16>
    %38 = tpu.concatenate %29, %30, %31, %32, %33, %34, %35, %36, %37 in 3 : vector<1x16x16x16xbf16>, vector<1x16x16x16xbf16>, vector<1x16x16x16xbf16>, vector<1x16x16x16xbf16>, vector<1x16x16x16xbf16>, vector<1x16x16x16xbf16>, vector<1x16x16x16xbf16>, vector<1x16x16x16xbf16>, vector<1x16x16x16xbf16> -> vector<1x16x16x144xbf16>
    %39 = vector.shape_cast %38 : vector<1x16x16x144xbf16> to vector<256x144xbf16>
    %c0_11 = arith.constant 0 : index
    %c0_12 = arith.constant 0 : index
    %40 = vector.load %arg4[%c0_11, %c0_12] : memref<144x16xbf16, #tpu.memory_space<vmem>>, vector<144x16xbf16>
    %cst_13 = arith.constant dense<0.000000e+00> : vector<256x16xf32>
    %41 = tpu.matmul %39, %40, %cst_13 {dimension_numbers = #tpu.dot_dimension_numbers<[1], [0], [0], [1], [0, 0, 1, 1], [], []>} : vector<256x144xbf16>, vector<144x16xbf16>, vector<256x16xf32> -> vector<256x16xf32>
    %42 = vector.extract_strided_slice %0 {offsets = [1, 0], sizes = [1, 16], strides = [1, 1]} : vector<3x128xf32> to vector<1x16xf32>
    %43 = vector.broadcast %42 : vector<1x16xf32> to vector<256x16xf32>
    %44 = arith.addf %41, %43 : vector<256x16xf32>
    %cst_14 = arith.constant 0.000000e+00 : f32
    %45 = vector.broadcast %cst_14 : f32 to vector<256x16xf32>
    %46 = arith.cmpf oge, %44, %45 : vector<256x16xf32>
    %cst_15 = arith.constant 2.000000e-01 : f32
    %47 = vector.broadcast %cst_15 : f32 to vector<256x16xf32>
    %48 = arith.mulf %47, %44 : vector<256x16xf32>
    %49 = arith.select %46, %44, %48 : vector<256x16xi1>, vector<256x16xf32>
    %50 = arith.truncf %49 : vector<256x16xf32> to vector<256x16xbf16>
    %51 = vector.shape_cast %50 : vector<256x16xbf16> to vector<1x16x16x16xbf16>
    %52 = vector.shape_cast %51 : vector<1x16x16x16xbf16> to vector<1x8x2x8x2x16xbf16>
    %53 = vector.extract_strided_slice %52 {offsets = [0, 0, 0, 0, 0, 0], sizes = [1, 8, 1, 8, 1, 16], strides = [1, 1, 1, 1, 1, 1]} : vector<1x8x2x8x2x16xbf16> to vector<1x8x1x8x1x16xbf16>
    %54 = vector.shape_cast %53 : vector<1x8x1x8x1x16xbf16> to vector<1x8x8x16xbf16>
    %55 = vector.extract_strided_slice %52 {offsets = [0, 0, 0, 0, 1, 0], sizes = [1, 8, 1, 8, 1, 16], strides = [1, 1, 1, 1, 1, 1]} : vector<1x8x2x8x2x16xbf16> to vector<1x8x1x8x1x16xbf16>
    %56 = vector.shape_cast %55 : vector<1x8x1x8x1x16xbf16> to vector<1x8x8x16xbf16>
    %57 = vector.extract_strided_slice %52 {offsets = [0, 0, 1, 0, 0, 0], sizes = [1, 8, 1, 8, 1, 16], strides = [1, 1, 1, 1, 1, 1]} : vector<1x8x2x8x2x16xbf16> to vector<1x8x1x8x1x16xbf16>
    %58 = vector.shape_cast %57 : vector<1x8x1x8x1x16xbf16> to vector<1x8x8x16xbf16>
    %59 = vector.extract_strided_slice %52 {offsets = [0, 0, 1, 0, 1, 0], sizes = [1, 8, 1, 8, 1, 16], strides = [1, 1, 1, 1, 1, 1]} : vector<1x8x2x8x2x16xbf16> to vector<1x8x1x8x1x16xbf16>
    %60 = vector.shape_cast %59 : vector<1x8x1x8x1x16xbf16> to vector<1x8x8x16xbf16>
    %61 = tpu.concatenate %54, %56, %58, %60 in 3 : vector<1x8x8x16xbf16>, vector<1x8x8x16xbf16>, vector<1x8x8x16xbf16>, vector<1x8x8x16xbf16> -> vector<1x8x8x64xbf16>
    %62 = vector.shape_cast %61 : vector<1x8x8x64xbf16> to vector<64x64xbf16>
    %c0_16 = arith.constant 0 : index
    %c0_17 = arith.constant 0 : index
    %63 = vector.load %arg5[%c0_16, %c0_17] : memref<64x128xbf16, #tpu.memory_space<vmem>>, vector<64x128xbf16>
    %cst_18 = arith.constant dense<0.000000e+00> : vector<64x128xf32>
    %64 = tpu.matmul %62, %63, %cst_18 {dimension_numbers = #tpu.dot_dimension_numbers<[1], [0], [0], [1], [0, 0, 1, 1], [], []>} : vector<64x64xbf16>, vector<64x128xbf16>, vector<64x128xf32> -> vector<64x128xf32>
    %65 = vector.extract_strided_slice %0 {offsets = [2, 0], sizes = [1, 128], strides = [1, 1]} : vector<3x128xf32> to vector<1x128xf32>
    %66 = vector.broadcast %65 : vector<1x128xf32> to vector<64x128xf32>
    %67 = arith.addf %64, %66 : vector<64x128xf32>
    %cst_19 = arith.constant 0.000000e+00 : f32
    %68 = vector.broadcast %cst_19 : f32 to vector<64x128xf32>
    %69 = arith.cmpf oge, %67, %68 : vector<64x128xf32>
    %cst_20 = arith.constant 2.000000e-01 : f32
    %70 = vector.broadcast %cst_20 : f32 to vector<64x128xf32>
    %71 = arith.mulf %70, %67 : vector<64x128xf32>
    %72 = arith.select %69, %67, %71 : vector<64x128xi1>, vector<64x128xf32>
    %73 = arith.truncf %72 : vector<64x128xf32> to vector<64x128xbf16>
    %74 = vector.shape_cast %73 : vector<64x128xbf16> to vector<1x8x8x128xbf16>
    %c0_21 = arith.constant 0 : index
    %c0_22 = arith.constant 0 : index
    %c0_23 = arith.constant 0 : index
    %c0_24 = arith.constant 0 : index
    %75 = vector.load %arg6[%c0_21, %c0_22, %c0_23, %c0_24] : memref<1x8x8x128xbf16, #tpu.memory_space<vmem>>, vector<1x8x8x128xbf16>
    tpu.vector_store %arg6[%c0_21, %c0_22, %c0_23, %c0_24], %74 {strides = array<i32>} : memref<1x8x8x128xbf16, #tpu.memory_space<vmem>>, vector<1x8x8x128xbf16>,
    return
  }
  func.func @transform_0(%arg0: i32) -> (i32, i32, i32, i32) {
    %c0_i32 = arith.constant 0 : i32
    %c0_i32_0 = arith.constant 0 : i32
    %c0_i32_1 = arith.constant 0 : i32
    %c0_i32_2 = arith.constant 0 : i32
    return %arg0, %c0_i32, %c0_i32_0, %c0_i32_1 : i32, i32, i32, i32
  }
  func.func @transform_1(%arg0: i32) -> (i32, i32) {
    %c0_i32 = arith.constant 0 : i32
    %c0_i32_0 = arith.constant 0 : i32
    %c0_i32_1 = arith.constant 0 : i32
    return %c0_i32, %c0_i32_0 : i32, i32
  }
  func.func @transform_2(%arg0: i32) -> (i32, i32) {
    %c0_i32 = arith.constant 0 : i32
    %c0_i32_0 = arith.constant 0 : i32
    %c0_i32_1 = arith.constant 0 : i32
    return %c0_i32, %c0_i32_0 : i32, i32
  }
  func.func @transform_3(%arg0: i32) -> (i32, i32) {
    %c0_i32 = arith.constant 0 : i32
    %c0_i32_0 = arith.constant 0 : i32
    %c0_i32_1 = arith.constant 0 : i32
    return %c0_i32, %c0_i32_0 : i32, i32
  }
  func.func @transform_4(%arg0: i32) -> (i32, i32) {
    %c0_i32 = arith.constant 0 : i32
    %c0_i32_0 = arith.constant 0 : i32
    %c0_i32_1 = arith.constant 0 : i32
    return %c0_i32, %c0_i32_0 : i32, i32
  }
  func.func @transform_5(%arg0: i32) -> (i32, i32, i32, i32) {
    %c0_i32 = arith.constant 0 : i32
    %c0_i32_0 = arith.constant 0 : i32
    %c0_i32_1 = arith.constant 0 : i32
    %c0_i32_2 = arith.constant 0 : i32
    return %arg0, %c0_i32, %c0_i32_0, %c0_i32_1 : i32, i32, i32, i32
  }
}

</mosaic_0001>

<bundles_post_ra>
// kernel: _lambda_.1
= control target key start
LH: loop header
LB: loop body
LE: loop exit
PB: predicated region body
PF: predicated region fallthrough
CT: control target
= control target key end

     0   :  { %s6789_s18 = smov 0   ;;  %s9528_s0 = inlined_call_operand.vmem [shape: bf16[2,18,18,16], index: 0, kind: input, shape index: {}]   ;;  %s9529_s1 = inlined_call_operand.vmem [shape: f32[3,128], index: 1, kind: input, shape index: {}]   ;;  %s9530_s2 = inlined_call_operand.vmem [shape: bf16[144,16], index: 2, kind: input, shape index: {}]   ;;  %s9531_s3 = inlined_call_operand.vmem [shape: bf16[144,16], index: 3, kind: input, shape index: {}]   ;;  %s9532_s4 = inlined_call_operand.vmem [shape: bf16[64,128], index: 4, kind: input, shape index: {}]   ;;  %s9533_s5 = inlined_call_operand.vmem [shape: bf16[2,8,8,128], index: 5, kind: output, shape index: {}]  }
   0x1 LB: > { %s6468_s19 = sadd.s32 4294967295, %s6748_s18   ;;  %p6472_p0 = scmp.ge.s32.totalorder %s6748_s18, 1  ;;  %s6748_s18 = sphi %s6789_s18, %s15_s18  }
   0x2   : > { %p187_p1 = scmp.lt.s32.totalorder %s6748_s18, 3 }
   0x4   : > { %p188_p2 = pnand %p6472_p0, %p187_p1 }
   0x6   : > { %191 = sbr.rel (%p188_p2) target bundleno = 1381 (0x565), region = 40 }
   0xd   : > { %p215_p3 = scmp.lt.s32.totalorder %s6468_s19, 1  ;;  %v6750_v0 = vmov 0   ;;  %v6700_v1 = vld [vmem:[%s9530_s2] sm:$0xff]   ;;  %v6701_v2 = vld [vmem:[%s9530_s2 + $0x8] sm:$0xff]   ;;  %vm634_vm0 = vcmask 1046528   ;;  %v6702_v3 = vld [vmem:[%s9530_s2 + $0x10] sm:$0xff]  }
   0xe   : > { %1292 = vmatprep.subr.bf16.mxu0 %v6750_v0  ;;  %2632 = vmatprep.subr.bf16.mxu1 %v6750_v0  ;;  %vm409_vm1 = vsmask.f32 7424  ;;  %s6751_s30 = smov 48   ;;  %v6705_v8 = vld [vmem:[%s9530_s2 + $0x18] sm:$0xff]   ;;  %s6752_s8 = smov 96   ;;  %v6706_v29 = vld [vmem:[%s9530_s2 + $0x20] sm:$0xff]  }
   0xf   : > { %s9621_s19 = smov (!%p215_p3, %s6468_s19), 1  ;;  %1293 = vmatpush1.bf16.msra.mxu0 %v6700_v1  ;;  %s6753_s9 = smov 32   ;;  %v6707_v51 = vld [vmem:[%s9530_s2 + $0x28] sm:$0xff]   ;;  %v6709_v53 = vld [vmem:[%s9530_s2 + $0x30] sm:$0xff]   ;;  %v6711_v55 = vld [vmem:[%s9530_s2 + $0x38] sm:$0xff]   ;;  %vm921_vm2 = vcmask 130048  }
  0x10   : > { %s6664_s22 = smul.u32 216, %s9621_s19  ;;  %1294 = vmatprep.subr.bf16.mxu0 %v6750_v0  ;;  %s6754_s12 = smov 80   ;;  %v6712_v61 = vld [vmem:[%s9530_s2 + $0x40] sm:$0xff]   ;;  %vm954_vm3 = vcmask 261120   ;;  %vm987_vm4 = vcmask 392192   ;;  %vm1020_vm5 = vcmask 523264  }
  0x11   : > { %s6755_s13 = smov 64   ;;  %s6756_s14 = smov 16   ;;  %vm1053_vm6 = vcmask 654336   ;;  %vm1086_vm7 = vcmask 785408   ;;  %vm1119_vm8 = vcmask 916480   ;;  %vm1718_vm9 = vcmask 1040384  }
  0x12   : > { %s6812_s27 = scalar_lea.vmem %s9528_s0, %s6664_s22  ;;  %s6757_s15 = smov 112   ;;  %vm1719_vm10 = vsmask.f32 256 }
  0x13   : > { %v6818_v4 = vld [vmem:[%s6812_s27 + $0xc] sm:$0xff]   ;;  %1295 = vmatpush1.bf16.msra.mxu0 %v6701_v2  ;;  %v6823_v5 = vld [vmem:[%s6812_s27] sm:$0xff]   ;;  %v6684_v6 = vld [vmem:[%s6812_s27 + $0x8] ss:$0 sps:$4 sm:$0x11]  }
  0x14   : > { %720 = vrot.lane.b32.xlu1 %v6818_v4, %s6751_s30  ;;  %1296 = vmatprep.subr.bf16.mxu0 %v6750_v0  ;;  %v6828_v7 = vld [vmem:[%s6812_s27 + $0x18] sm:$0xff]   ;;  %v635_v9 = vrot.slane %v6823_v5, 1  ;;  %v636_v10 = vrot.slane %v6684_v6, 1  ;;  %v6686_v11 = vld [vmem:[%s6812_s27 + $0x14] ss:$0 sps:$4 sm:$0x11]   ;;  %vm7290_vm11 = vmand %vm1718_vm9, %vm1719_vm10 }
  0x15   : > { %v638_v12 = vrot.slane %v6818_v4, 1  ;;  %v423_v13 = vshrl.u32 %v6818_v4, 16  ;;  %v425_v14 = vshll.u32 %v6818_v4, 16  ;;  %v411_v15 = vshrl.u32 %v6823_v5, 16  ;;  %v6849_v27 = vld [vmem:[%s6812_s27 + $0x24] sm:$0xff]   ;;  %v6884_v52 = vld [vmem:[%s6812_s27 + $0x30] sm:$0xff]  }
  0x16   : > { %v413_v16 = vshll.u32 %v6823_v5, 16  ;;  %v637_v17 = vsel %vm634_vm0, %v635_v9, %v636_v10  ;;  %v639_v18 = vrot.slane %v6686_v11, 1  ;;  %v430_v19 = vshll.u32 %v6686_v11, 16  ;;  %v6687_v22 = vld [vmem:[%s6812_s27 + $0x20] ss:$0 sps:$4 sm:$0x11]  }
  0x17   : > { %1297 = vmatpush1.bf16.msra.mxu0 %v6702_v3  ;;  %v418_v20 = vshll.u32 %v6684_v6, 16  ;;  %683 = vrot.lane.b32.xlu0 %v637_v17, %s6753_s9  ;;  %v427_v21 = vrot.slane %v425_v14, 1  ;;  %v437_v26 = vshll.u32 %v6828_v7, 16  ;;  %v6857_v30 = vld [vmem:[%s6812_s27 + $0x2c] ss:$0 sps:$4 sm:$0x11]  }
  0x18   : > { %839 = vrot.lane.b32.xlu1 %v6828_v7, %s6752_s8  ;;  %1298 = vmatprep.subr.bf16.mxu0 %v6750_v0  ;;  %v640_v23 = vsel %vm634_vm0, %v638_v12, %v639_v18  ;;  %v432_v24 = vrot.slane %v430_v19, 1  ;;  %v415_v25 = vrot.slane %v413_v16, 1  ;;  %v435_v32 = vshrl.u32 %v6828_v7, 16  ;;  %v6691_v54 = vld [vmem:[%s6812_s27 + $0x38] ss:$0 sps:$4 sm:$0x11]  }
  0x19   : > { %v428_v28 = vor.u32 %v427_v21, %v423_v13  ;;  %v449_v33 = vshll.u32 %v6849_v27, 16  ;;  %v420_v35 = vrot.slane %v418_v20, 1  ;;  %v439_v36 = vrot.slane %v437_v26, 1  ;;  %v6906_v60 = vld [vmem:[%s6812_s27 + $0x3c] sm:$0xff]   ;;  %v6941_v19 = vld [vmem:[%s6812_s27 + $0x48] sm:$0xff]  }
  0x1a   : > { %v416_v34 = vor.u32 %v415_v25, %v411_v15  ;;  %v442_v37 = vshll.u32 %v6687_v22, 16  ;;  %v641_v38 = vrot.slane %v6828_v7, 1  ;;  %v642_v39 = vrot.slane %v6687_v22, 1  ;;  %v6693_v1 = vld [vmem:[%s6812_s27 + $0x44] ss:$0 sps:$4 sm:$0x11]  }
  0x1b   : > { %1299 = vmatpush1.bf16.msra.mxu0 %v6705_v8  ;;  %802 = vrot.lane.b32.xlu0 %v640_v23, %s6754_s12  ;;  %v433_v31 = vsel %vm409_vm1, %v428_v28, %v432_v24  ;;  %v447_v40 = vshrl.u32 %v6849_v27, 16  ;;  %v451_v41 = vrot.slane %v449_v33, 1  ;;  %v454_v42 = vshll.u32 %v6857_v30, 16  ;;  %v6695_v20 = vld [vmem:[%s6812_s27 + $0x50] ss:$0 sps:$4 sm:$0x11]  }
  0x1c   : > { %722 = vrot.lane.b32.xlu1 %v6828_v7, %s6751_s30  ;;  %1300 = vmatprep.subr.bf16.mxu0 %v6750_v0  ;;  %v421_v43 = vsel %vm409_vm1, %v416_v34, %v420_v35  ;;  %v440_v44 = vor.u32 %v439_v36, %v435_v32  ;;  %v444_v45 = vrot.slane %v442_v37, 1  ;;  %v643_v46 = vsel %vm634_vm0, %v641_v38, %v642_v39 }
  0x1d   : > { %v452_v47 = vor.u32 %v451_v41, %v447_v40  ;;  %v456_v48 = vrot.slane %v454_v42, 1  ;;  %v461_v56 = vshll.u32 %v6884_v52, 16  ;;  %6521 = vmatprep.mubr.msk.bf16.mxu0 %vm921_vm2, %v643_v46  ;;  %v644_v57 = vrot.slane %v6849_v27, 1 }
  0x1e   : > { %v445_v49 = vsel %vm409_vm1, %v440_v44, %v444_v45  ;;  %v645_v58 = vrot.slane %v6857_v30, 1  ;;  %v459_v59 = vshrl.u32 %v6884_v52, 16  ;;  %v466_v63 = vshll.u32 %v6691_v54, 16  ;;  %v6985_v44 = vld [vmem:[%s6812_s27 + $0x60] sm:$0xff]  }
  0x1f   : > { %1301 = vmatpush1.bf16.msra.mxu0 %v6706_v29  ;;  %685 = vrot.lane.b32.xlu0 %v640_v23, %s6753_s9  ;;  %v457_v50 = vsel %vm409_vm1, %v452_v47, %v456_v48  ;;  %v463_v62 = vrot.slane %v461_v56, 1  ;;  %v473_v2 = vshll.u32 %v6906_v60, 16  ;;  %v647_v9 = vrot.slane %v6884_v52, 1  ;;  %v6953_v23 = vld [vmem:[%s6812_s27 + $0x54] sm:$0xff]   ;;  %v6997_v48 = vld [vmem:[%s6812_s27 + $0x6c] sm:$0xff]  }
  0x20   : > { %767 = vrot.lane.b32.xlu1 %v433_v31, %s6755_s13  ;;  %1302 = vmatprep.subr.bf16.mxu0 %v6750_v0  ;;  %v6919_v3 = vsel %vm634_vm0, %v644_v57, %v645_v58  ;;  %v468_v8 = vrot.slane %v466_v63, 1  ;;  %v648_v10 = vrot.slane %v6691_v54, 1  ;;  %v471_v11 = vshrl.u32 %v6906_v60, 16  ;;  %v6697_v29 = vld [vmem:[%s6812_s27 + $0x5c] ss:$0 sps:$4 sm:$0x11]  }
  0x21   : > { %v464_v6 = vor.u32 %v463_v62, %v459_v59  ;;  %v475_v12 = vrot.slane %v473_v2, 1  ;;  %v478_v13 = vshll.u32 %v6693_v1, 16  ;;  %v485_v21 = vshll.u32 %v6941_v19, 16  ;;  %v6699_v45 = vld [vmem:[%s6812_s27 + $0x68] ss:$0 sps:$4 sm:$0x11]  }
  0x22   : > { %v6931_v15 = vsel %vm634_vm0, %v647_v9, %v648_v10  ;;  %v650_v22 = vrot.slane %v6906_v60, 1  ;;  %v651_v24 = vrot.slane %v6693_v1, 1  ;;  %v483_v25 = vshrl.u32 %v6941_v19, 16  ;;  %v6704_v54 = vld [vmem:[%s6812_s27 + $0x74] ss:$0 sps:$4 sm:$0x11]  }
  0x23   : > { %602 = vrot.lane.b32.xlu0 %v421_v43, %s6756_s14  ;;  %1303 = vmatpush1.bf16.msra.mxu0 %v6707_v51  ;;  %v469_v14 = vsel %vm409_vm1, %v464_v6, %v468_v8  ;;  %v476_v16 = vor.u32 %v475_v12, %v471_v11  ;;  %v480_v17 = vrot.slane %v478_v13, 1  ;;  %v487_v26 = vrot.slane %v485_v21, 1  ;;  %v7029_v11 = vld [vmem:[%s6812_s27 + $0x78] sm:$0xff]   ;;  %v6710_v13 = vld [vmem:[%s6812_s27 + $0x80] ss:$0 sps:$4 sm:$0x11]  }
  0x24   : > { %604 = vrot.lane.b32.xlu1 %v433_v31, %s6756_s14  ;;  %1304 = vmatprep.subr.bf16.mxu0 %v6750_v0  ;;  %v490_v28 = vshll.u32 %v6695_v20, 16  ;;  %v497_v30 = vshll.u32 %v6953_v23, 16  ;;  %v6963_v31 = vsel %vm634_vm0, %v650_v22, %v651_v24  ;;  %v653_v34 = vrot.slane %v6941_v19, 1 }
  0x25   : > { %v481_v18 = vsel %vm409_vm1, %v476_v16, %v480_v17  ;;  %v488_v32 = vor.u32 %v487_v26, %v483_v25  ;;  %v654_v35 = vrot.slane %v6695_v20, 1  ;;  %v495_v36 = vshrl.u32 %v6953_v23, 16  ;;  %v7041_v17 = vld [vmem:[%s6812_s27 + $0x84] sm:$0xff]   ;;  %v7049_v26 = vld [vmem:[%s6812_s27 + $0x8c] ss:$0 sps:$4 sm:$0x11]  }
  0x26   : > { %v492_v33 = vrot.slane %v490_v28, 1  ;;  %v499_v37 = vrot.slane %v497_v30, 1  ;;  %v502_v38 = vshll.u32 %v6697_v29, 16  ;;  %v656_v47 = vrot.slane %v6953_v23, 1 }
  0x27   : > { %886 = vrot.lane.b32.xlu0 %v445_v49, %s6757_s15  ;;  %1305 = vmatpush1.bf16.msra.mxu0 %v6709_v53  ;;  %v6975_v40 = vsel %vm634_vm0, %v653_v34, %v654_v35  ;;  %v514_v53 = vshll.u32 %v6699_v45, 16  ;;  %v659_v59 = vrot.slane %v6985_v44, 1  ;;  %v519_v62 = vshrl.u32 %v6997_v48, 16 }
  0x28   : > { %804 = vrot.lane.b32.xlu1 %v643_v46, %s6754_s12  ;;  %1306 = vmatprep.subr.bf16.mxu0 %v6750_v0  ;;  %v493_v39 = vsel %vm409_vm1, %v488_v32, %v492_v33  ;;  %v500_v41 = vor.u32 %v499_v37, %v495_v36  ;;  %v504_v42 = vrot.slane %v502_v38, 1  ;;  %v526_v1 = vshll.u32 %v6704_v54, 16 }
  0x29   : > { %v516_v58 = vrot.slane %v514_v53, 1  ;;  %v662_v16 = vrot.slane %v6997_v48, 1  ;;  %v663_v20 = vrot.slane %v6704_v54, 1  ;;  %v531_v21 = vshrl.u32 %v7029_v11, 16 }
  0x2a   : > { %v505_v43 = vsel %vm409_vm1, %v500_v41, %v504_v42  ;;  %v528_v9 = vrot.slane %v526_v1, 1  ;;  %v538_v24 = vshll.u32 %v6710_v13, 16  ;;  %v545_v28 = vshll.u32 %v7041_v17, 16 }
  0x2b   : > { %769 = vrot.lane.b32.xlu0 %v445_v49, %s6755_s13  ;;  %1307 = vmatpush1.bf16.msra.mxu0 %v6711_v55  ;;  %v521_v55 = vshll.u32 %v6997_v48, 16  ;;  %v7053_v30 = vsel %vm634_vm0, %v662_v16, %v663_v20  ;;  %v665_v35 = vrot.slane %v7029_v11, 1  ;;  %v666_v36 = vrot.slane %v6710_v13, 1  ;;  %v6716_v13 = vld [vmem:[%s6812_s27 + $0x98] ss:$0 sps:$4 sm:$0x11]  }
  0x2c   : > { %888 = vrot.lane.b32.xlu1 %v457_v50, %s6757_s15  ;;  %1308 = vmatprep.subr.bf16.mxu0 %v6750_v0  ;;  %v540_v33 = vrot.slane %v538_v24, 1  ;;  %v543_v37 = vshrl.u32 %v7041_v17, 16  ;;  %v547_v38 = vrot.slane %v545_v28, 1 }
  0x2d   : > { %v523_v63 = vrot.slane %v521_v55, 1 }
  0x2f   : > { %841 = vrot.lane.b32.xlu0 %v6849_v27, %s6752_s8  ;;  %1309 = vmatpush1.bf16.msra.mxu0 %v6712_v61  ;;  %v660_v61 = vrot.slane %v6699_v45, 1  ;;  %v524_v8 = vor.u32 %v523_v63, %v519_v62  ;;  %v7066_v45 = vsel %vm634_vm0, %v665_v35, %v666_v36 }
  0x30   : > { %687 = vrot.lane.b32.xlu1 %v643_v46, %s6753_s9  ;;  %v509_v46 = vshll.u32 %v6985_v44, 16 }
  0x31   : > { %v7019_v6 = vsel %vm634_vm0, %v659_v59, %v660_v61  ;;  %v529_v10 = vsel %vm409_vm1, %v524_v8, %v528_v9 }
  0x32   : > { %v511_v51 = vrot.slane %v509_v46, 1  ;;  %v548_v46 = vor.u32 %v547_v38, %v543_v37 }
  0x33   : > { %606 = vrot.lane.b32.xlu0 %v445_v49, %s6756_s14  ;;  %v657_v49 = vrot.slane %v6697_v29, 1 }
  0x34   : > { %771 = vrot.lane.b32.xlu1 %v457_v50, %s6755_s13 }
  0x35   : > { %v7007_v56 = vsel %vm634_vm0, %v656_v47, %v657_v49 }
  0x37   : > { %724 = vrot.lane.b32.xlu0 %v6849_v27, %s6751_s30 }
  0x38   : > { %843 = vrot.lane.b32.xlu1 %v6884_v52, %s6752_s8 }
  0x3b   : > { %806 = vrot.lane.b32.xlu0 %v6919_v3, %s6754_s12 }
  0x3c   : > { %608 = vrot.lane.b32.xlu1 %v457_v50, %s6756_s14  ;;  %v507_v50 = vshrl.u32 %v6985_v44, 16 }
  0x3e   : > { %v512_v57 = vor.u32 %v511_v51, %v507_v50 }
  0x3f   : > { %890 = vrot.lane.b32.xlu0 %v469_v14, %s6757_s15 }
  0x40   : > { %726 = vrot.lane.b32.xlu1 %v6884_v52, %s6751_s30  ;;  %v517_v2 = vsel %vm409_vm1, %v512_v57, %v516_v58 }
  0x43   : > { %689 = vrot.lane.b32.xlu0 %v6919_v3, %s6753_s9 }
  0x44   : > { %808 = vrot.lane.b32.xlu1 %v6931_v15, %s6754_s12 }
  0x47   : > { %773 = vrot.lane.b32.xlu0 %v469_v14, %s6755_s13 }
  0x48   : > { %892 = vrot.lane.b32.xlu1 %v481_v18, %s6757_s15 }
  0x4b   : > { %845 = vrot.lane.b32.xlu0 %v6906_v60, %s6752_s8 }
  0x4c   : > { %691 = vrot.lane.b32.xlu1 %v6931_v15, %s6753_s9 }
  0x4f   : > { %610 = vrot.lane.b32.xlu0 %v469_v14, %s6756_s14  ;;  %v533_v14 = vshll.u32 %v7029_v11, 16 }
  0x50   : > { %775 = vrot.lane.b32.xlu1 %v481_v18, %s6755_s13 }
  0x51   : > { %v535_v22 = vrot.slane %v533_v14, 1 }
  0x53   : > { %728 = vrot.lane.b32.xlu0 %v6906_v60, %s6751_s30  ;;  %v536_v32 = vor.u32 %v535_v22, %v531_v21  ;;  %v7106_v22 = vld [vmem:[%s6812_s27 + $0x9c] sm:$0xff]  }
  0x54   : > { %847 = vrot.lane.b32.xlu1 %v6941_v19, %s6752_s8  ;;  %v569_v36 = vshll.u32 %v7106_v22, 16 }
  0x55   : > { %v541_v42 = vsel %vm409_vm1, %v536_v32, %v540_v33  ;;  %v562_v32 = vshll.u32 %v6716_v13, 16 }
  0x57   : > { %810 = vrot.lane.b32.xlu0 %v6963_v31, %s6754_s12 }
  0x58   : > { %612 = vrot.lane.b32.xlu1 %v481_v18, %s6756_s14 }
  0x5b   : > { %894 = vrot.lane.b32.xlu0 %v493_v39, %s6757_s15 }
  0x5c   : > { %730 = vrot.lane.b32.xlu1 %v6941_v19, %s6751_s30 }
  0x5f   : > { %693 = vrot.lane.b32.xlu0 %v6963_v31, %s6753_s9 }
  0x60   : > { %812 = vrot.lane.b32.xlu1 %v6975_v40, %s6754_s12 }
  0x63   : > { %777 = vrot.lane.b32.xlu0 %v493_v39, %s6755_s13 }
  0x64   : > { %896 = vrot.lane.b32.xlu1 %v505_v43, %s6757_s15 }
  0x67   : > { %849 = vrot.lane.b32.xlu0 %v6953_v23, %s6752_s8 }
  0x68   : > { %695 = vrot.lane.b32.xlu1 %v6975_v40, %s6753_s9 }
  0x6b   : > { %614 = vrot.lane.b32.xlu0 %v493_v39, %s6756_s14  ;;  %v550_v39 = vshll.u32 %v7049_v26, 16 }
  0x6c   : > { %779 = vrot.lane.b32.xlu1 %v505_v43, %s6755_s13 }
  0x6d   : > { %v552_v47 = vrot.slane %v550_v39, 1  ;;  %v564_v39 = vrot.slane %v562_v32, 1 }
  0x6f   : > { %732 = vrot.lane.b32.xlu0 %v6953_v23, %s6751_s30  ;;  %v553_v55 = vsel %vm409_vm1, %v548_v46, %v552_v47  ;;  %v567_v46 = vshrl.u32 %v7106_v22, 16  ;;  %v571_v47 = vrot.slane %v569_v36, 1 }
  0x70   : > { %851 = vrot.lane.b32.xlu1 %v6985_v44, %s6752_s8 }
  0x73   : > { %814 = vrot.lane.b32.xlu0 %v7007_v56, %s6754_s12 }
  0x74   : > { %616 = vrot.lane.b32.xlu1 %v505_v43, %s6756_s14 }
  0x77   : > { %898 = vrot.lane.b32.xlu0 %v517_v2, %s6757_s15 }
  0x78   : > { %734 = vrot.lane.b32.xlu1 %v6985_v44, %s6751_s30 }
  0x7b   : > { %697 = vrot.lane.b32.xlu0 %v7007_v56, %s6753_s9 }
  0x7c   : > { %816 = vrot.lane.b32.xlu1 %v7019_v6, %s6754_s12 }
  0x7f   : > { %781 = vrot.lane.b32.xlu0 %v517_v2, %s6755_s13 }
  0x80   : > { %900 = vrot.lane.b32.xlu1 %v529_v10, %s6757_s15 }
  0x83   : > { %853 = vrot.lane.b32.xlu0 %v6997_v48, %s6752_s8 }
  0x84   : > { %699 = vrot.lane.b32.xlu1 %v7019_v6, %s6753_s9 }
  0x86   : > { %v721_v12 = vpop.permute.xlu1 %720 }
  0x87   : > { %618 = vrot.lane.b32.xlu0 %v517_v2, %s6756_s14  ;;  %v7087_v2 = vld [vmem:[%s6812_s27 + $0x90] sm:$0xff]  }
  0x88   : > { %783 = vrot.lane.b32.xlu1 %v529_v10, %s6755_s13  ;;  %v557_v14 = vshll.u32 %v7087_v2, 16  ;;  %v555_v28 = vshrl.u32 %v7087_v2, 16 }
  0x89   : > { %v684_v25 = vpop.permute.xlu0 %683 }
  0x8a   : > { %v840_v18 = vpop.permute.xlu1 %839 }
  0x8b   : > { %736 = vrot.lane.b32.xlu0 %v6997_v48, %s6751_s30 }
  0x8c   : > { %855 = vrot.lane.b32.xlu1 %v7029_v11, %s6752_s8 }
  0x8d   : > { %v803_v34 = vpop.permute.xlu0 %802 }
  0x8e   : > { %v723_v29 = vpop.permute.xlu1 %722 }
  0x8f   : > { %818 = vrot.lane.b32.xlu0 %v7053_v30, %s6754_s12 }
  0x90   : > { %620 = vrot.lane.b32.xlu1 %v529_v10, %s6756_s14 }
  0x91   : > { %v686_v43 = vpop.permute.xlu0 %685 }
  0x92   : > { %v768_v41 = vpop.permute.xlu1 %767 }
  0x93   : > { %902 = vrot.lane.b32.xlu0 %v541_v42, %s6757_s15 }
  0x94   : > { %738 = vrot.lane.b32.xlu1 %v7029_v11, %s6751_s30 }
  0x95   : > { %v603_v50 = vpop.permute.xlu0 %602 }
  0x96   : > { %v605_v49 = vpop.permute.xlu1 %604  ;;  %v923_v51 = vsel %vm921_vm2, %v6823_v5, %v603_v50 }
  0x97   : > { %v956_v53 = vsel %vm954_vm3, %v923_v51, %v684_v25  ;;  %v925_v54 = vsel %vm921_vm2, %v6818_v4, %v605_v49  ;;  %701 = vrot.lane.b32.xlu0 %v7053_v30, %s6753_s9  ;;  %v669_v25 = vrot.slane %v7049_v26, 1  ;;  %v7120_v26 = vld [vmem:[%s6812_s27 + $0xa4] ss:$0 sps:$4 sm:$0x11]  }
  0x98   : > { %820 = vrot.lane.b32.xlu1 %v7066_v45, %s6754_s12  ;;  %v989_v57 = vsel %vm987_vm4, %v956_v53, %v721_v12  ;;  %v958_v61 = vsel %vm954_vm3, %v925_v54, %v686_v43  ;;  %v672_v43 = vrot.slane %v6716_v13, 1  ;;  %v574_v49 = vshll.u32 %v7120_v26, 16  ;;  %v7158_v13 = vld [vmem:[%s6812_s27 + $0xa8] sm:$0xff]  }
  0x99   : > { %v887_v58 = vpop.permute.xlu0 %886  ;;  %v1022_v59 = vsel %vm1020_vm5, %v989_v57, %v768_v41  ;;  %v991_v8 = vsel %vm987_vm4, %v958_v61, %v723_v29  ;;  %v559_v29 = vrot.slane %v557_v14, 1 }
  0x9a   : > { %v805_v5 = vpop.permute.xlu1 %804  ;;  %v1055_v4 = vsel %vm1053_vm6, %v1022_v59, %v803_v34 }
  0x9b   : > { %785 = vrot.lane.b32.xlu0 %v541_v42, %s6755_s13  ;;  %v1088_v62 = vsel %vm1086_vm7, %v1055_v4, %v840_v18 }
  0x9c   : > { %904 = vrot.lane.b32.xlu1 %v553_v55, %s6757_s15  ;;  %v1121_v63 = vsel %vm1119_vm8, %v1088_v62, %v887_v58  ;;  %v576_v58 = vrot.slane %v574_v49, 1 }
  0x9d   : > { %1325 = vmatmul.mubr.bf16.vlgmr.msra.gmra.mrb[0].mxu0 %v1121_v63  ;;  %v770_v9 = vpop.permute.xlu0 %769 }
  0x9e   : > { %v889_v1 = vpop.permute.xlu1 %888  ;;  %v1024_v10 = vsel %vm1020_vm5, %v991_v8, %v770_v9  ;;  %6522 = vmatprep.mubr.msk.bf16.mxu0 %vm921_vm2, %v6919_v3  ;;  %v668_v3 = vrot.slane %v7041_v17, 1 }
  0x9f   : > { %857 = vrot.lane.b32.xlu0 %v7041_v17, %s6752_s8  ;;  %v1057_v16 = vsel %vm1053_vm6, %v1024_v10, %v805_v5  ;;  %v572_v5 = vor.u32 %v571_v47, %v567_v46  ;;  %v677_v47 = vrot.slane %v7158_v13, 1 }
  0xa0   : > { %703 = vrot.lane.b32.xlu1 %v7066_v45, %s6753_s9  ;;  %v7124_v37 = vsel %vm634_vm0, %v668_v3, %v669_v25 }
  0xa1   : > { %v842_v18 = vpop.permute.xlu0 %841 }
  0xa2   : > { %v688_v12 = vpop.permute.xlu1 %687  ;;  %v1090_v20 = vsel %vm1086_vm7, %v1057_v16, %v842_v18  ;;  %v6720_v18 = vld [vmem:[%s6812_s27 + $0xb0] ss:$0 sps:$4 sm:$0x11]  }
  0xa3   : > { %622 = vrot.lane.b32.xlu0 %v541_v42, %s6756_s14  ;;  %v1124_v21 = vsel %vm1119_vm8, %v1090_v20, %v889_v1  ;;  %v577_v1 = vsel %vm409_vm1, %v572_v5, %v576_v58  ;;  %v581_v20 = vshll.u32 %v7158_v13, 16  ;;  %v586_v36 = vshll.u32 %v6720_v18, 16 }
  0xa4   : > { %787 = vrot.lane.b32.xlu1 %v553_v55, %s6755_s13  ;;  %v678_v49 = vrot.slane %v6720_v18, 1  ;;  %v6723_v18 = vld [vmem:[%s6812_s27 + $0xc0] sm:$0xff]  }
  0xa5   : > { %1333 = vmatmul.mubr.bf16.gmra.mrb[4].mxu0 %v1124_v21  ;;  %v607_v33 = vpop.permute.xlu0 %606 }
  0xa6   : > { %v772_v24 = vpop.permute.xlu1 %771  ;;  %v927_v34 = vsel %vm921_vm2, %v6828_v7, %v607_v33  ;;  %6523 = vmatprep.mubr.msk.bf16.mxu0 %vm921_vm2, %v6931_v15  ;;  %v560_v7 = vor.u32 %v559_v29, %v555_v28  ;;  %v671_v15 = vrot.slane %v7087_v2, 1  ;;  %v674_v28 = vrot.slane %v7106_v22, 1  ;;  %v7174_v29 = vld [vmem:[%s6812_s27 + $0xb4] sm:$0xff]  }
  0xa7   : > { %v960_v35 = vsel %vm954_vm3, %v927_v34, %v688_v12  ;;  %740 = vrot.lane.b32.xlu0 %v7041_v17, %s6751_s30  ;;  %v675_v33 = vrot.slane %v7120_v26, 1  ;;  %v579_v34 = vshrl.u32 %v7158_v13, 16  ;;  %v7188_v26 = vld [vmem:[%s6812_s27 + $0xbc] ss:$0 sps:$4 sm:$0x11]  }
  0xa8   : > { %859 = vrot.lane.b32.xlu1 %v7087_v2, %s6752_s8  ;;  %v565_v50 = vsel %vm409_vm1, %v560_v7, %v564_v39 }
  0xa9   : > { %v725_v41 = vpop.permute.xlu0 %724 }
  0xaa   : > { %v844_v38 = vpop.permute.xlu1 %843  ;;  %v993_v42 = vsel %vm987_vm4, %v960_v35, %v725_v41  ;;  %v583_v35 = vrot.slane %v581_v20, 1  ;;  %v593_v41 = vshll.u32 %v7174_v29, 16 }
  0xab   : > { %822 = vrot.lane.b32.xlu0 %v7124_v37, %s6754_s12  ;;  %v1026_v53 = vsel %vm1020_vm5, %v993_v42, %v772_v24  ;;  %v7192_v42 = vsel %vm634_vm0, %v674_v28, %v675_v33 }
  0xac   : > { %624 = vrot.lane.b32.xlu1 %v553_v55, %s6756_s14  ;;  %v7140_v55 = vsel %vm634_vm0, %v671_v15, %v672_v43  ;;  %v588_v43 = vrot.slane %v586_v36, 1 }
  0xad   : > { %v807_v54 = vpop.permute.xlu0 %806 }
  0xae   : > { %v609_v51 = vpop.permute.xlu1 %608  ;;  %v1059_v57 = vsel %vm1053_vm6, %v1026_v53, %v807_v54  ;;  %v598_v53 = vshll.u32 %v7188_v26, 16 }
  0xaf   : > { %906 = vrot.lane.b32.xlu0 %v565_v50, %s6757_s15  ;;  %v1092_v61 = vsel %vm1086_vm7, %v1059_v57, %v844_v38  ;;  %v929_v63 = vsel %vm921_vm2, %v6849_v27, %v609_v51  ;;  %v595_v51 = vrot.slane %v593_v41, 1 }
  0xb0   : > { %742 = vrot.lane.b32.xlu1 %v7087_v2, %s6751_s30 }
  0xb1   : > { %v891_v4 = vpop.permute.xlu0 %890 }
  0xb2   : > { %v727_v59 = vpop.permute.xlu1 %726  ;;  %v1127_v62 = vsel %vm1119_vm8, %v1092_v61, %v891_v4  ;;  %v7208_v61 = vsel %vm634_vm0, %v677_v47, %v678_v49 }
  0xb3   : > { %705 = vrot.lane.b32.xlu0 %v7124_v37, %s6753_s9  ;;  %1341 = vmatmul.mubr.bf16.gmra.mrb[8].mxu0 %v1127_v62  ;;  %v600_v62 = vrot.slane %v598_v53, 1 }
  0xb4   : > { %824 = vrot.lane.b32.xlu1 %v7140_v55, %s6754_s12  ;;  %6524 = vmatprep.mubr.msk.bf16.mxu0 %vm921_vm2, %v6963_v31 }
  0xb5   : > { %v690_v9 = vpop.permute.xlu0 %689 }
  0xb6   : > { %v809_v8 = vpop.permute.xlu1 %808  ;;  %v962_v10 = vsel %vm954_vm3, %v929_v63, %v690_v9 }
  0xb7   : > { %v995_v12 = vsel %vm987_vm4, %v962_v10, %v727_v59  ;;  %789 = vrot.lane.b32.xlu0 %v565_v50, %s6755_s13 }
  0xb8   : > { %908 = vrot.lane.b32.xlu1 %v577_v1, %s6757_s15 }
  0xb9   : > { %v774_v14 = vpop.permute.xlu0 %773 }
  0xba   : > { %v893_v27 = vpop.permute.xlu1 %892  ;;  %v1028_v16 = vsel %vm1020_vm5, %v995_v12, %v774_v14 }
  0xbb   : > { %861 = vrot.lane.b32.xlu0 %v7106_v22, %s6752_s8  ;;  %v1061_v21 = vsel %vm1053_vm6, %v1028_v16, %v809_v8 }
  0xbc   : > { %707 = vrot.lane.b32.xlu1 %v7140_v55, %s6753_s9 }
  0xbd   : > { %v846_v3 = vpop.permute.xlu0 %845 }
  0xbe   : > { %v692_v31 = vpop.permute.xlu1 %691  ;;  %v1094_v24 = vsel %vm1086_vm7, %v1061_v21, %v846_v3  ;;  %v6724_v3 = vld [vmem:[%s6812_s27 + $0xc8] ss:$0 sps:$4 sm:$0x11]  }
  0xbf   : > { %626 = vrot.lane.b32.xlu0 %v565_v50, %s6756_s14  ;;  %v1130_v25 = vsel %vm1119_vm8, %v1094_v24, %v893_v27  ;;  %v591_v50 = vshrl.u32 %v7174_v29, 16  ;;  %v758_v24 = vshll.u32 %v6723_v18, 16  ;;  %v763_v41 = vshll.u32 %v6724_v3, 16 }
  0xc0   : > { %791 = vrot.lane.b32.xlu1 %v577_v1, %s6755_s13  ;;  %1349 = vmatmul.mubr.bf16.gmra.mrb[12].mxu0 %v1130_v25  ;;  %v800_v53 = vrot.slane %v6724_v3, 1 }
  0xc1   : > { %v611_v38 = vpop.permute.xlu0 %610  ;;  %6525 = vmatprep.mubr.msk.bf16.mxu0 %vm921_vm2, %v6975_v40  ;;  %v584_v40 = vor.u32 %v583_v35, %v579_v34  ;;  %v596_v4 = vor.u32 %v595_v51, %v591_v50  ;;  %v680_v34 = vrot.slane %v7174_v29, 1  ;;  %v7239_v35 = vld [vmem:[%s6812_s27 + $0xcc] sm:$0xff]   ;;  %v799_v51 = vrot.slane %v6723_v18, 1 }
  0xc2   : > { %v776_v32 = vpop.permute.xlu1 %775  ;;  %v931_v7 = vsel %vm921_vm2, %v6884_v52, %v611_v38  ;;  %v681_v38 = vrot.slane %v7188_v26, 1  ;;  %v877_v26 = vshll.u32 %v7239_v35, 16 }
  0xc3   : > { %v964_v39 = vsel %vm954_vm3, %v931_v7, %v692_v31  ;;  %744 = vrot.lane.b32.xlu0 %v7106_v22, %s6751_s30  ;;  %v589_v54 = vsel %vm409_vm1, %v584_v40, %v588_v43  ;;  %v601_v12 = vsel %vm409_vm1, %v596_v4, %v600_v62  ;;  %v756_v7 = vshrl.u32 %v6723_v18, 16 }
  0xc4   : > { %863 = vrot.lane.b32.xlu1 %v7158_v13, %s6752_s8 }
  0xc5   : > { %v729_v46 = vpop.permute.xlu0 %728 }
  0xc6   : > { %v848_v15 = vpop.permute.xlu1 %847  ;;  %v997_v52 = vsel %vm987_vm4, %v964_v39, %v729_v46  ;;  %v760_v39 = vrot.slane %v758_v24, 1  ;;  %v7251_v46 = vld [vmem:[%s6812_s27 + $0xd4] ss:$0 sps:$4 sm:$0x11]  }
  0xc7   : > { %826 = vrot.lane.b32.xlu0 %v7192_v42, %s6754_s12  ;;  %v1030_v5 = vsel %vm1020_vm5, %v997_v52, %v776_v32  ;;  %v7255_v52 = vsel %vm634_vm0, %v680_v34, %v681_v38 }
  0xc8   : > { %628 = vrot.lane.b32.xlu1 %v577_v1, %s6756_s14  ;;  %v761_v49 = vor.u32 %v760_v39, %v756_v7 }
  0xc9   : > { %v811_v58 = vpop.permute.xlu0 %810 }
  0xca   : > { %v613_v57 = vpop.permute.xlu1 %612  ;;  %v1063_v59 = vsel %vm1053_vm6, %v1030_v5, %v811_v58  ;;  %v882_v5 = vshll.u32 %v7251_v46, 16 }
  0xcb   : > { %910 = vrot.lane.b32.xlu0 %v589_v54, %s6757_s15  ;;  %v1096_v1 = vsel %vm1086_vm7, %v1063_v59, %v848_v15  ;;  %v933_v10 = vsel %vm921_vm2, %v6906_v60, %v613_v57  ;;  %v879_v57 = vrot.slane %v877_v26, 1 }
  0xcc   : > { %746 = vrot.lane.b32.xlu1 %v7158_v13, %s6751_s30 }
  0xcd   : > { %v895_v8 = vpop.permute.xlu0 %894 }
  0xce   : > { %v731_v63 = vpop.permute.xlu1 %730  ;;  %v1133_v9 = vsel %vm1119_vm8, %v1096_v1, %v895_v8  ;;  %v7269_v1 = vsel %vm634_vm0, %v799_v51, %v800_v53 }
  0xcf   : > { %709 = vrot.lane.b32.xlu0 %v7192_v42, %s6753_s9  ;;  %1357 = vmatmul.mubr.bf16.gmra.mrb[16].mxu0 %v1133_v9  ;;  %v884_v9 = vrot.slane %v882_v5, 1 }
  0xd0   : > { %828 = vrot.lane.b32.xlu1 %v7208_v61, %s6754_s12  ;;  %6526 = vmatprep.mubr.msk.bf16.mxu0 %vm921_vm2, %v7007_v56 }
  0xd1   : > { %v694_v14 = vpop.permute.xlu0 %693 }
  0xd2   : > { %v813_v27 = vpop.permute.xlu1 %812  ;;  %v966_v16 = vsel %vm954_vm3, %v933_v10, %v694_v14 }
  0xd3   : > { %v999_v31 = vsel %vm987_vm4, %v966_v16, %v731_v63  ;;  %793 = vrot.lane.b32.xlu0 %v589_v54, %s6755_s13 }
  0xd4   : > { %912 = vrot.lane.b32.xlu1 %v601_v12, %s6757_s15 }
  0xd5   : > { %v778_v20 = vpop.permute.xlu0 %777 }
  0xd6   : > { %v897_v60 = vpop.permute.xlu1 %896  ;;  %v1032_v21 = vsel %vm1020_vm5, %v999_v31, %v778_v20 }
  0xd7   : > { %865 = vrot.lane.b32.xlu0 %v7174_v29, %s6752_s8  ;;  %v1065_v25 = vsel %vm1053_vm6, %v1032_v21, %v813_v27 }
  0xd8   : > { %711 = vrot.lane.b32.xlu1 %v7208_v61, %s6753_s9 }
  0xd9   : > { %v850_v28 = vpop.permute.xlu0 %849 }
  0xda   : > { %v696_v56 = vpop.permute.xlu1 %695  ;;  %v1098_v32 = vsel %vm1086_vm7, %v1065_v25, %v850_v28 }
  0xdb   : > { %630 = vrot.lane.b32.xlu0 %v589_v54, %s6756_s14  ;;  %v1136_v33 = vsel %vm1119_vm8, %v1098_v32, %v897_v60  ;;  %v875_v54 = vshrl.u32 %v7239_v35, 16 }
  0xdc   : > { %795 = vrot.lane.b32.xlu1 %v601_v12, %s6755_s13  ;;  %1365 = vmatmul.mubr.bf16.gmra.mrb[20].mxu0 %v1136_v33 }
  0xdd   : > { %v615_v15 = vpop.permute.xlu0 %614  ;;  %6527 = vmatprep.mubr.msk.bf16.mxu0 %vm921_vm2, %v7019_v6  ;;  %v765_v6 = vrot.slane %v763_v41, 1  ;;  %v880_v8 = vor.u32 %v879_v57, %v875_v54 }
  0xde   : > { %v780_v36 = vpop.permute.xlu1 %779  ;;  %v935_v40 = vsel %vm921_vm2, %v6941_v19, %v615_v15 }
  0xdf   : > { %v968_v43 = vsel %vm954_vm3, %v935_v40, %v696_v56  ;;  %748 = vrot.lane.b32.xlu0 %v7174_v29, %s6751_s30  ;;  %v766_v58 = vsel %vm409_vm1, %v761_v49, %v765_v6  ;;  %v885_v31 = vsel %vm409_vm1, %v880_v8, %v884_v9 }
  0xe0   : > { %867 = vrot.lane.b32.xlu1 %v6723_v18, %s6752_s8 }
  0xe1   : > { %v733_v50 = vpop.permute.xlu0 %732 }
  0xe2   : > { %v852_v47 = vpop.permute.xlu1 %851  ;;  %v1001_v19 = vsel %vm987_vm4, %v968_v43, %v733_v50 }
  0xe3   : > { %830 = vrot.lane.b32.xlu0 %v7255_v52, %s6754_s12  ;;  %v1034_v4 = vsel %vm1020_vm5, %v1001_v19, %v780_v36 }
  0xe4   : > { %632 = vrot.lane.b32.xlu1 %v601_v12, %s6756_s14 }
  0xe5   : > { %v815_v62 = vpop.permute.xlu0 %814 }
  0xe6   : > { %v617_v59 = vpop.permute.xlu1 %616  ;;  %v1067_v63 = vsel %vm1053_vm6, %v1034_v4, %v815_v62 }
  0xe7   : > { %914 = vrot.lane.b32.xlu0 %v766_v58, %s6757_s15  ;;  %v1100_v12 = vsel %vm1086_vm7, %v1067_v63, %v852_v47  ;;  %v937_v16 = vsel %vm921_vm2, %v6953_v23, %v617_v59 }
  0xe8   : > { %750 = vrot.lane.b32.xlu1 %v6723_v18, %s6751_s30 }
  0xe9   : > { %v899_v27 = vpop.permute.xlu0 %898 }
  0xea   : > { %v735_v10 = vpop.permute.xlu1 %734  ;;  %v1139_v14 = vsel %vm1119_vm8, %v1100_v12, %v899_v27 }
  0xeb   : > { %713 = vrot.lane.b32.xlu0 %v7255_v52, %s6753_s9  ;;  %1373 = vmatmul.mubr.bf16.gmra.mrb[24].mxu0 %v1139_v14 }
  0xec   : > { %832 = vrot.lane.b32.xlu1 %v7269_v1, %s6754_s12  ;;  %6528 = vmatprep.mubr.msk.bf16.mxu0 %vm921_vm2, %v7053_v30  ;;  %v1568_v30 = vrot.slane %v6750_v0, 7 }
  0xed   : > { %v698_v18 = vpop.permute.xlu0 %697 }
  0xee   : > { %v817_v60 = vpop.permute.xlu1 %816  ;;  %v970_v20 = vsel %vm954_vm3, %v937_v16, %v698_v18  ;;  %v7297_v33 = vsel %vm7290_vm11, 0, %v1568_v30  ;;  %v1738_v7 = vsel %vm7290_vm11, %v1568_v30, 0 }
  0xef   : > { %v1003_v21 = vsel %vm987_vm4, %v970_v20, %v735_v10  ;;  %797 = vrot.lane.b32.xlu0 %v766_v58, %s6755_s13  ;;  %v1758_v36 = vshll.u32 %v7297_v33, 16  ;;  %v1756_v41 = vshrl.u32 %v7297_v33, 16  ;;  %v1763_v40 = vshll.u32 %v1738_v7, 16 }
  0xf0   : > { %916 = vrot.lane.b32.xlu1 %v885_v31, %s6757_s15  ;;  %v2011_v53 = vrot.slane %v7297_v33, 1  ;;  %v2012_v54 = vrot.slane %v1738_v7, 1 }
  0xf1   : > { %v782_v56 = vpop.permute.xlu0 %781  ;;  %v1760_v15 = vrot.slane %v1758_v36, 1  ;;  %v1765_v49 = vrot.slane %v1763_v40, 1 }
  0xf2   : > { %v901_v23 = vpop.permute.xlu1 %900  ;;  %v1036_v3 = vsel %vm1020_vm5, %v1003_v21, %v782_v56  ;;  %v7318_v57 = vsel %vm634_vm0, %v2011_v53, %v2012_v54 }
  0xf3   : > { %869 = vrot.lane.b32.xlu0 %v7239_v35, %s6752_s8  ;;  %v1069_v28 = vsel %vm1053_vm6, %v1036_v3, %v817_v60  ;;  %v1761_v47 = vor.u32 %v1760_v15, %v1756_v41 }
  0xf4   : > { %2059 = vrot.lane.b32.xlu1 %v7318_v57, %s6753_s9 }
  0xf5   : > { %v854_v32 = vpop.permute.xlu0 %853  ;;  %v7311_v19 = vsel %vm409_vm1, %v1761_v47, %v1765_v49 }
  0xf6   : > { %v700_v24 = vpop.permute.xlu1 %699  ;;  %v1102_v34 = vsel %vm1086_vm7, %v1069_v28, %v854_v32 }
  0xf7   : > { %v1142_v38 = vsel %vm1119_vm8, %v1102_v34, %v901_v23  ;;  %1947 = vrot.lane.b32.xlu0 %v7311_v19, %s6756_s14 }
  0xf8   : > { %1381 = vmatmul.mubr.bf16.gmra.mrb[28].mxu0 %v1142_v38 }
  0xf9   : > { %v619_v43 = vpop.permute.xlu0 %618  ;;  %6529 = vmatprep.mubr.msk.bf16.mxu0 %vm921_vm2, %v7066_v45 }
  0xfa   : > { %v784_v39 = vpop.permute.xlu1 %783  ;;  %v939_v26 = vsel %vm921_vm2, %v6985_v44, %v619_v43 }
  0xfb   : > { %v972_v6 = vsel %vm954_vm3, %v939_v26, %v700_v24 }
  0xfd   : > { %v737_v51 = vpop.permute.xlu0 %736 }
  0xfe   : > { %v856_v50 = vpop.permute.xlu1 %855  ;;  %v1005_v45 = vsel %vm987_vm4, %v972_v6, %v737_v51 }
  0xff   : > { %v1038_v5 = vsel %vm1020_vm5, %v1005_v45, %v784_v39 }
 0x101   : > { %v819_v58 = vpop.permute.xlu0 %818 }
 0x102   : > { %v621_v44 = vpop.permute.xlu1 %620  ;;  %v1071_v59 = vsel %vm1053_vm6, %v1038_v5, %v819_v58 }
 0x103   : > { %v1104_v62 = vsel %vm1086_vm7, %v1071_v59, %v856_v50  ;;  %v941_v9 = vsel %vm921_vm2, %v6997_v48, %v621_v44 }
 0x105   : > { %v903_v63 = vpop.permute.xlu0 %902 }
 0x106   : > { %v739_v4 = vpop.permute.xlu1 %738  ;;  %v1145_v8 = vsel %vm1119_vm8, %v1104_v62, %v903_v63 }
 0x107   : > { %1389 = vmatmul.mubr.bf16.gmra.mrb[32].mxu0 %v1145_v8 }
 0x108   : > { %6530 = vmatprep.mubr.msk.bf16.mxu0 %vm921_vm2, %v7124_v37 }
 0x109   : > { %v702_v12 = vpop.permute.xlu0 %701 }
 0x10a   : > { %v821_v10 = vpop.permute.xlu1 %820  ;;  %v974_v27 = vsel %vm954_vm3, %v941_v9, %v702_v12 }
 0x10b   : > { %v1007_v14 = vsel %vm987_vm4, %v974_v27, %v739_v4 }
 0x10d   : > { %v786_v31 = vpop.permute.xlu0 %785 }
 0x10e   : > { %v905_v16 = vpop.permute.xlu1 %904  ;;  %v1040_v60 = vsel %vm1020_vm5, %v1007_v14, %v786_v31 }
 0x10f   : > { %v1073_v20 = vsel %vm1053_vm6, %v1040_v60, %v821_v10 }
 0x111   : > { %v858_v21 = vpop.permute.xlu0 %857 }
 0x112   : > { %v704_v18 = vpop.permute.xlu1 %703  ;;  %v1106_v48 = vsel %vm1086_vm7, %v1073_v20, %v858_v21 }
 0x113   : > { %v1148_v23 = vsel %vm1119_vm8, %v1106_v48, %v905_v16 }
 0x114   : > { %1397 = vmatmul.mubr.bf16.gmra.mrb[36].mxu0 %v1148_v23 }
 0x115   : > { %v623_v37 = vpop.permute.xlu0 %622  ;;  %6531 = vmatprep.mubr.msk.bf16.mxu0 %vm921_vm2, %v7140_v55 }
 0x116   : > { %v788_v56 = vpop.permute.xlu1 %787  ;;  %v943_v3 = vsel %vm921_vm2, %v7029_v11, %v623_v37 }
 0x117   : > { %v976_v30 = vsel %vm954_vm3, %v943_v3, %v704_v18 }
 0x119   : > { %v741_v28 = vpop.permute.xlu0 %740 }
 0x11a   : > { %v860_v24 = vpop.permute.xlu1 %859  ;;  %v1009_v32 = vsel %vm987_vm4, %v976_v30, %v741_v28 }
 0x11b   : > { %v1042_v36 = vsel %vm1020_vm5, %v1009_v32, %v788_v56 }
 0x11d   : > { %v823_v38 = vpop.permute.xlu0 %822 }
 0x11e   : > { %v625_v34 = vpop.permute.xlu1 %624  ;;  %v1075_v7 = vsel %vm1053_vm6, %v1042_v36, %v823_v38 }
 0x11f   : > { %v1108_v41 = vsel %vm1086_vm7, %v1075_v7, %v860_v24  ;;  %v945_v11 = vsel %vm921_vm2, %v7041_v17, %v625_v34 }
 0x121   : > { %v907_v15 = vpop.permute.xlu0 %906 }
 0x122   : > { %v743_v39 = vpop.permute.xlu1 %742  ;;  %v1151_v55 = vsel %vm1119_vm8, %v1108_v41, %v907_v15  ;;  %v918_v41 = vrot.slane %v7239_v35, 1  ;;  %v919_v15 = vrot.slane %v7251_v46, 1 }
 0x123   : > { %1405 = vmatmul.mubr.bf16.gmra.mrb[40].mxu0 %v1151_v55 }
 0x124   : > { %6532 = vmatprep.mubr.msk.bf16.mxu0 %vm921_vm2, %v7192_v42 }
 0x125   : > { %v706_v43 = vpop.permute.xlu0 %705 }
 0x126   : > { %v825_v40 = vpop.permute.xlu1 %824  ;;  %v978_v26 = vsel %vm954_vm3, %v945_v11, %v706_v43 }
 0x127   : > { %v1011_v47 = vsel %vm987_vm4, %v978_v26, %v743_v39 }
 0x129   : > { %v790_v6 = vpop.permute.xlu0 %789 }
 0x12a   : > { %v909_v49 = vpop.permute.xlu1 %908  ;;  %v1044_v50 = vsel %vm1020_vm5, %v1011_v47, %v790_v6 }
 0x12b   : > { %v1077_v53 = vsel %vm1053_vm6, %v1044_v50, %v825_v40  ;;  %v920_v40 = vsel %vm634_vm0, %v918_v41, %v919_v15  ;;  %v1186_v50 = vlaneseq }
 0x12d   : > { %v862_v54 = vpop.permute.xlu0 %861 }
 0x12e   : > { %v708_v51 = vpop.permute.xlu1 %707  ;;  %v1110_v17 = vsel %vm1086_vm7, %v1077_v53, %v862_v54 }
 0x12f   : > { %v1154_v45 = vsel %vm1119_vm8, %v1110_v17, %v909_v49 }
 0x130   : > { %1413 = vmatmul.mubr.bf16.gmra.mrb[44].mxu0 %v1154_v45  ;;  %v7400_v45 = vshrl.u32 %v1186_v50, 7 }
 0x131   : > { %v627_v42 = vpop.permute.xlu0 %626  ;;  %6533 = vmatprep.mubr.msk.bf16.mxu0 %vm921_vm2, %v7208_v61 }
 0x132   : > { %v792_v44 = vpop.permute.xlu1 %791  ;;  %v947_v5 = vsel %vm921_vm2, %v7087_v2, %v627_v42  ;;  %9552 = vst [vmem:[#allocation2_spill] sm:$0xff] %v7400_v45 }
 0x133   : > { %v980_v58 = vsel %vm954_vm3, %v947_v5, %v708_v51  ;;  %v6727_v51 = vld [vmem:[%s9531_s3] sm:$0xff]  }
 0x134   : > { %2633 = vmatpush1.bf16.msra.mxu1 %v6727_v51 }
 0x135   : > { %v745_v4 = vpop.permute.xlu0 %744  ;;  %2634 = vmatprep.subr.bf16.mxu1 %v6750_v0 }
 0x136   : > { %v864_v59 = vpop.permute.xlu1 %863  ;;  %v1013_v62 = vsel %vm987_vm4, %v980_v58, %v745_v4  ;;  %v1188_v58 = vsub.s32 0, %v7400_v45  ;;  %v226_v4 = vld [vmem:[%s9529_s1] sm:$0x7] }
 0x137   : > { %v1046_v8 = vsel %vm1020_vm5, %v1013_v62, %v792_v44  ;;  %v6728_v44 = vld [vmem:[%s9531_s3 + $0x8] sm:$0xff]  }
 0x138   : > { %2635 = vmatpush1.bf16.msra.mxu1 %v6728_v44  ;;  %v7416_v62 = vrot.slane %v226_v4, %v1188_v58 }
 0x139   : > { %v827_v9 = vpop.permute.xlu0 %826  ;;  %2636 = vmatprep.subr.bf16.mxu1 %v6750_v0 }
 0x13a   : > { %v629_v63 = vpop.permute.xlu1 %628  ;;  %v1079_v10 = vsel %vm1053_vm6, %v1046_v8, %v827_v9 }
 0x13b   : > { %v1112_v27 = vsel %vm1086_vm7, %v1079_v10, %v864_v59  ;;  %v949_v2 = vsel %vm921_vm2, %v7106_v22, %v629_v63  ;;  %v6729_v59 = vld [vmem:[%s9531_s3 + $0x10] sm:$0xff]   ;;  %v6730_v63 = vld [vmem:[%s9531_s3 + $0x18] sm:$0xff]  }
 0x13c   : > { %2637 = vmatpush1.bf16.msra.mxu1 %v6729_v59 }
 0x13d   : > { %v911_v14 = vpop.permute.xlu0 %910  ;;  %2638 = vmatprep.subr.bf16.mxu1 %v6750_v0 }
 0x13e   : > { %v747_v12 = vpop.permute.xlu1 %746  ;;  %v1157_v61 = vsel %vm1119_vm8, %v1112_v27, %v911_v14 }
 0x13f   : > { %1421 = vmatmul.mubr.bf16.gmra.mrb[48].mxu0 %v1157_v61 }
 0x140   : > { %6534 = vmatprep.mubr.msk.bf16.mxu0 %vm921_vm2, %v7255_v52  ;;  %2639 = vmatpush1.bf16.msra.mxu1 %v6730_v63 }
 0x141   : > { %v710_v31 = vpop.permute.xlu0 %709  ;;  %2640 = vmatprep.subr.bf16.mxu1 %v6750_v0 }
 0x142   : > { %v829_v16 = vpop.permute.xlu1 %828  ;;  %v982_v60 = vsel %vm954_vm3, %v949_v2, %v710_v31  ;;  %v6732_v31 = vld [vmem:[%s9531_s3 + $0x28] sm:$0xff]  }
 0x143   : > { %v1015_v18 = vsel %vm987_vm4, %v982_v60, %v747_v12  ;;  %v6731_v12 = vld [vmem:[%s9531_s3 + $0x20] sm:$0xff]  }
 0x144   : > { %2641 = vmatpush1.bf16.msra.mxu1 %v6731_v12 }
 0x145   : > { %v794_v21 = vpop.permute.xlu0 %793  ;;  %2642 = vmatprep.subr.bf16.mxu1 %v6750_v0 }
 0x146   : > { %v913_v20 = vpop.permute.xlu1 %912  ;;  %v1048_v48 = vsel %vm1020_vm5, %v1015_v18, %v794_v21 }
 0x147   : > { %v1081_v56 = vsel %vm1053_vm6, %v1048_v48, %v829_v16 }
 0x148   : > { %2643 = vmatpush1.bf16.msra.mxu1 %v6732_v31 }
 0x149   : > { %v866_v37 = vpop.permute.xlu0 %865  ;;  %2644 = vmatprep.subr.bf16.mxu1 %v6750_v0 }
 0x14a   : > { %v712_v23 = vpop.permute.xlu1 %711  ;;  %v1114_v22 = vsel %vm1086_vm7, %v1081_v56, %v866_v37  ;;  %v6733_v56 = vld [vmem:[%s9531_s3 + $0x30] sm:$0xff]  }
 0x14b   : > { %v1160_v3 = vsel %vm1119_vm8, %v1114_v22, %v913_v20 }
 0x14c   : > { %1429 = vmatmul.mubr.bf16.gmra.mrb[52].mxu0 %v1160_v3  ;;  %2645 = vmatpush1.bf16.msra.mxu1 %v6733_v56 }
 0x14d   : > { %v631_v52 = vpop.permute.xlu0 %630  ;;  %6535 = vmatprep.mubr.msk.bf16.mxu0 %vm921_vm2, %v7269_v1  ;;  %2646 = vmatprep.subr.bf16.mxu1 %v6750_v0 }
 0x14e   : > { %v796_v30 = vpop.permute.xlu1 %795  ;;  %v951_v24 = vsel %vm921_vm2, %v7158_v13, %v631_v52 }
 0x14f   : > { %v984_v28 = vsel %vm954_vm3, %v951_v24, %v712_v23 }
 0x151   : > { %v749_v34 = vpop.permute.xlu0 %748 }
 0x152   : > { %v868_v32 = vpop.permute.xlu1 %867  ;;  %v1017_v36 = vsel %vm987_vm4, %v984_v28, %v749_v34  ;;  %v6734_v34 = vld [vmem:[%s9531_s3 + $0x38] sm:$0xff]  }
 0x153   : > { %v1050_v7 = vsel %vm1020_vm5, %v1017_v36, %v796_v30  ;;  %2647 = vmatpush1.bf16.msra.mxu1 %v6734_v34 }
 0x154   : > { %2648 = vmatprep.subr.bf16.mxu1 %v6750_v0 }
 0x155   : > { %v831_v39 = vpop.permute.xlu0 %830 }
 0x156   : > { %v633_v38 = vpop.permute.xlu1 %632  ;;  %v1083_v55 = vsel %vm1053_vm6, %v1050_v7, %v831_v39 }
 0x157   : > { %v1116_v11 = vsel %vm1086_vm7, %v1083_v55, %v868_v32  ;;  %v953_v26 = vsel %vm921_vm2, %v7174_v29, %v633_v38 }
 0x159   : > { %v915_v13 = vpop.permute.xlu0 %914 }
 0x15a   : > { %v751_v1 = vpop.permute.xlu1 %750  ;;  %v1163_v43 = vsel %vm1119_vm8, %v1116_v11, %v915_v13 }
 0x15b   : > { %1437 = vmatmul.mubr.bf16.gmra.mrb[56].mxu0 %v1163_v43 }
 0x15c   : > { %6536 = vmatprep.mubr.msk.bf16.mxu0 %vm921_vm2, %v920_v40  ;;  %v6735_v40 = vld [vmem:[%s9531_s3 + $0x40] sm:$0xff]  }
 0x15d   : > { %v714_v47 = vpop.permute.xlu0 %713  ;;  %2649 = vmatpush1.bf16.msra.mxu1 %v6735_v40 }
 0x15e   : > { %v986_v35 = vsel %vm954_vm3, %v953_v26, %v714_v47  ;;  %v833_v46 = vpop.permute.xlu1 %832 }
 0x15f   : > { %v1019_v49 = vsel %vm987_vm4, %v986_v35, %v751_v1 }
 0x161   : > { %v798_v6 = vpop.permute.xlu0 %797 }
 0x162   : > { %v1052_v53 = vsel %vm1020_vm5, %v1019_v49, %v798_v6  ;;  %v917_v54 = vpop.permute.xlu1 %916 }
 0x163   : > { %v1085_v29 = vsel %vm1053_vm6, %v1052_v53, %v833_v46 }
 0x165   : > { %v870_v17 = vpop.permute.xlu0 %869 }
 0x166   : > { %v1118_v42 = vsel %vm1086_vm7, %v1085_v29, %v870_v17 }
 0x167   : > { %v1166_v5 = vsel %vm1119_vm8, %v1118_v42, %v917_v54 }
 0x168   : > { %1445 = vmatmul.mubr.bf16.gmra.mrb[60].mxu0 %v1166_v5 }
 0x170   : > { %v1326_v8 = vpop.f32.mrb[0].mxu0 }
 0x171   : > { %v1327_v9 = vadd.f32 %v1326_v8, %v7416_v62  ;;  %v1328_v10 = vpop.f32.mrb[1].mxu0 }
 0x172   : > { %v1329_v27 = vpop.f32.mrb[2].mxu0 }
 0x173   : > { %v1485_v14 = vmul.f32 0.2, %v1327_v9  ;;  %v1330_v61 = vadd.f32 %v1329_v27, %v7416_v62  ;;  %v1331_v2 = vpop.f32.mrb[3].mxu0  ;;  %vm1453_vm12 = vcmp.ge.f32.partialorder %v1327_v9, 0.0 }
 0x175   : > { %vm1454_vm13 = vcmp.ge.f32.partialorder %v1330_v61, 0.0  ;;  %v1486_v16 = vmul.f32 0.2, %v1330_v61  ;;  %v1517_v60 = vsel %vm1453_vm12, %v1327_v9, %v1485_v14 }
 0x177   : > { %v1518_v18 = vsel %vm1454_vm13, %v1330_v61, %v1486_v16 }
 0x178   : > { %v1549_v20 = vpack.c.bf16 %v1518_v18, %v1517_v60  ;;  %v1334_v21 = vpop.f32.mrb[4].mxu0 }
 0x179   : > { %v1335_v48 = vadd.f32 %v1334_v21, %v7416_v62  ;;  %v1336_v23 = vpop.f32.mrb[5].mxu0 }
 0x17a   : > { %v1573_v37 = vshrl.u32 %v1549_v20, 16  ;;  %v1337_v22 = vpop.f32.mrb[6].mxu0  ;;  %v1576_v28 = vshll.u32 %v1549_v20, 16 }
 0x17b   : > { %v1487_v3 = vmul.f32 0.2, %v1335_v48  ;;  %v1338_v30 = vadd.f32 %v1337_v22, %v7416_v62  ;;  %v1339_v52 = vpop.f32.mrb[7].mxu0  ;;  %vm1455_vm14 = vcmp.ge.f32.partialorder %v1335_v48, 0.0 }
 0x17c   : > { %v1575_v24 = vrot.slane %v1573_v37, 7 }
 0x17d   : > { %vm1456_vm15 = vcmp.ge.f32.partialorder %v1338_v30, 0.0  ;;  %v1488_v32 = vmul.f32 0.2, %v1338_v30  ;;  %v1519_v7 = vsel %vm1455_vm14, %v1335_v48, %v1487_v3 }
 0x17e   : > { %v1578_v36 = vor.u32 %v1576_v28, %v1575_v24  ;;  %v1739_v38 = vsel %vm7290_vm11, %v1575_v24, 0 }
 0x17f   : > { %v1520_v39 = vsel %vm1456_vm15, %v1338_v30, %v1488_v32  ;;  %v2015_v1 = vrot.slane %v1739_v38, 1  ;;  %v1775_v13 = vshll.u32 %v1739_v38, 16 }
 0x180   : > { %v1550_v41 = vpack.c.bf16 %v1520_v39, %v1519_v7  ;;  %v7445_v15 = vsel %vm7290_vm11, 0, %v1578_v36 }
 0x181   : > { %2092 = vrot.lane.b32.xlu0 %v7445_v15, %s6751_s30  ;;  %v2014_v55 = vrot.slane %v7445_v15, 1  ;;  %v1770_v11 = vshll.u32 %v7445_v15, 16  ;;  %v1768_v47 = vshrl.u32 %v7445_v15, 16  ;;  %v1777_v6 = vrot.slane %v1775_v13, 1 }
 0x182   : > { %v1580_v43 = vshrl.u32 %v1550_v41, 16  ;;  %v1583_v46 = vshll.u32 %v1550_v41, 16 }
 0x183   : > { %v2016_v26 = vsel %vm634_vm0, %v2014_v55, %v2015_v1  ;;  %v1772_v35 = vrot.slane %v1770_v11, 1 }
 0x184   : > { %v1582_v0 = vrot.slane %v1580_v43, 7 }
 0x185   : > { %2172 = vrot.lane.b32.xlu0 %v2016_v26, %s6754_s12  ;;  %v1773_v49 = vor.u32 %v1772_v35, %v1768_v47 }
 0x186   : > { %v1585_v50 = vor.u32 %v1583_v46, %v1582_v0  ;;  %v1342_v51 = vpop.f32.mrb[8].mxu0  ;;  %v1740_v53 = vsel %vm7290_vm11, %v1582_v0, 0 }
 0x187   : > { %v1343_v54 = vadd.f32 %v1342_v51, %v7416_v62  ;;  %v1344_v29 = vpop.f32.mrb[9].mxu0  ;;  %v1778_v17 = vsel %vm409_vm1, %v1773_v49, %v1777_v6  ;;  %v2018_v63 = vrot.slane %v1740_v53, 1  ;;  %v1787_v8 = vshll.u32 %v1740_v53, 16 }
 0x188   : > { %v7464_v44 = vsel %vm7290_vm11, 0, %v1585_v50  ;;  %2136 = vrot.lane.b32.xlu1 %v1778_v17, %s6755_s13  ;;  %v1345_v42 = vpop.f32.mrb[10].mxu0 }
 0x189   : > { %v1489_v5 = vmul.f32 0.2, %v1343_v54  ;;  %v1346_v58 = vadd.f32 %v1345_v42, %v7416_v62  ;;  %v1347_v59 = vpop.f32.mrb[11].mxu0  ;;  %2061 = vrot.lane.b32.xlu0 %v2016_v26, %s6753_s9  ;;  %v2017_v4 = vrot.slane %v7464_v44, 1  ;;  %vm1457_vm9 = vcmp.ge.f32.partialorder %v1343_v54, 0.0 }
 0x18a   : > { %v1782_v9 = vshll.u32 %v7464_v44, 16  ;;  %v1780_v27 = vshrl.u32 %v7464_v44, 16  ;;  %v1789_v60 = vrot.slane %v1787_v8, 1 }
 0x18b   : > { %vm1458_vm10 = vcmp.ge.f32.partialorder %v1346_v58, 0.0  ;;  %v1490_v10 = vmul.f32 0.2, %v1346_v58  ;;  %v2019_v12 = vsel %vm634_vm0, %v2017_v4, %v2018_v63  ;;  %v1521_v61 = vsel %vm1457_vm9, %v1343_v54, %v1489_v5 }
 0x18c   : > { %1949 = vrot.lane.b32.xlu1 %v1778_v17, %s6756_s14  ;;  %6546 = vmatprep.mubr.msk.bf16.mxu1 %vm921_vm2, %v2019_v12  ;;  %v1784_v14 = vrot.slane %v1782_v9, 1 }
 0x18d   : > { %v1522_v2 = vsel %vm1458_vm10, %v1346_v58, %v1490_v10 }
 0x18e   : > { %v1551_v16 = vpack.c.bf16 %v1522_v2, %v1521_v61  ;;  %v1785_v31 = vor.u32 %v1784_v14, %v1780_v27 }
 0x190   : > { %v1587_v18 = vshrl.u32 %v1551_v16, 16  ;;  %2204 = vrot.lane.b32.xlu1 %v7464_v44, %s6752_s8  ;;  %v1790_v20 = vsel %vm409_vm1, %v1785_v31, %v1789_v60  ;;  %v1590_v48 = vshll.u32 %v1551_v16, 16 }
 0x191   : > { %2236 = vrot.lane.b32.xlu0 %v1790_v20, %s6757_s15 }
 0x192   : > { %v1589_v21 = vrot.slane %v1587_v18, 7 }
 0x193   : > { %v1350_v23 = vpop.f32.mrb[12].mxu0 }
 0x194   : > { %v1592_v56 = vor.u32 %v1590_v48, %v1589_v21  ;;  %v1351_v37 = vadd.f32 %v1350_v23, %v7416_v62  ;;  %2094 = vrot.lane.b32.xlu1 %v7464_v44, %s6751_s30  ;;  %v1352_v22 = vpop.f32.mrb[13].mxu0  ;;  %v1741_v32 = vsel %vm7290_vm11, %v1589_v21, 0 }
 0x195   : > { %2138 = vrot.lane.b32.xlu0 %v1790_v20, %s6755_s13  ;;  %v1353_v3 = vpop.f32.mrb[14].mxu0  ;;  %v1799_v39 = vshll.u32 %v1741_v32, 16  ;;  %v2021_v6 = vrot.slane %v1741_v32, 1 }
 0x196   : > { %v1491_v30 = vmul.f32 0.2, %v1351_v37  ;;  %v1354_v52 = vadd.f32 %v1353_v3, %v7416_v62  ;;  %v1355_v24 = vpop.f32.mrb[15].mxu0  ;;  %v7486_v28 = vsel %vm7290_vm11, 0, %v1592_v56  ;;  %vm1459_vm12 = vcmp.ge.f32.partialorder %v1351_v37, 0.0 }
 0x197   : > { %v1794_v34 = vshll.u32 %v7486_v28, 16  ;;  %v1792_v38 = vshrl.u32 %v7486_v28, 16  ;;  %v1801_v40 = vrot.slane %v1799_v39, 1  ;;  %v2020_v35 = vrot.slane %v7486_v28, 1 }
 0x198   : > { %vm1460_vm13 = vcmp.ge.f32.partialorder %v1354_v52, 0.0  ;;  %v1492_v36 = vmul.f32 0.2, %v1354_v52  ;;  %2174 = vrot.lane.b32.xlu1 %v2019_v12, %s6754_s12  ;;  %v1523_v41 = vsel %vm1459_vm12, %v1351_v37, %v1491_v30 }
 0x199   : > { %1951 = vrot.lane.b32.xlu0 %v1790_v20, %s6756_s14  ;;  %v1796_v7 = vrot.slane %v1794_v34, 1  ;;  %v7511_v54 = vsel %vm634_vm0, %v2020_v35, %v2021_v6 }
 0x19a   : > { %v1524_v55 = vsel %vm1460_vm13, %v1354_v52, %v1492_v36 }
 0x19b   : > { %v1552_v1 = vpack.c.bf16 %v1524_v55, %v1523_v41  ;;  %v1797_v11 = vor.u32 %v1796_v7, %v1792_v38 }
 0x19c   : > { %2063 = vrot.lane.b32.xlu1 %v2019_v12, %s6753_s9 }
 0x19d   : > { %v1594_v13 = vshrl.u32 %v1552_v1, 16  ;;  %2206 = vrot.lane.b32.xlu0 %v7486_v28, %s6752_s8  ;;  %v1597_v26 = vshll.u32 %v1552_v1, 16  ;;  %v1802_v47 = vsel %vm409_vm1, %v1797_v11, %v1801_v40 }
 0x19f   : > { %v1596_v43 = vrot.slane %v1594_v13, 7 }
 0x1a0   : > { %2238 = vrot.lane.b32.xlu1 %v1802_v47, %s6757_s15 }
 0x1a1   : > { %v1599_v0 = vor.u32 %v1597_v26, %v1596_v43  ;;  %2096 = vrot.lane.b32.xlu0 %v7486_v28, %s6751_s30  ;;  %v1742_v46 = vsel %vm7290_vm11, %v1596_v43, 0 }
 0x1a2   : > { %v1358_v49 = vpop.f32.mrb[16].mxu0  ;;  %v1811_v42 = vshll.u32 %v1742_v46, 16  ;;  %v2024_v56 = vrot.slane %v1742_v46, 1 }
 0x1a3   : > { %v1359_v50 = vadd.f32 %v1358_v49, %v7416_v62  ;;  %v1360_v51 = vpop.f32.mrb[17].mxu0  ;;  %v7507_v53 = vsel %vm7290_vm11, 0, %v1599_v0 }
 0x1a4   : > { %2140 = vrot.lane.b32.xlu1 %v1802_v47, %s6755_s13  ;;  %v1361_v29 = vpop.f32.mrb[18].mxu0  ;;  %v1806_v17 = vshll.u32 %v7507_v53, 16  ;;  %v1804_v4 = vshrl.u32 %v7507_v53, 16  ;;  %v1813_v10 = vrot.slane %v1811_v42, 1  ;;  %v2023_v18 = vrot.slane %v7507_v53, 1 }
 0x1a5   : > { %v1493_v5 = vmul.f32 0.2, %v1359_v50  ;;  %2176 = vrot.lane.b32.xlu0 %v7511_v54, %s6754_s12  ;;  %v1362_v58 = vadd.f32 %v1361_v29, %v7416_v62  ;;  %v1363_v59 = vpop.f32.mrb[19].mxu0  ;;  %vm1461_vm14 = vcmp.ge.f32.partialorder %v1359_v50, 0.0 }
 0x1a6   : > { %v1808_v63 = vrot.slane %v1806_v17, 1  ;;  %v7538_v24 = vsel %vm634_vm0, %v2023_v18, %v2024_v56 }
 0x1a7   : > { %vm1462_vm15 = vcmp.ge.f32.partialorder %v1362_v58, 0.0  ;;  %v1494_v8 = vmul.f32 0.2, %v1362_v58  ;;  %v1525_v12 = vsel %vm1461_vm14, %v1359_v50, %v1493_v5 }
 0x1a8   : > { %1953 = vrot.lane.b32.xlu1 %v1802_v47, %s6756_s14  ;;  %v1809_v9 = vor.u32 %v1808_v63, %v1804_v4 }
 0x1a9   : > { %v1526_v27 = vsel %vm1462_vm15, %v1362_v58, %v1494_v8  ;;  %2065 = vrot.lane.b32.xlu0 %v7511_v54, %s6753_s9 }
 0x1aa   : > { %v1553_v14 = vpack.c.bf16 %v1526_v27, %v1525_v12  ;;  %v1814_v61 = vsel %vm409_vm1, %v1809_v9, %v1813_v10 }
 0x1ac   : > { %v1601_v2 = vshrl.u32 %v1553_v14, 16  ;;  %2208 = vrot.lane.b32.xlu1 %v7507_v53, %s6752_s8  ;;  %v1604_v31 = vshll.u32 %v1553_v14, 16 }
 0x1ad   : > { %2240 = vrot.lane.b32.xlu0 %v1814_v61, %s6757_s15 }
 0x1ae   : > { %v1603_v16 = vrot.slane %v1601_v2, 7 }
 0x1af   : > { %v1366_v60 = vpop.f32.mrb[20].mxu0 }
 0x1b0   : > { %v1606_v20 = vor.u32 %v1604_v31, %v1603_v16  ;;  %v1367_v21 = vadd.f32 %v1366_v60, %v7416_v62  ;;  %2098 = vrot.lane.b32.xlu1 %v7507_v53, %s6751_s30  ;;  %v1368_v48 = vpop.f32.mrb[21].mxu0  ;;  %v1743_v52 = vsel %vm7290_vm11, %v1603_v16, 0 }
 0x1b1   : > { %2142 = vrot.lane.b32.xlu0 %v1814_v61, %s6755_s13  ;;  %v1369_v23 = vpop.f32.mrb[22].mxu0  ;;  %v1823_v7 = vshll.u32 %v1743_v52, 16  ;;  %v2027_v49 = vrot.slane %v1743_v52, 1 }
 0x1b2   : > { %v1495_v37 = vmul.f32 0.2, %v1367_v21  ;;  %v1370_v22 = vadd.f32 %v1369_v23, %v7416_v62  ;;  %v1371_v3 = vpop.f32.mrb[23].mxu0  ;;  %v7533_v30 = vsel %vm7290_vm11, 0, %v1606_v20  ;;  %vm1463_vm9 = vcmp.ge.f32.partialorder %v1367_v21, 0.0 }
 0x1b3   : > { %v1818_v32 = vshll.u32 %v7533_v30, 16  ;;  %v1816_v36 = vshrl.u32 %v7533_v30, 16  ;;  %v1825_v13 = vrot.slane %v1823_v7, 1  ;;  %v2026_v47 = vrot.slane %v7533_v30, 1 }
 0x1b4   : > { %vm1464_vm10 = vcmp.ge.f32.partialorder %v1370_v22, 0.0  ;;  %v1496_v34 = vmul.f32 0.2, %v1370_v22  ;;  %2178 = vrot.lane.b32.xlu1 %v7538_v24, %s6754_s12  ;;  %v1527_v39 = vsel %vm1463_vm9, %v1367_v21, %v1495_v37 }
 0x1b5   : > { %1955 = vrot.lane.b32.xlu0 %v1814_v61, %s6756_s14  ;;  %v1820_v38 = vrot.slane %v1818_v32, 1  ;;  %v7563_v29 = vsel %vm634_vm0, %v2026_v47, %v2027_v49 }
 0x1b6   : > { %v1528_v41 = vsel %vm1464_vm10, %v1370_v22, %v1496_v34 }
 0x1b7   : > { %v1554_v55 = vpack.c.bf16 %v1528_v41, %v1527_v39  ;;  %v1821_v1 = vor.u32 %v1820_v38, %v1816_v36 }
 0x1b8   : > { %2067 = vrot.lane.b32.xlu1 %v7538_v24, %s6753_s9 }
 0x1b9   : > { %v1608_v11 = vshrl.u32 %v1554_v55, 16  ;;  %2210 = vrot.lane.b32.xlu0 %v7533_v30, %s6752_s8  ;;  %v1611_v43 = vshll.u32 %v1554_v55, 16  ;;  %v1826_v26 = vsel %vm409_vm1, %v1821_v1, %v1825_v13 }
 0x1bb   : > { %v1610_v40 = vrot.slane %v1608_v11, 7 }
 0x1bc   : > { %2242 = vrot.lane.b32.xlu1 %v1826_v26, %s6757_s15 }
 0x1bd   : > { %v1613_v35 = vor.u32 %v1611_v43, %v1610_v40  ;;  %2100 = vrot.lane.b32.xlu0 %v7533_v30, %s6751_s30  ;;  %v1744_v0 = vsel %vm7290_vm11, %v1610_v40, 0 }
 0x1be   : > { %v1374_v46 = vpop.f32.mrb[24].mxu0  ;;  %v1835_v5 = vshll.u32 %v1744_v0, 16  ;;  %v2030_v37 = vrot.slane %v1744_v0, 1 }
 0x1bf   : > { %v1375_v6 = vadd.f32 %v1374_v46, %v7416_v62  ;;  %v1376_v50 = vpop.f32.mrb[25].mxu0  ;;  %v7559_v51 = vsel %vm7290_vm11, 0, %v1613_v35 }
 0x1c0   : > { %2144 = vrot.lane.b32.xlu1 %v1826_v26, %s6755_s13  ;;  %v1377_v17 = vpop.f32.mrb[26].mxu0  ;;  %v1830_v42 = vshll.u32 %v7559_v51, 16  ;;  %v1828_v63 = vshrl.u32 %v7559_v51, 16  ;;  %v1837_v12 = vrot.slane %v1835_v5, 1  ;;  %v2029_v20 = vrot.slane %v7559_v51, 1 }
 0x1c1   : > { %v1497_v58 = vmul.f32 0.2, %v1375_v6  ;;  %2180 = vrot.lane.b32.xlu0 %v7563_v29, %s6754_s12  ;;  %v1378_v59 = vadd.f32 %v1377_v17, %v7416_v62  ;;  %v1379_v4 = vpop.f32.mrb[27].mxu0  ;;  %vm1465_vm12 = vcmp.ge.f32.partialorder %v1375_v6, 0.0 }
 0x1c2   : > { %v1832_v8 = vrot.slane %v1830_v42, 1  ;;  %v7590_v36 = vsel %vm634_vm0, %v2029_v20, %v2030_v37 }
 0x1c3   : > { %vm1466_vm13 = vcmp.ge.f32.partialorder %v1378_v59, 0.0  ;;  %v1498_v9 = vmul.f32 0.2, %v1378_v59  ;;  %v1529_v27 = vsel %vm1465_vm12, %v1375_v6, %v1497_v58 }
 0x1c4   : > { %1957 = vrot.lane.b32.xlu1 %v1826_v26, %s6756_s14  ;;  %v1833_v10 = vor.u32 %v1832_v8, %v1828_v63 }
 0x1c5   : > { %v1530_v14 = vsel %vm1466_vm13, %v1378_v59, %v1498_v9  ;;  %2069 = vrot.lane.b32.xlu0 %v7563_v29, %s6753_s9 }
 0x1c6   : > { %v1555_v61 = vpack.c.bf16 %v1530_v14, %v1529_v27  ;;  %v1838_v2 = vsel %vm409_vm1, %v1833_v10, %v1837_v12 }
 0x1c8   : > { %v1615_v16 = vshrl.u32 %v1555_v61, 16  ;;  %2212 = vrot.lane.b32.xlu1 %v7559_v51, %s6752_s8  ;;  %v1618_v60 = vshll.u32 %v1555_v61, 16 }
 0x1c9   : > { %2244 = vrot.lane.b32.xlu0 %v1838_v2, %s6757_s15 }
 0x1ca   : > { %v1617_v31 = vrot.slane %v1615_v16, 7 }
 0x1cb   : > { %v1382_v18 = vpop.f32.mrb[28].mxu0 }
 0x1cc   : > { %v1620_v21 = vor.u32 %v1618_v60, %v1617_v31  ;;  %v1383_v48 = vadd.f32 %v1382_v18, %v7416_v62  ;;  %2102 = vrot.lane.b32.xlu1 %v7559_v51, %s6751_s30  ;;  %v1384_v23 = vpop.f32.mrb[29].mxu0  ;;  %v1745_v34 = vsel %vm7290_vm11, %v1617_v31, 0 }
 0x1cd   : > { %2146 = vrot.lane.b32.xlu0 %v1838_v2, %s6755_s13  ;;  %v1385_v56 = vpop.f32.mrb[30].mxu0  ;;  %v1847_v55 = vshll.u32 %v1745_v34, 16  ;;  %v2033_v17 = vrot.slane %v1745_v34, 1 }
 0x1ce   : > { %v1499_v22 = vmul.f32 0.2, %v1383_v48  ;;  %v1386_v3 = vadd.f32 %v1385_v56, %v7416_v62  ;;  %v1387_v52 = vpop.f32.mrb[31].mxu0  ;;  %v7585_v32 = vsel %vm7290_vm11, 0, %v1620_v21  ;;  %vm1467_vm14 = vcmp.ge.f32.partialorder %v1383_v48, 0.0 }
 0x1cf   : > { %v1842_v38 = vshll.u32 %v7585_v32, 16  ;;  %v1840_v39 = vshrl.u32 %v7585_v32, 16  ;;  %v1849_v26 = vrot.slane %v1847_v55, 1  ;;  %v2032_v46 = vrot.slane %v7585_v32, 1 }
 0x1d0   : > { %vm1468_vm15 = vcmp.ge.f32.partialorder %v1386_v3, 0.0  ;;  %v1500_v7 = vmul.f32 0.2, %v1386_v3  ;;  %2182 = vrot.lane.b32.xlu1 %v7590_v36, %s6754_s12  ;;  %v1531_v1 = vsel %vm1467_vm14, %v1383_v48, %v1499_v22 }
 0x1d1   : > { %1959 = vrot.lane.b32.xlu0 %v1838_v2, %s6756_s14  ;;  %v1844_v41 = vrot.slane %v1842_v38, 1  ;;  %v7615_v59 = vsel %vm634_vm0, %v2032_v46, %v2033_v17 }
 0x1d2   : > { %v1532_v11 = vsel %vm1468_vm15, %v1386_v3, %v1500_v7 }
 0x1d3   : > { %v1556_v13 = vpack.c.bf16 %v1532_v11, %v1531_v1  ;;  %v1845_v40 = vor.u32 %v1844_v41, %v1840_v39 }
 0x1d4   : > { %2071 = vrot.lane.b32.xlu1 %v7590_v36, %s6753_s9 }
 0x1d5   : > { %v1622_v43 = vshrl.u32 %v1556_v13, 16  ;;  %2214 = vrot.lane.b32.xlu0 %v7585_v32, %s6752_s8  ;;  %v1625_v35 = vshll.u32 %v1556_v13, 16  ;;  %v1850_v0 = vsel %vm409_vm1, %v1845_v40, %v1849_v26 }
 0x1d7   : > { %v1624_v47 = vrot.slane %v1622_v43, 7  ;;  %v1948_v43 = vpop.permute.xlu0 %1947 }
 0x1d8   : > { %2246 = vrot.lane.b32.xlu1 %v1850_v0, %s6757_s15 }
 0x1d9   : > { %v1627_v49 = vor.u32 %v1625_v35, %v1624_v47  ;;  %2104 = vrot.lane.b32.xlu0 %v7585_v32, %s6751_s30  ;;  %v1746_v6 = vsel %vm7290_vm11, %v1624_v47, 0 }
 0x1da   : > { %v1390_v50 = vpop.f32.mrb[32].mxu0  ;;  %v1859_v8 = vshll.u32 %v1746_v6, 16  ;;  %v2036_v38 = vrot.slane %v1746_v6, 1 }
 0x1db   : > { %v1391_v42 = vadd.f32 %v1390_v50, %v7416_v62  ;;  %v1392_v5 = vpop.f32.mrb[33].mxu0  ;;  %v7611_v58 = vsel %vm7290_vm11, 0, %v1627_v49 }
 0x1dc   : > { %2148 = vrot.lane.b32.xlu1 %v1850_v0, %s6755_s13  ;;  %v1393_v4 = vpop.f32.mrb[34].mxu0  ;;  %v1854_v63 = vshll.u32 %v7611_v58, 16  ;;  %v1852_v27 = vshrl.u32 %v7611_v58, 16  ;;  %v1861_v16 = vrot.slane %v1859_v8, 1  ;;  %v2035_v37 = vrot.slane %v7611_v58, 1 }
 0x1dd   : > { %v1501_v9 = vmul.f32 0.2, %v1391_v42  ;;  %2184 = vrot.lane.b32.xlu0 %v7615_v59, %s6754_s12  ;;  %v1394_v10 = vadd.f32 %v1393_v4, %v7416_v62  ;;  %v1395_v12 = vpop.f32.mrb[35].mxu0  ;;  %vm1469_vm9 = vcmp.ge.f32.partialorder %v1391_v42, 0.0 }
 0x1de   : > { %v1856_v14 = vrot.slane %v1854_v63, 1  ;;  %v7642_v11 = vsel %vm634_vm0, %v2035_v37, %v2036_v38  ;;  %v2060_v12 = vpop.permute.xlu1 %2059 }
 0x1df   : > { %vm1470_vm10 = vcmp.ge.f32.partialorder %v1394_v10, 0.0  ;;  %v1502_v61 = vmul.f32 0.2, %v1394_v10  ;;  %v1533_v31 = vsel %vm1469_vm9, %v1391_v42, %v1501_v9 }
 0x1e0   : > { %1961 = vrot.lane.b32.xlu1 %v1850_v0, %s6756_s14  ;;  %v1857_v2 = vor.u32 %v1856_v14, %v1852_v27 }
 0x1e1   : > { %v1534_v60 = vsel %vm1470_vm10, %v1394_v10, %v1502_v61  ;;  %2073 = vrot.lane.b32.xlu0 %v7615_v59, %s6753_s9 }
 0x1e2   : > { %v1557_v18 = vpack.c.bf16 %v1534_v60, %v1533_v31  ;;  %v1862_v20 = vsel %vm409_vm1, %v1857_v2, %v1861_v16  ;;  %v2269_v31 = vsel %vm921_vm2, %v7297_v33, %v1948_v43 }
 0x1e4   : > { %v1629_v21 = vshrl.u32 %v1557_v18, 16  ;;  %2216 = vrot.lane.b32.xlu1 %v7611_v58, %s6752_s8  ;;  %v1632_v23 = vshll.u32 %v1557_v18, 16 }
 0x1e5   : > { %2248 = vrot.lane.b32.xlu0 %v1862_v20, %s6757_s15 }
 0x1e6   : > { %v1631_v48 = vrot.slane %v1629_v21, 7 }
 0x1e7   : > { %v1398_v56 = vpop.f32.mrb[36].mxu0 }
 0x1e8   : > { %v1634_v22 = vor.u32 %v1632_v23, %v1631_v48  ;;  %v1399_v3 = vadd.f32 %v1398_v56, %v7416_v62  ;;  %2106 = vrot.lane.b32.xlu1 %v7611_v58, %s6751_s30  ;;  %v1400_v52 = vpop.f32.mrb[37].mxu0  ;;  %v1747_v1 = vsel %vm7290_vm11, %v1631_v48, 0 }
 0x1e9   : > { %2150 = vrot.lane.b32.xlu0 %v1862_v20, %s6755_s13  ;;  %v1401_v34 = vpop.f32.mrb[38].mxu0  ;;  %v1871_v35 = vshll.u32 %v1747_v1, 16  ;;  %v2039_v14 = vrot.slane %v1747_v1, 1 }
 0x1ea   : > { %v1503_v7 = vmul.f32 0.2, %v1399_v3  ;;  %v1402_v39 = vadd.f32 %v1401_v34, %v7416_v62  ;;  %v1403_v41 = vpop.f32.mrb[39].mxu0  ;;  %v7637_v55 = vsel %vm7290_vm11, 0, %v1634_v22  ;;  %vm1471_vm12 = vcmp.ge.f32.partialorder %v1399_v3, 0.0 }
 0x1eb   : > { %v1866_v13 = vshll.u32 %v7637_v55, 16  ;;  %v1864_v26 = vshrl.u32 %v7637_v55, 16  ;;  %v1873_v17 = vrot.slane %v1871_v35, 1  ;;  %v2038_v8 = vrot.slane %v7637_v55, 1 }
 0x1ec   : > { %vm1472_vm13 = vcmp.ge.f32.partialorder %v1402_v39, 0.0  ;;  %v1504_v40 = vmul.f32 0.2, %v1402_v39  ;;  %2186 = vrot.lane.b32.xlu1 %v7642_v11, %s6754_s12  ;;  %v1535_v0 = vsel %vm1471_vm12, %v1399_v3, %v1503_v7  ;;  %v2301_v34 = vsel %vm954_vm3, %v2269_v31, %v2060_v12 }
 0x1ed   : > { %1963 = vrot.lane.b32.xlu0 %v1862_v20, %s6756_s14  ;;  %v1868_v47 = vrot.slane %v1866_v13, 1  ;;  %v7671_v60 = vsel %vm634_vm0, %v2038_v8, %v2039_v14 }
 0x1ee   : > { %v1536_v46 = vsel %vm1472_vm13, %v1402_v39, %v1504_v40 }
 0x1ef   : > { %v1558_v49 = vpack.c.bf16 %v1536_v46, %v1535_v0  ;;  %v1869_v6 = vor.u32 %v1868_v47, %v1864_v26 }
 0x1f0   : > { %2075 = vrot.lane.b32.xlu1 %v7642_v11, %s6753_s9 }
 0x1f1   : > { %v1636_v50 = vshrl.u32 %v1558_v49, 16  ;;  %2218 = vrot.lane.b32.xlu0 %v7637_v55, %s6752_s8  ;;  %v1639_v5 = vshll.u32 %v1558_v49, 16  ;;  %v1874_v63 = vsel %vm409_vm1, %v1869_v6, %v1873_v17 }
 0x1f3   : > { %v1638_v42 = vrot.slane %v1636_v50, 7  ;;  %v2093_v4 = vpop.permute.xlu0 %2092 }
 0x1f4   : > { %2250 = vrot.lane.b32.xlu1 %v1874_v63, %s6757_s15  ;;  %v2333_v13 = vsel %vm987_vm4, %v2301_v34, %v2093_v4 }
 0x1f5   : > { %v1641_v9 = vor.u32 %v1639_v5, %v1638_v42  ;;  %2108 = vrot.lane.b32.xlu0 %v7637_v55, %s6751_s30  ;;  %v7660_v10 = vsel %vm7290_vm11, %v1638_v42, 0 }
 0x1f6   : > { %v1406_v27 = vpop.f32.mrb[40].mxu0  ;;  %v1883_v21 = vshll.u32 %v7660_v10, 16  ;;  %v2042_v14 = vrot.slane %v7660_v10, 1 }
 0x1f7   : > { %v1407_v61 = vadd.f32 %v1406_v27, %v7416_v62  ;;  %v1408_v2 = vpop.f32.mrb[41].mxu0  ;;  %v7665_v16 = vsel %vm7290_vm11, 0, %v1641_v9  ;;  %v2173_v23 = vpop.permute.xlu0 %2172 }
 0x1f8   : > { %2152 = vrot.lane.b32.xlu1 %v1874_v63, %s6755_s13  ;;  %v1409_v18 = vpop.f32.mrb[42].mxu0  ;;  %v1878_v20 = vshll.u32 %v7665_v16, 16  ;;  %v1876_v3 = vshrl.u32 %v7665_v16, 16  ;;  %v1885_v39 = vrot.slane %v1883_v21, 1  ;;  %v2041_v4 = vrot.slane %v7665_v16, 1 }
 0x1f9   : > { %v1505_v48 = vmul.f32 0.2, %v1407_v61  ;;  %2188 = vrot.lane.b32.xlu0 %v7671_v60, %s6754_s12  ;;  %v1410_v56 = vadd.f32 %v1409_v18, %v7416_v62  ;;  %v1411_v37 = vpop.f32.mrb[43].mxu0  ;;  %vm1473_vm14 = vcmp.ge.f32.partialorder %v1407_v61, 0.0 }
 0x1fa   : > { %v2137_v22 = vpop.permute.xlu1 %2136  ;;  %v1880_v52 = vrot.slane %v1878_v20, 1 }
 0x1fb   : > { %vm1474_vm15 = vcmp.ge.f32.partialorder %v1410_v56, 0.0  ;;  %v1506_v38 = vmul.f32 0.2, %v1410_v56  ;;  %v1537_v41 = vsel %vm1473_vm14, %v1407_v61, %v1505_v48  ;;  %v2365_v47 = vsel %vm1020_vm5, %v2333_v13, %v2137_v22  ;;  %v2062_v35 = vpop.permute.xlu0 %2061 }
 0x1fc   : > { %1965 = vrot.lane.b32.xlu1 %v1874_v63, %s6756_s14  ;;  %v1881_v7 = vor.u32 %v1880_v52, %v1876_v3  ;;  %v2397_v50 = vsel %vm1053_vm6, %v2365_v47, %v2173_v23  ;;  %v7708_v23 = vsel %vm634_vm0, %v2041_v4, %v2042_v14 }
 0x1fd   : > { %v1538_v1 = vsel %vm1474_vm15, %v1410_v56, %v1506_v38  ;;  %2077 = vrot.lane.b32.xlu0 %v7671_v60, %s6753_s9 }
 0x1fe   : > { %v1559_v40 = vpack.c.bf16 %v1538_v1, %v1537_v41  ;;  %v1950_v43 = vpop.permute.xlu1 %1949  ;;  %v1886_v26 = vsel %vm409_vm1, %v1881_v7, %v1885_v39 }
 0x200   : > { %v1643_v0 = vshrl.u32 %v1559_v40, 16  ;;  %2220 = vrot.lane.b32.xlu1 %v7665_v16, %s6752_s8  ;;  %v1646_v49 = vshll.u32 %v1559_v40, 16 }
 0x201   : > { %2252 = vrot.lane.b32.xlu0 %v1886_v26, %s6757_s15 }
 0x202   : > { %v1645_v46 = vrot.slane %v1643_v0, 7  ;;  %v2205_v6 = vpop.permute.xlu1 %2204 }
 0x203   : > { %v2429_v17 = vsel %vm1086_vm7, %v2397_v50, %v2205_v6  ;;  %v2237_v42 = vpop.permute.xlu0 %2236  ;;  %v1414_v5 = vpop.f32.mrb[44].mxu0 }
 0x204   : > { %v1648_v63 = vor.u32 %v1646_v49, %v1645_v46  ;;  %v1415_v8 = vadd.f32 %v1414_v5, %v7416_v62  ;;  %2110 = vrot.lane.b32.xlu1 %v7665_v16, %s6751_s30  ;;  %v1416_v9 = vpop.f32.mrb[45].mxu0  ;;  %v2461_v12 = vsel %vm1119_vm8, %v2429_v17, %v2237_v42  ;;  %v1749_v21 = vsel %vm7290_vm11, %v1645_v46, 0 }
 0x205   : > { %2154 = vrot.lane.b32.xlu0 %v1886_v26, %s6755_s13  ;;  %v1417_v27 = vpop.f32.mrb[46].mxu0  ;;  %2665 = vmatmul.mubr.bf16.vlgmr.msra.gmra.mrb[0].mxu1 %v2461_v12  ;;  %v1895_v3 = vshll.u32 %v1749_v21, 16 }
 0x206   : > { %v1507_v61 = vmul.f32 0.2, %v1415_v8  ;;  %v1418_v2 = vadd.f32 %v1417_v27, %v7416_v62  ;;  %v2095_v31 = vpop.permute.xlu1 %2094  ;;  %v1419_v18 = vpop.f32.mrb[47].mxu0  ;;  %6547 = vmatprep.mubr.msk.bf16.mxu1 %vm921_vm2, %v7511_v54  ;;  %v7703_v20 = vsel %vm7290_vm11, 0, %v1648_v63  ;;  %vm1475_vm9 = vcmp.ge.f32.partialorder %v1415_v8, 0.0 }
 0x207   : > { %v2139_v48 = vpop.permute.xlu0 %2138  ;;  %v1890_v10 = vshll.u32 %v7703_v20, 16  ;;  %v2271_v54 = vsel %vm921_vm2, %v7445_v15, %v1950_v43  ;;  %v1888_v37 = vshrl.u32 %v7703_v20, 16  ;;  %v1897_v40 = vrot.slane %v1895_v3, 1 }
 0x208   : > { %vm1476_vm10 = vcmp.ge.f32.partialorder %v1418_v2, 0.0  ;;  %v1508_v56 = vmul.f32 0.2, %v1418_v2  ;;  %2190 = vrot.lane.b32.xlu1 %v7708_v23, %s6754_s12  ;;  %v1539_v52 = vsel %vm1475_vm9, %v1415_v8, %v1507_v61  ;;  %v2303_v1 = vsel %vm954_vm3, %v2271_v54, %v2062_v35 }
 0x209   : > { %1967 = vrot.lane.b32.xlu0 %v1886_v26, %s6756_s14  ;;  %v1892_v22 = vrot.slane %v1890_v10, 1  ;;  %v2335_v15 = vsel %vm987_vm4, %v2303_v1, %v2095_v31  ;;  %v2044_v35 = vrot.slane %v7703_v20, 1  ;;  %v2045_v63 = vrot.slane %v1749_v21, 1 }
 0x20a   : > { %v1540_v34 = vsel %vm1476_vm10, %v1418_v2, %v1508_v56  ;;  %v2175_v38 = vpop.permute.xlu1 %2174  ;;  %v2367_v49 = vsel %vm1020_vm5, %v2335_v15, %v2139_v48 }
 0x20b   : > { %v1560_v7 = vpack.c.bf16 %v1540_v34, %v1539_v52  ;;  %v1952_v39 = vpop.permute.xlu0 %1951  ;;  %v1893_v41 = vor.u32 %v1892_v22, %v1888_v37  ;;  %v2399_v50 = vsel %vm1053_vm6, %v2367_v49, %v2175_v38  ;;  %v7743_v61 = vsel %vm634_vm0, %v2044_v35, %v2045_v63 }
 0x20c   : > { %2079 = vrot.lane.b32.xlu1 %v7708_v23, %s6753_s9  ;;  %v2273_v52 = vsel %vm921_vm2, %v7464_v44, %v1952_v39 }
 0x20d   : > { %v1650_v13 = vshrl.u32 %v1560_v7, 16  ;;  %2222 = vrot.lane.b32.xlu0 %v7703_v20, %s6752_s8  ;;  %v1653_v47 = vshll.u32 %v1560_v7, 16  ;;  %v1898_v46 = vsel %vm409_vm1, %v1893_v41, %v1897_v40 }
 0x20e   : > { %v2064_v43 = vpop.permute.xlu1 %2063 }
 0x20f   : > { %v1652_v26 = vrot.slane %v1650_v13, 7  ;;  %v2207_v0 = vpop.permute.xlu0 %2206  ;;  %v2305_v7 = vsel %vm954_vm3, %v2273_v52, %v2064_v43 }
 0x210   : > { %2254 = vrot.lane.b32.xlu1 %v1898_v46, %s6757_s15  ;;  %v2431_v42 = vsel %vm1086_vm7, %v2399_v50, %v2207_v0 }
 0x211   : > { %v1655_v6 = vor.u32 %v1653_v47, %v1652_v26  ;;  %2112 = vrot.lane.b32.xlu0 %v7703_v20, %s6751_s30  ;;  %v7732_v17 = vsel %vm7290_vm11, %v1652_v26, 0 }
 0x212   : > { %v2239_v5 = vpop.permute.xlu1 %2238  ;;  %v1422_v4 = vpop.f32.mrb[48].mxu0  ;;  %v1907_v18 = vshll.u32 %v7732_v17, 16 }
 0x213   : > { %v1423_v8 = vadd.f32 %v1422_v4, %v7416_v62  ;;  %v2097_v9 = vpop.permute.xlu0 %2096  ;;  %v1424_v12 = vpop.f32.mrb[49].mxu0  ;;  %v2464_v27 = vsel %vm1119_vm8, %v2431_v42, %v2239_v5  ;;  %v7739_v14 = vsel %vm7290_vm11, 0, %v1655_v6 }
 0x214   : > { %2156 = vrot.lane.b32.xlu1 %v1898_v46, %s6755_s13  ;;  %v1425_v2 = vpop.f32.mrb[50].mxu0  ;;  %2673 = vmatmul.mubr.bf16.gmra.mrb[4].mxu1 %v2464_v27  ;;  %v1902_v31 = vshll.u32 %v7739_v14, 16  ;;  %v1900_v54 = vshrl.u32 %v7739_v14, 16  ;;  %v1909_v38 = vrot.slane %v1907_v18, 1  ;;  %v2047_v50 = vrot.slane %v7739_v14, 1 }
 0x215   : > { %v1509_v21 = vmul.f32 0.2, %v1423_v8  ;;  %2192 = vrot.lane.b32.xlu0 %v7743_v61, %s6754_s12  ;;  %v1426_v48 = vadd.f32 %v1425_v2, %v7416_v62  ;;  %v1427_v10 = vpop.f32.mrb[51].mxu0  ;;  %6548 = vmatprep.mubr.msk.bf16.mxu1 %vm921_vm2, %v7538_v24  ;;  %vm1477_vm12 = vcmp.ge.f32.partialorder %v1423_v8, 0.0  ;;  %v2337_v24 = vsel %vm987_vm4, %v2305_v7, %v2097_v9 }
 0x216   : > { %v2141_v56 = vpop.permute.xlu1 %2140  ;;  %v1904_v37 = vrot.slane %v1902_v31, 1  ;;  %v2048_v9 = vrot.slane %v7732_v17, 1 }
 0x217   : > { %vm1478_vm13 = vcmp.ge.f32.partialorder %v1426_v48, 0.0  ;;  %v1510_v22 = vmul.f32 0.2, %v1426_v48  ;;  %v2177_v3 = vpop.permute.xlu0 %2176  ;;  %v1541_v41 = vsel %vm1477_vm12, %v1423_v8, %v1509_v21  ;;  %v2369_v26 = vsel %vm1020_vm5, %v2337_v24, %v2141_v56 }
 0x218   : > { %1969 = vrot.lane.b32.xlu1 %v1898_v46, %s6756_s14  ;;  %v1905_v34 = vor.u32 %v1904_v37, %v1900_v54  ;;  %v2401_v0 = vsel %vm1053_vm6, %v2369_v26, %v2177_v3  ;;  %v7784_v10 = vsel %vm634_vm0, %v2047_v50, %v2048_v9 }
 0x219   : > { %v1542_v1 = vsel %vm1478_vm13, %v1426_v48, %v1510_v22  ;;  %2081 = vrot.lane.b32.xlu0 %v7743_v61, %s6753_s9 }
 0x21a   : > { %v1561_v13 = vpack.c.bf16 %v1542_v1, %v1541_v41  ;;  %v1954_v15 = vpop.permute.xlu1 %1953  ;;  %v1910_v40 = vsel %vm409_vm1, %v1905_v34, %v1909_v38 }
 0x21b   : > { %v2066_v44 = vpop.permute.xlu0 %2065 }
 0x21c   : > { %v1657_v39 = vshrl.u32 %v1561_v13, 16  ;;  %2224 = vrot.lane.b32.xlu1 %v7739_v14, %s6752_s8  ;;  %v1660_v47 = vshll.u32 %v1561_v13, 16 }
 0x21d   : > { %2256 = vrot.lane.b32.xlu0 %v1910_v40, %s6757_s15 }
 0x21e   : > { %v1659_v43 = vrot.slane %v1657_v39, 7  ;;  %v2209_v46 = vpop.permute.xlu1 %2208 }
 0x21f   : > { %v2433_v49 = vsel %vm1086_vm7, %v2401_v0, %v2209_v46  ;;  %v2241_v35 = vpop.permute.xlu0 %2240  ;;  %v1430_v6 = vpop.f32.mrb[52].mxu0 }
 0x220   : > { %v1662_v42 = vor.u32 %v1660_v47, %v1659_v43  ;;  %v1431_v5 = vadd.f32 %v1430_v6, %v7416_v62  ;;  %2114 = vrot.lane.b32.xlu1 %v7739_v14, %s6751_s30  ;;  %v1432_v4 = vpop.f32.mrb[53].mxu0  ;;  %v2467_v63 = vsel %vm1119_vm8, %v2433_v49, %v2241_v35  ;;  %v1751_v21 = vsel %vm7290_vm11, %v1659_v43, 0 }
 0x221   : > { %2158 = vrot.lane.b32.xlu0 %v1910_v40, %s6755_s13  ;;  %v1433_v8 = vpop.f32.mrb[54].mxu0  ;;  %2681 = vmatmul.mubr.bf16.gmra.mrb[8].mxu1 %v2467_v63  ;;  %v1919_v22 = vshll.u32 %v1751_v21, 16 }
 0x222   : > { %v1511_v12 = vmul.f32 0.2, %v1431_v5  ;;  %v1434_v27 = vadd.f32 %v1433_v8, %v7416_v62  ;;  %v2099_v2 = vpop.permute.xlu1 %2098  ;;  %v1435_v31 = vpop.f32.mrb[55].mxu0  ;;  %6549 = vmatprep.mubr.msk.bf16.mxu1 %vm921_vm2, %v7563_v29  ;;  %v7779_v18 = vsel %vm7290_vm11, 0, %v1662_v42  ;;  %vm1479_vm14 = vcmp.ge.f32.partialorder %v1431_v5, 0.0 }
 0x223   : > { %v2143_v48 = vpop.permute.xlu0 %2142  ;;  %v1914_v17 = vshll.u32 %v7779_v18, 16  ;;  %v2275_v29 = vsel %vm921_vm2, %v7486_v28, %v1954_v15  ;;  %v1912_v54 = vshrl.u32 %v7779_v18, 16  ;;  %v1921_v13 = vrot.slane %v1919_v22, 1 }
 0x224   : > { %vm1480_vm15 = vcmp.ge.f32.partialorder %v1434_v27, 0.0  ;;  %v1512_v56 = vmul.f32 0.2, %v1434_v27  ;;  %2194 = vrot.lane.b32.xlu1 %v7784_v10, %s6754_s12  ;;  %v1543_v3 = vsel %vm1479_vm14, %v1431_v5, %v1511_v12  ;;  %v2307_v1 = vsel %vm954_vm3, %v2275_v29, %v2066_v44 }
 0x225   : > { %1971 = vrot.lane.b32.xlu0 %v1910_v40, %s6756_s14  ;;  %v1916_v37 = vrot.slane %v1914_v17, 1  ;;  %v2339_v28 = vsel %vm987_vm4, %v2307_v1, %v2099_v2  ;;  %v2050_v44 = vrot.slane %v7779_v18, 1  ;;  %v2051_v42 = vrot.slane %v1751_v21, 1 }
 0x226   : > { %v1544_v52 = vsel %vm1480_vm15, %v1434_v27, %v1512_v56  ;;  %v2179_v34 = vpop.permute.xlu1 %2178  ;;  %v2371_v47 = vsel %vm1020_vm5, %v2339_v28, %v2143_v48  ;;  %vm4678_vm14 = vcmask 1045509   ;;  %vm4681_vm15 = vcmask 1046534  }
 0x227   : > { %v1562_v38 = vpack.c.bf16 %v1544_v52, %v1543_v3  ;;  %v1956_v7 = vpop.permute.xlu0 %1955  ;;  %v1917_v41 = vor.u32 %v1916_v37, %v1912_v54  ;;  %v2403_v46 = vsel %vm1053_vm6, %v2371_v47, %v2179_v34  ;;  %v7819_v12 = vsel %vm634_vm0, %v2050_v44, %v2051_v42 }
 0x228   : > { %2083 = vrot.lane.b32.xlu1 %v7784_v10, %s6753_s9  ;;  %v2277_v3 = vsel %vm921_vm2, %v7507_v53, %v1956_v7 }
 0x229   : > { %v1664_v24 = vshrl.u32 %v1562_v38, 16  ;;  %2226 = vrot.lane.b32.xlu0 %v7779_v18, %s6752_s8  ;;  %v1667_v26 = vshll.u32 %v1562_v38, 16  ;;  %v1922_v43 = vsel %vm409_vm1, %v1917_v41, %v1921_v13 }
 0x22a   : > { %v2068_v15 = vpop.permute.xlu1 %2067 }
 0x22b   : > { %v1666_v40 = vrot.slane %v1664_v24, 7  ;;  %v2211_v39 = vpop.permute.xlu0 %2210  ;;  %v2309_v38 = vsel %vm954_vm3, %v2277_v3, %v2068_v15 }
 0x22c   : > { %2258 = vrot.lane.b32.xlu1 %v1922_v43, %s6757_s15  ;;  %v2435_v35 = vsel %vm1086_vm7, %v2403_v46, %v2211_v39 }
 0x22d   : > { %v1669_v0 = vor.u32 %v1667_v26, %v1666_v40  ;;  %2116 = vrot.lane.b32.xlu0 %v7779_v18, %s6751_s30  ;;  %v7808_v49 = vsel %vm7290_vm11, %v1666_v40, 0 }
 0x22e   : > { %v2243_v6 = vpop.permute.xlu1 %2242  ;;  %v1438_v50 = vpop.f32.mrb[56].mxu0  ;;  %v1931_v31 = vshll.u32 %v7808_v49, 16 }
 0x22f   : > { %v1439_v5 = vadd.f32 %v1438_v50, %v7416_v62  ;;  %v2101_v4 = vpop.permute.xlu0 %2100  ;;  %v1440_v63 = vpop.f32.mrb[57].mxu0  ;;  %v2470_v8 = vsel %vm1119_vm8, %v2435_v35, %v2243_v6  ;;  %v7815_v9 = vsel %vm7290_vm11, 0, %v1669_v0 }
 0x230   : > { %2160 = vrot.lane.b32.xlu1 %v1922_v43, %s6755_s13  ;;  %v1441_v27 = vpop.f32.mrb[58].mxu0  ;;  %2689 = vmatmul.mubr.bf16.gmra.mrb[12].mxu1 %v2470_v8  ;;  %v1926_v2 = vshll.u32 %v7815_v9, 16  ;;  %v1924_v29 = vshrl.u32 %v7815_v9, 16  ;;  %v1933_v34 = vrot.slane %v1931_v31, 1  ;;  %v2053_v46 = vrot.slane %v7815_v9, 1 }
 0x231   : > { %v1513_v21 = vmul.f32 0.2, %v1439_v5  ;;  %2196 = vrot.lane.b32.xlu0 %v7819_v12, %s6754_s12  ;;  %v1442_v48 = vadd.f32 %v1441_v27, %v7416_v62  ;;  %v1443_v17 = vpop.f32.mrb[59].mxu0  ;;  %6550 = vmatprep.mubr.msk.bf16.mxu1 %vm921_vm2, %v7590_v36  ;;  %vm1481_vm9 = vcmp.ge.f32.partialorder %v1439_v5, 0.0  ;;  %v2341_v36 = vsel %vm987_vm4, %v2309_v38, %v2101_v4 }
 0x232   : > { %v2145_v56 = vpop.permute.xlu1 %2144  ;;  %v1928_v54 = vrot.slane %v1926_v2, 1  ;;  %v2054_v4 = vrot.slane %v7808_v49, 1 }
 0x233   : > { %vm1482_vm10 = vcmp.ge.f32.partialorder %v1442_v48, 0.0  ;;  %v1514_v37 = vmul.f32 0.2, %v1442_v48  ;;  %v2181_v22 = vpop.permute.xlu0 %2180  ;;  %v1545_v41 = vsel %vm1481_vm9, %v1439_v5, %v1513_v21  ;;  %v2373_v40 = vsel %vm1020_vm5, %v2341_v36, %v2145_v56 }
 0x234   : > { %1973 = vrot.lane.b32.xlu1 %v1922_v43, %s6756_s14  ;;  %v1929_v52 = vor.u32 %v1928_v54, %v1924_v29  ;;  %v2405_v39 = vsel %vm1053_vm6, %v2373_v40, %v2181_v22  ;;  %v7860_v17 = vsel %vm634_vm0, %v2053_v46, %v2054_v4  ;;  %vm4684_vm9 = vcmask 1047559  }
 0x235   : > { %v1546_v1 = vsel %vm1482_vm10, %v1442_v48, %v1514_v37  ;;  %2085 = vrot.lane.b32.xlu0 %v7819_v12, %s6753_s9 }
 0x236   : > { %v1563_v24 = vpack.c.bf16 %v1546_v1, %v1545_v41  ;;  %v1958_v28 = vpop.permute.xlu1 %1957  ;;  %v1934_v13 = vsel %vm409_vm1, %v1929_v52, %v1933_v34 }
 0x237   : > { %v2070_v53 = vpop.permute.xlu0 %2069 }
 0x238   : > { %v1671_v7 = vshrl.u32 %v1563_v24, 16  ;;  %2228 = vrot.lane.b32.xlu1 %v7815_v9, %s6752_s8  ;;  %v1674_v26 = vshll.u32 %v1563_v24, 16 }
 0x239   : > { %2260 = vrot.lane.b32.xlu0 %v1934_v13, %s6757_s15 }
 0x23a   : > { %v1673_v15 = vrot.slane %v1671_v7, 7  ;;  %v2213_v43 = vpop.permute.xlu1 %2212 }
 0x23b   : > { %v2437_v47 = vsel %vm1086_vm7, %v2405_v39, %v2213_v43  ;;  %v2245_v44 = vpop.permute.xlu0 %2244  ;;  %v1446_v0 = vpop.f32.mrb[60].mxu0 }
 0x23c   : > { %v1676_v35 = vor.u32 %v1674_v26, %v1673_v15  ;;  %v1447_v6 = vadd.f32 %v1446_v0, %v7416_v62  ;;  %2118 = vrot.lane.b32.xlu1 %v7815_v9, %s6751_s30  ;;  %v1448_v50 = vpop.f32.mrb[61].mxu0  ;;  %v2473_v42 = vsel %vm1119_vm8, %v2437_v47, %v2245_v44  ;;  %v1753_v21 = vsel %vm7290_vm11, %v1673_v15, 0 }
 0x23d   : > { %2162 = vrot.lane.b32.xlu0 %v1934_v13, %s6755_s13  ;;  %v1449_v5 = vpop.f32.mrb[62].mxu0  ;;  %2697 = vmatmul.mubr.bf16.gmra.mrb[16].mxu1 %v2473_v42  ;;  %v1943_v54 = vshll.u32 %v1753_v21, 16  ;;  %v2057_v0 = vrot.slane %v1753_v21, 1 }
 0x23e   : > { %v1515_v63 = vmul.f32 0.2, %v1447_v6  ;;  %v1450_v8 = vadd.f32 %v1449_v5, %v7416_v62  ;;  %v2103_v27 = vpop.permute.xlu1 %2102  ;;  %v1451_v2 = vpop.f32.mrb[63].mxu0  ;;  %6551 = vmatprep.mubr.msk.bf16.mxu1 %vm921_vm2, %v7615_v59  ;;  %v7855_v31 = vsel %vm7290_vm11, 0, %v1676_v35  ;;  %vm1483_vm12 = vcmp.ge.f32.partialorder %v1447_v6, 0.0 }
 0x23f   : > { %v2147_v48 = vpop.permute.xlu0 %2146  ;;  %v1938_v49 = vshll.u32 %v7855_v31, 16  ;;  %v2279_v59 = vsel %vm921_vm2, %v7533_v30, %v1958_v28  ;;  %v1936_v56 = vshrl.u32 %v7855_v31, 16  ;;  %v1945_v36 = vrot.slane %v1943_v54, 1 }
 0x240   : > { %vm1484_vm13 = vcmp.ge.f32.partialorder %v1450_v8, 0.0  ;;  %v1516_v62 = vmul.f32 0.2, %v1450_v8  ;;  %2198 = vrot.lane.b32.xlu1 %v7860_v17, %s6754_s12  ;;  %v1547_v37 = vsel %vm1483_vm12, %v1447_v6, %v1515_v63  ;;  %v2311_v41 = vsel %vm954_vm3, %v2279_v59, %v2070_v53 }
 0x241   : > { %1975 = vrot.lane.b32.xlu0 %v1934_v13, %s6756_s14  ;;  %v1940_v29 = vrot.slane %v1938_v49, 1  ;;  %v2343_v30 = vsel %vm987_vm4, %v2311_v41, %v2103_v27  ;;  %v2056_v53 = vrot.slane %v7855_v31, 1 }
 0x242   : > { %v1548_v22 = vsel %vm1484_vm13, %v1450_v8, %v1516_v62  ;;  %v2183_v3 = vpop.permute.xlu1 %2182  ;;  %v2375_v15 = vsel %vm1020_vm5, %v2343_v30, %v2147_v48 }
 0x243   : > { %v1564_v52 = vpack.c.bf16 %v1548_v22, %v1547_v37  ;;  %v1960_v34 = vpop.permute.xlu0 %1959  ;;  %v1941_v38 = vor.u32 %v1940_v29, %v1936_v56  ;;  %v2407_v26 = vsel %vm1053_vm6, %v2375_v15, %v2183_v3  ;;  %v7890_v50 = vsel %vm634_vm0, %v2056_v53, %v2057_v0 }
 0x244   : > { %2087 = vrot.lane.b32.xlu1 %v7860_v17, %s6753_s9  ;;  %v2281_v25 = vsel %vm921_vm2, %v7559_v51, %v1960_v34 }
 0x245   : > { %v1678_v1 = vshrl.u32 %v1564_v52, 16  ;;  %2230 = vrot.lane.b32.xlu0 %v7855_v31, %s6752_s8  ;;  %v1681_v13 = vshll.u32 %v1564_v52, 16  ;;  %v1946_v7 = vsel %vm409_vm1, %v1941_v38, %v1945_v36 }
 0x246   : > { %v2072_v24 = vpop.permute.xlu1 %2071 }
 0x247   : > { %v1680_v28 = vrot.slane %v1678_v1, 7  ;;  %v2215_v40 = vpop.permute.xlu0 %2214  ;;  %v2313_v48 = vsel %vm954_vm3, %v2281_v25, %v2072_v24 }
 0x248   : > { %2262 = vrot.lane.b32.xlu1 %v1946_v7, %s6757_s15  ;;  %v2439_v47 = vsel %vm1086_vm7, %v2407_v26, %v2215_v40 }
 0x249   : > { %2120 = vrot.lane.b32.xlu0 %v7855_v31, %s6751_s30  ;;  %v1683_v39 = vor.u32 %v1681_v13, %v1680_v28  ;;  %v1754_v43 = vsel %vm7290_vm11, %v1680_v28, 0 }
 0x24a   : > { %v2247_v44 = vpop.permute.xlu1 %2246  ;;  %v2132_v5 = vshll.u32 %v1754_v43, 16  ;;  %v2170_v52 = vrot.slane %v1754_v43, 1 }
 0x24b   : > { %v2105_v46 = vpop.permute.xlu0 %2104  ;;  %v2476_v35 = vsel %vm1119_vm8, %v2439_v47, %v2247_v44  ;;  %v1737_v6 = vsel %vm7290_vm11, 0, %v1683_v39  ;;  %vm4675_vm11 = vcmask 1044484  }
 0x24c   : > { %2164 = vrot.lane.b32.xlu1 %v1946_v7, %s6755_s13  ;;  %2705 = vmatmul.mubr.bf16.gmra.mrb[20].mxu1 %v2476_v35  ;;  %v2127_v42 = vshll.u32 %v1737_v6, 16  ;;  %v2125_v63 = vshrl.u32 %v1737_v6, 16  ;;  %v2134_v21 = vrot.slane %v2132_v5, 1  ;;  %v2345_v49 = vsel %vm987_vm4, %v2313_v48, %v2105_v46 }
 0x24d   : > { %2200 = vrot.lane.b32.xlu0 %v7890_v50, %s6754_s12  ;;  %6552 = vmatprep.mubr.msk.bf16.mxu1 %vm921_vm2, %v7642_v11  ;;  %v2169_v22 = vrot.slane %v1737_v6, 1 }
 0x24e   : > { %v2149_v4 = vpop.permute.xlu1 %2148  ;;  %v2129_v8 = vrot.slane %v2127_v42, 1 }
 0x24f   : > { %v2185_v27 = vpop.permute.xlu0 %2184  ;;  %v2377_v59 = vsel %vm1020_vm5, %v2345_v49, %v2149_v4  ;;  %v7915_v41 = vsel %vm634_vm0, %v2169_v22, %v2170_v52 }
 0x250   : > { %1977 = vrot.lane.b32.xlu1 %v1946_v7, %s6756_s14  ;;  %v2130_v2 = vor.u32 %v2129_v8, %v2125_v63  ;;  %v2409_v51 = vsel %vm1053_vm6, %v2377_v59, %v2185_v27 }
 0x251   : > { %2089 = vrot.lane.b32.xlu0 %v7890_v50, %s6753_s9 }
 0x252   : > { %v1962_v62 = vpop.permute.xlu1 %1961  ;;  %v2135_v11 = vsel %vm409_vm1, %v2130_v2, %v2134_v21 }
 0x253   : > { %v2074_v56 = vpop.permute.xlu0 %2073  ;;  %v2283_v1 = vsel %vm921_vm2, %v7585_v32, %v1962_v62 }
 0x254   : > { %2232 = vrot.lane.b32.xlu1 %v1737_v6, %s6752_s8  ;;  %v2315_v24 = vsel %vm954_vm3, %v2283_v1, %v2074_v56 }
 0x255   : > { %2264 = vrot.lane.b32.xlu0 %v2135_v11, %s6757_s15 }
 0x256   : > { %v2217_v29 = vpop.permute.xlu1 %2216 }
 0x257   : > { %v2441_v54 = vsel %vm1086_vm7, %v2409_v51, %v2217_v29  ;;  %v2249_v37 = vpop.permute.xlu0 %2248 }
 0x258   : > { %2122 = vrot.lane.b32.xlu1 %v1737_v6, %s6751_s30  ;;  %v2479_v3 = vsel %vm1119_vm8, %v2441_v54, %v2249_v37 }
 0x259   : > { %2166 = vrot.lane.b32.xlu0 %v2135_v11, %s6755_s13  ;;  %2713 = vmatmul.mubr.bf16.gmra.mrb[24].mxu1 %v2479_v3 }
 0x25a   : > { %v2107_v34 = vpop.permute.xlu1 %2106  ;;  %6553 = vmatprep.mubr.msk.bf16.mxu1 %vm921_vm2, %v7671_v60 }
 0x25b   : > { %v2151_v38 = vpop.permute.xlu0 %2150  ;;  %v2347_v60 = vsel %vm987_vm4, %v2315_v24, %v2107_v34 }
 0x25c   : > { %2202 = vrot.lane.b32.xlu1 %v7915_v41, %s6754_s12  ;;  %v2379_v40 = vsel %vm1020_vm5, %v2347_v60, %v2151_v38 }
 0x25d   : > { %2234 = vrot.lane.b32.xlu0 %v7297_v33, %s6752_s8 }
 0x25e   : > { %v2187_v30 = vpop.permute.xlu1 %2186 }
 0x25f   : > { %v1964_v36 = vpop.permute.xlu0 %1963  ;;  %v2411_v7 = vsel %vm1053_vm6, %v2379_v40, %v2187_v30 }
 0x260   : > { %2266 = vrot.lane.b32.xlu1 %v7311_v19, %s6757_s15  ;;  %v2285_v39 = vsel %vm921_vm2, %v7611_v58, %v1964_v36 }
 0x262   : > { %v2076_v28 = vpop.permute.xlu1 %2075 }
 0x263   : > { %v2219_v13 = vpop.permute.xlu0 %2218  ;;  %v2317_v43 = vsel %vm954_vm3, %v2285_v39, %v2076_v28 }
 0x264   : > { %v2443_v32 = vsel %vm1086_vm7, %v2411_v7, %v2219_v13 }
 0x266   : > { %v2251_v15 = vpop.permute.xlu1 %2250 }
 0x267   : > { %v2109_v53 = vpop.permute.xlu0 %2108  ;;  %v2482_v33 = vsel %vm1119_vm8, %v2443_v32, %v2251_v15 }
 0x268   : > { %2721 = vmatmul.mubr.bf16.gmra.mrb[28].mxu1 %v2482_v33  ;;  %v2349_v47 = vsel %vm987_vm4, %v2317_v43, %v2109_v53 }
 0x269   : > { %6554 = vmatprep.mubr.msk.bf16.mxu1 %vm921_vm2, %v7708_v23 }
 0x26a   : > { %v2153_v26 = vpop.permute.xlu1 %2152 }
 0x26b   : > { %v2189_v19 = vpop.permute.xlu0 %2188  ;;  %v2381_v0 = vsel %vm1020_vm5, %v2349_v47, %v2153_v26 }
 0x26c   : > { %v2413_v35 = vsel %vm1053_vm6, %v2381_v0, %v2189_v19 }
 0x26e   : > { %v1966_v44 = vpop.permute.xlu1 %1965 }
 0x26f   : > { %v2078_v46 = vpop.permute.xlu0 %2077  ;;  %v2287_v63 = vsel %vm921_vm2, %v7637_v55, %v1966_v44 }
 0x270   : > { %v2319_v25 = vsel %vm954_vm3, %v2287_v63, %v2078_v46 }
 0x272   : > { %v2221_v6 = vpop.permute.xlu1 %2220 }
 0x273   : > { %v2445_v42 = vsel %vm1086_vm7, %v2413_v35, %v2221_v6  ;;  %v2253_v5 = vpop.permute.xlu0 %2252 }
 0x274   : > { %v2485_v23 = vsel %vm1119_vm8, %v2445_v42, %v2253_v5 }
 0x275   : > { %2729 = vmatmul.mubr.bf16.gmra.mrb[32].mxu1 %v2485_v23 }
 0x276   : > { %v2111_v4 = vpop.permute.xlu1 %2110  ;;  %6555 = vmatprep.mubr.msk.bf16.mxu1 %vm921_vm2, %v7743_v61 }
 0x277   : > { %v2155_v58 = vpop.permute.xlu0 %2154  ;;  %v2351_v2 = vsel %vm987_vm4, %v2319_v25, %v2111_v4 }
 0x278   : > { %v2383_v49 = vsel %vm1020_vm5, %v2351_v2, %v2155_v58 }
 0x27a   : > { %v2191_v8 = vpop.permute.xlu1 %2190 }
 0x27b   : > { %v1968_v27 = vpop.permute.xlu0 %1967  ;;  %v2415_v62 = vsel %vm1053_vm6, %v2383_v49, %v2191_v8 }
 0x27c   : > { %v2289_v29 = vsel %vm921_vm2, %v7665_v16, %v1968_v27 }
 0x27e   : > { %v2080_v21 = vpop.permute.xlu1 %2079 }
 0x27f   : > { %v2223_v48 = vpop.permute.xlu0 %2222  ;;  %v2321_v54 = vsel %vm954_vm3, %v2289_v29, %v2080_v21 }
 0x280   : > { %v2447_v11 = vsel %vm1086_vm7, %v2415_v62, %v2223_v48 }
 0x282   : > { %v2255_v59 = vpop.permute.xlu1 %2254 }
 0x283   : > { %v2113_v61 = vpop.permute.xlu0 %2112  ;;  %v2488_v56 = vsel %vm1119_vm8, %v2447_v11, %v2255_v59 }
 0x284   : > { %2737 = vmatmul.mubr.bf16.gmra.mrb[36].mxu1 %v2488_v56  ;;  %v2353_v37 = vsel %vm987_vm4, %v2321_v54, %v2113_v61 }
 0x285   : > { %6556 = vmatprep.mubr.msk.bf16.mxu1 %vm921_vm2, %v7784_v10 }
 0x286   : > { %v2157_v55 = vpop.permute.xlu1 %2156 }
 0x287   : > { %v2193_v51 = vpop.permute.xlu0 %2192  ;;  %v2385_v3 = vsel %vm1020_vm5, %v2353_v37, %v2157_v55 }
 0x288   : > { %v2417_v34 = vsel %vm1053_vm6, %v2385_v3, %v2193_v51 }
 0x28a   : > { %v1970_v22 = vpop.permute.xlu1 %1969 }
 0x28b   : > { %v2082_v52 = vpop.permute.xlu0 %2081  ;;  %v2291_v24 = vsel %vm921_vm2, %v7703_v20, %v1970_v22 }
 0x28c   : > { %v2323_v13 = vsel %vm954_vm3, %v2291_v24, %v2082_v52 }
 0x28e   : > { %v2225_v38 = vpop.permute.xlu1 %2224 }
 0x28f   : > { %v2449_v1 = vsel %vm1086_vm7, %v2417_v34, %v2225_v38  ;;  %v2257_v30 = vpop.permute.xlu0 %2256 }
 0x290   : > { %v2491_v10 = vsel %vm1119_vm8, %v2449_v1, %v2257_v30 }
 0x291   : > { %2745 = vmatmul.mubr.bf16.gmra.mrb[40].mxu1 %v2491_v10 }
 0x292   : > { %v2115_v36 = vpop.permute.xlu1 %2114  ;;  %6557 = vmatprep.mubr.msk.bf16.mxu1 %vm921_vm2, %v7819_v12 }
 0x293   : > { %v2159_v16 = vpop.permute.xlu0 %2158  ;;  %v2355_v40 = vsel %vm987_vm4, %v2323_v13, %v2115_v36 }
 0x294   : > { %v2387_v15 = vsel %vm1020_vm5, %v2355_v40, %v2159_v16 }
 0x296   : > { %v2195_v60 = vpop.permute.xlu1 %2194 }
 0x297   : > { %v1972_v28 = vpop.permute.xlu0 %1971  ;;  %v2419_v53 = vsel %vm1053_vm6, %v2387_v15, %v2195_v60  ;;  %v2528_v60 = vsub.s32 1, %v7400_v45 }
 0x298   : > { %v2293_v43 = vsel %vm921_vm2, %v7739_v14, %v1972_v28 }
 0x29a   : > { %v2084_v7 = vpop.permute.xlu1 %2083 }
 0x29b   : > { %v2227_v32 = vpop.permute.xlu0 %2226  ;;  %v2325_v47 = vsel %vm954_vm3, %v2293_v43, %v2084_v7 }
 0x29c   : > { %v2451_v33 = vsel %vm1086_vm7, %v2419_v53, %v2227_v32  ;;  %v6758_v32 = vmov 1966171168  }
 0x29d   : > { %v2923_v15 = vunpack.c.l.s4 %v6758_v32 }
 0x29e   : > { %v2259_v26 = vpop.permute.xlu1 %2258 }
 0x29f   : > { %v2117_v12 = vpop.permute.xlu0 %2116  ;;  %v2494_v19 = vsel %vm1119_vm8, %v2451_v33, %v2259_v26 }
 0x2a0   : > { %2753 = vmatmul.mubr.bf16.gmra.mrb[44].mxu1 %v2494_v19  ;;  %v2357_v44 = vsel %vm987_vm4, %v2325_v47, %v2117_v12  ;;  %v2924_v12 = vunpack.c.0.s8 %v2923_v15 }
 0x2a1   : > { %6558 = vmatprep.mubr.msk.bf16.mxu1 %vm921_vm2, %v7860_v17 }
 0x2a2   : > { %v2161_v20 = vpop.permute.xlu1 %2160 }
 0x2a3   : > { %v2197_v39 = vpop.permute.xlu0 %2196  ;;  %v2389_v46 = vsel %vm1020_vm5, %v2357_v44, %v2161_v20  ;;  %v8020_v44 = vsub.s32 %v2924_v12, %v7400_v45 }
 0x2a4   : > { %v2421_v6 = vsel %vm1053_vm6, %v2389_v46, %v2197_v39 }
 0x2a6   : > { %v1974_v0 = vpop.permute.xlu1 %1973 }
 0x2a7   : > { %v2086_v35 = vpop.permute.xlu0 %2085  ;;  %v2295_v58 = vsel %vm921_vm2, %v7779_v18, %v1974_v0 }
 0x2a8   : > { %v2327_v27 = vsel %vm954_vm3, %v2295_v58, %v2086_v35 }
 0x2aa   : > { %v2229_v42 = vpop.permute.xlu1 %2228 }
 0x2ab   : > { %v2453_v5 = vsel %vm1086_vm7, %v2421_v6, %v2229_v42  ;;  %v2261_v23 = vpop.permute.xlu0 %2260 }
 0x2ac   : > { %v2497_v17 = vsel %vm1119_vm8, %v2453_v5, %v2261_v23 }
 0x2ad   : > { %2761 = vmatmul.mubr.bf16.gmra.mrb[48].mxu1 %v2497_v17 }
 0x2ae   : > { %v2119_v4 = vpop.permute.xlu1 %2118  ;;  %6559 = vmatprep.mubr.msk.bf16.mxu1 %vm921_vm2, %v7890_v50 }
 0x2af   : > { %v2163_v14 = vpop.permute.xlu0 %2162  ;;  %v2359_v25 = vsel %vm987_vm4, %v2327_v27, %v2119_v4 }
 0x2b0   : > { %v2391_v48 = vsel %vm1020_vm5, %v2359_v25, %v2163_v14 }
 0x2b2   : > { %v2199_v63 = vpop.permute.xlu1 %2198 }
 0x2b3   : > { %v1976_v8 = vpop.permute.xlu0 %1975  ;;  %v2423_v49 = vsel %vm1053_vm6, %v2391_v48, %v2199_v63 }
 0x2b4   : > { %v2297_v56 = vsel %vm921_vm2, %v7815_v9, %v1976_v8 }
 0x2b6   : > { %v2088_v2 = vpop.permute.xlu1 %2087 }
 0x2b7   : > { %v2231_v21 = vpop.permute.xlu0 %2230  ;;  %v2329_v55 = vsel %vm954_vm3, %v2297_v56, %v2088_v2 }
 0x2b8   : > { %v2455_v62 = vsel %vm1086_vm7, %v2423_v49, %v2231_v21 }
 0x2ba   : > { %v2263_v11 = vpop.permute.xlu1 %2262 }
 0x2bb   : > { %v2121_v50 = vpop.permute.xlu0 %2120  ;;  %v2500_v59 = vsel %vm1119_vm8, %v2455_v62, %v2263_v11 }
 0x2bc   : > { %2769 = vmatmul.mubr.bf16.gmra.mrb[52].mxu1 %v2500_v59  ;;  %v2361_v51 = vsel %vm987_vm4, %v2329_v55, %v2121_v50 }
 0x2bd   : > { %6560 = vmatprep.mubr.msk.bf16.mxu1 %vm921_vm2, %v7915_v41 }
 0x2be   : > { %v2165_v18 = vpop.permute.xlu1 %2164 }
 0x2bf   : > { %v2201_v61 = vpop.permute.xlu0 %2200  ;;  %v2393_v54 = vsel %vm1020_vm5, %v2361_v51, %v2165_v18 }
 0x2c0   : > { %v2425_v22 = vsel %vm1053_vm6, %v2393_v54, %v2201_v61 }
 0x2c2   : > { %v1978_v29 = vpop.permute.xlu1 %1977 }
 0x2c3   : > { %v2090_v37 = vpop.permute.xlu0 %2089  ;;  %v2299_v52 = vsel %vm921_vm2, %v7855_v31, %v1978_v29 }
 0x2c4   : > { %v2331_v9 = vsel %vm954_vm3, %v2299_v52, %v2090_v37 }
 0x2c6   : > { %v2233_v3 = vpop.permute.xlu1 %2232 }
 0x2c7   : > { %v2457_v41 = vsel %vm1086_vm7, %v2425_v22, %v2233_v3  ;;  %v2265_v34 = vpop.permute.xlu0 %2264 }
 0x2c8   : > { %v2503_v38 = vsel %vm1119_vm8, %v2457_v41, %v2265_v34 }
 0x2c9   : > { %2777 = vmatmul.mubr.bf16.gmra.mrb[56].mxu1 %v2503_v38 }
 0x2ca   : > { %v2123_v1 = vpop.permute.xlu1 %2122  ;;  %6561 = vmatprep.mubr.msk.bf16.mxu1 %vm921_vm2, %v7318_v57  ;;  %v6740_v57 = vld [vmem:[%s9529_s1] sm:$0x7] }
 0x2cb   : > { %v2363_v30 = vsel %vm987_vm4, %v2331_v9, %v2123_v1  ;;  %v2167_v10 = vpop.permute.xlu0 %2166  ;;  %v8015_v7 = vrot.slane %v6740_v57, %v2528_v60 }
 0x2cc   : > { %v2395_v36 = vsel %vm1020_vm5, %v2363_v30, %v2167_v10 }
 0x2ce   : > { %v2203_v16 = vpop.permute.xlu1 %2202 }
 0x2cf   : > { %v2427_v31 = vsel %vm1053_vm6, %v2395_v36, %v2203_v16  ;;  %v2235_v24 = vpop.permute.xlu0 %2234  ;;  %vm4666_vm6 = vcmask 1041409  }
 0x2d0   : > { %v2459_v28 = vsel %vm1086_vm7, %v2427_v31, %v2235_v24  ;;  %vm4669_vm7 = vcmask 1042434  }
 0x2d2   : > { %v2267_v13 = vpop.permute.xlu1 %2266 }
 0x2d3   : > { %v2506_v40 = vsel %vm1119_vm8, %v2459_v28, %v2267_v13  ;;  %vm4672_vm8 = vcmask 1043459  }
 0x2d4   : > { %2785 = vmatmul.mubr.bf16.gmra.mrb[60].mxu1 %v2506_v40 }
 0x2d8   : > { %v2666_v53 = vpop.f32.mrb[0].mxu1 }
 0x2d9   : > { %v2667_v33 = vadd.f32 %v2666_v53, %v8015_v7  ;;  %v2668_v26 = vpop.f32.mrb[1].mxu1 }
 0x2da   : > { %v2669_v19 = vpop.f32.mrb[2].mxu1 }
 0x2db   : > { %v2825_v20 = vmul.f32 0.2, %v2667_v33  ;;  %v2670_v39 = vadd.f32 %v2669_v19, %v8015_v7  ;;  %v2671_v43 = vpop.f32.mrb[3].mxu1  ;;  %vm2793_vm0 = vcmp.ge.f32.partialorder %v2667_v33, 0.0 }
 0x2dd   : > { %vm2794_vm1 = vcmp.ge.f32.partialorder %v2670_v39, 0.0  ;;  %v2826_v47 = vmul.f32 0.2, %v2670_v39  ;;  %v2857_v0 = vsel %vm2793_vm0, %v2667_v33, %v2825_v20 }
 0x2df   : > { %v2858_v46 = vsel %vm2794_vm1, %v2670_v39, %v2826_v47 }
 0x2e0   : > { %v2889_v35 = vpack.c.bf16 %v2858_v46, %v2857_v0  ;;  %v6562_v6 = vpack.c.bf16 %v2858_v46, %v2858_v46 }
 0x2e2   : > { %v2928_v42 = vrot.slane %v2889_v35, %v8020_v44  ;;  %v2935_v5 = vrot.slane %v6562_v6, %v8020_v44 }
 0x2e4   : > { %v2936_v23 = vcombine.high %v2928_v42, %v2928_v42  ;;  %v2937_v17 = vcombine.high %v2935_v5, %v2935_v5  ;;  %v2944_v4 = vrot.slane %v2928_v42, %v8020_v44  ;;  %v2951_v14 = vrot.slane %v2935_v5, %v8020_v44 }
 0x2e6   : > { %v2958_v58 = vrot.slane %v2936_v23, %v8020_v44  ;;  %v2965_v63 = vrot.slane %v2937_v17, %v8020_v44  ;;  %v2966_v8 = vcombine.high %v2944_v4, %v2944_v4  ;;  %v2967_v27 = vcombine.high %v2951_v14, %v2951_v14 }
 0x2e7   : > { %v3711_v25 = vrot.slane %v2944_v4, %v8020_v44  ;;  %v3767_v2 = vrot.slane %v2951_v14, %v8020_v44  ;;  %v2674_v21 = vpop.f32.mrb[4].mxu1 }
 0x2e8   : > { %v2968_v48 = vcombine.high %v2958_v58, %v2958_v58  ;;  %v2969_v49 = vcombine.high %v2965_v63, %v2965_v63  ;;  %v3725_v62 = vrot.slane %v2958_v58, %v8020_v44  ;;  %v3739_v11 = vrot.slane %v2966_v8, %v8020_v44  ;;  %v2676_v50 = vpop.f32.mrb[5].mxu1 }
 0x2e9   : > { %v3718_v59 = vrot.slane %v3711_v25, %v8020_v44  ;;  %v3774_v18 = vrot.slane %v3767_v2, %v8020_v44  ;;  %v3781_v61 = vrot.slane %v2965_v63, %v8020_v44  ;;  %v3795_v56 = vrot.slane %v2967_v27, %v8020_v44  ;;  %v2677_v55 = vpop.f32.mrb[6].mxu1 }
 0x2ea   : > { %v3732_v51 = vrot.slane %v3725_v62, %v8020_v44  ;;  %v3746_v29 = vrot.slane %v3739_v11, %v8020_v44  ;;  %v3753_v54 = vrot.slane %v2968_v48, %v8020_v44  ;;  %v3809_v37 = vrot.slane %v2969_v49, %v8020_v44  ;;  %v2679_v22 = vpop.f32.mrb[7].mxu1 }
 0x2eb   : > { %v3788_v3 = vrot.slane %v3781_v61, %v8020_v44  ;;  %v3802_v52 = vrot.slane %v3795_v56, %v8020_v44  ;;  %v4601_v41 = vunpack.c.l.b16 %v3718_v59  ;;  %v4605_v34 = vunpack.c.l.b16 %v3774_v18 }
 0x2ec   : > { %v3760_v38 = vrot.slane %v3753_v54, %v8020_v44  ;;  %v4602_v9 = vunpack.c.l.b16 %v3732_v51  ;;  %v4603_v1 = vunpack.c.l.b16 %v3746_v29  ;;  %v2675_v30 = vadd.f32 %v2674_v21, %v8015_v7 }
 0x2ed   : > { %v4606_v10 = vunpack.c.l.b16 %v3788_v3  ;;  %v4674_v36 = vrot.slane %v4605_v34, 4  ;;  %v4792_v16 = vrot.slane %v4601_v41, 1  ;;  %v4798_v31 = vrot.slane %v4605_v34, 5 }
 0x2ee   : > { %v4604_v24 = vunpack.c.l.b16 %v3760_v38  ;;  %v4665_v60 = vrot.slane %v4602_v9, 7  ;;  %v4668_v28 = vrot.slane %v4603_v1, 6  ;;  %v4794_v13 = vrot.slane %v4603_v1, 7 }
 0x2ef   : > { %v4793_v40 = vsel %vm4666_vm6, %v4602_v9, %v4792_v16  ;;  %vm2795_vm10 = vcmp.ge.f32.partialorder %v2675_v30, 0.0  ;;  %v2827_v57 = vmul.f32 0.2, %v2675_v30  ;;  %v2678_v32 = vadd.f32 %v2677_v55, %v8015_v7 }
 0x2f0   : > { %v4667_v15 = vsel %vm4666_vm6, %v4665_v60, %v4601_v41  ;;  %v4796_v53 = vrot.slane %v4604_v24, 6  ;;  %v3816_v33 = vrot.slane %v3809_v37, %v8020_v44  ;;  %v8048_v26 = vunpack.c.l.b16 %v3802_v52 }
 0x2f1   : > { %v2859_v12 = vsel %vm2795_vm10, %v2675_v30, %v2827_v57  ;;  %vm2796_vm12 = vcmp.ge.f32.partialorder %v2678_v32, 0.0  ;;  %v2828_v19 = vmul.f32 0.2, %v2678_v32  ;;  %v4795_v20 = vsel %vm4669_vm7, %v4794_v13, %v4793_v40 }
 0x2f2   : > { %v8051_v39 = vunpack.c.l.b16 %v3816_v33  ;;  %v4797_v43 = vsel %vm4672_vm8, %v4796_v53, %v4795_v20  ;;  %v4800_v47 = vrot.slane %v4606_v10, 4  ;;  %v4802_v0 = vrot.slane %v8048_v26, 3 }
 0x2f3   : > { %v2860_v46 = vsel %vm2796_vm12, %v2678_v32, %v2828_v19  ;;  %v4799_v35 = vsel %vm4675_vm11, %v4798_v31, %v4797_v43  ;;  %v4670_v6 = vsel %vm4669_vm7, %v4668_v28, %v4667_v15  ;;  %v4671_v42 = vrot.slane %v4604_v24, 5 }
 0x2f4   : > { %v2890_v5 = vpack.c.bf16 %v2860_v46, %v2859_v12  ;;  %v6563_v23 = vpack.c.bf16 %v2860_v46, %v2860_v46  ;;  %v2682_v17 = vpop.f32.mrb[8].mxu1  ;;  %v4801_v4 = vsel %vm4678_vm14, %v4800_v47, %v4799_v35  ;;  %v4804_v14 = vrot.slane %v8051_v39, 2 }
 0x2f5   : > { %v2684_v58 = vpop.f32.mrb[9].mxu1  ;;  %v4803_v63 = vsel %vm4681_vm15, %v4802_v0, %v4801_v4  ;;  %v4673_v8 = vsel %vm4672_vm8, %v4671_v42, %v4670_v6  ;;  %v2683_v49 = vadd.f32 %v2682_v17, %v8015_v7  ;;  %v4677_v59 = vrot.slane %v4606_v10, 3 }
 0x2f6   : > { %v2977_v27 = vrot.slane %v2890_v5, %v8020_v44  ;;  %v2984_v25 = vrot.slane %v6563_v23, %v8020_v44  ;;  %v2685_v2 = vpop.f32.mrb[10].mxu1  ;;  %v4805_v21 = vsel %vm4684_vm9, %v4804_v14, %v4803_v63  ;;  %v4676_v48 = vsel %vm4675_vm11, %v4674_v36, %v4673_v8 }
 0x2f7   : > { %v2686_v62 = vadd.f32 %v2685_v2, %v8015_v7  ;;  %v2687_v11 = vpop.f32.mrb[11].mxu1  ;;  %v4904_v50 = vpack.c.b16 %v4805_v21, %v4805_v21  ;;  %v8071_v29 = vsel %vm4678_vm14, %v4677_v59, %v4676_v48  ;;  %v2829_v34 = vmul.f32 0.2, %v2683_v49 }
 0x2f8   : > { %v2985_v18 = vcombine.high %v2977_v27, %v2977_v27  ;;  %v2986_v61 = vcombine.high %v2984_v25, %v2984_v25  ;;  %v2993_v56 = vrot.slane %v2977_v27, %v8020_v44  ;;  %v3000_v55 = vrot.slane %v2984_v25, %v8020_v44 }
 0x2f9   : > { %v2830_v51 = vmul.f32 0.2, %v2686_v62  ;;  %4912 = vrot.lane.b32.xlu0 %v4904_v50, %s6756_s14  ;;  %vm2798_vm13 = vcmp.ge.f32.partialorder %v2686_v62, 0.0  ;;  %vm2797_vm0 = vcmp.ge.f32.partialorder %v2683_v49, 0.0 }
 0x2fa   : > { %v3007_v54 = vrot.slane %v2985_v18, %v8020_v44  ;;  %v3014_v37 = vrot.slane %v2986_v61, %v8020_v44  ;;  %v3015_v22 = vcombine.high %v2993_v56, %v2993_v56  ;;  %v3016_v3 = vcombine.high %v3000_v55, %v3000_v55 }
 0x2fb   : > { %v4934_v52 = vrot.slane %v2993_v56, %v8020_v44  ;;  %v4990_v41 = vrot.slane %v3000_v55, %v8020_v44  ;;  %v2862_v16 = vsel %vm2798_vm13, %v2686_v62, %v2830_v51  ;;  %v2861_v32 = vsel %vm2797_vm0, %v2683_v49, %v2829_v34 }
 0x2fc   : > { %v3017_v38 = vcombine.high %v3007_v54, %v3007_v54  ;;  %v4948_v9 = vrot.slane %v3007_v54, %v8020_v44  ;;  %v4962_v1 = vrot.slane %v3015_v22, %v8020_v44  ;;  %v5004_v36 = vrot.slane %v3014_v37, %v8020_v44 }
 0x2fd   : > { %v8080_v30 = vrot.slane %v4934_v52, %v8020_v44  ;;  %v4997_v10 = vrot.slane %v4990_v41, %v8020_v44  ;;  %v3018_v31 = vcombine.high %v3014_v37, %v3014_v37  ;;  %v8091_v40 = vrot.slane %v3016_v3, %v8020_v44 }
 0x2fe   : > { %v4955_v24 = vrot.slane %v4948_v9, %v8020_v44  ;;  %v4969_v60 = vrot.slane %v4962_v1, %v8020_v44  ;;  %v4976_v28 = vrot.slane %v3017_v38, %v8020_v44  ;;  %v8088_v13 = vrot.slane %v5004_v36, %v8020_v44 }
 0x2ff   : > { %v5824_v57 = vunpack.c.l.b16 %v8080_v30  ;;  %v5828_v33 = vunpack.c.l.b16 %v4997_v10  ;;  %v2891_v12 = vpack.c.bf16 %v2862_v16, %v2861_v32  ;;  %v5032_v20 = vrot.slane %v3018_v31, %v8020_v44 }
 0x300   : > { %v4983_v15 = vrot.slane %v4976_v28, %v8020_v44  ;;  %v5825_v53 = vunpack.c.l.b16 %v4955_v24  ;;  %v8095_v19 = vunpack.c.l.b16 %v4969_v60  ;;  %v5025_v0 = vrot.slane %v8091_v40, %v8020_v44 }
 0x301   : > { %v6024_v43 = vrot.slane %v5824_v57, 1  ;;  %v5829_v46 = vunpack.c.l.b16 %v8088_v13  ;;  %v6564_v35 = vpack.c.bf16 %v2862_v16, %v2862_v16  ;;  %v3026_v6 = vrot.slane %v2891_v12, %v8020_v44 }
 0x302   : > { %v8103_v5 = vunpack.c.l.b16 %v4983_v15  ;;  %v5888_v23 = vrot.slane %v5825_v53, 7  ;;  %v8105_v17 = vrot.slane %v5828_v33, 4  ;;  %v8107_v4 = vrot.slane %v5828_v33, 5 }
 0x303   : > { %v2690_v42 = vpop.f32.mrb[12].mxu1  ;;  %v5890_v58 = vrot.slane %v8095_v19, 6  ;;  %v3033_v63 = vrot.slane %v6564_v35, %v8020_v44  ;;  %v3034_v8 = vcombine.high %v3026_v6, %v3026_v6  ;;  %v3042_v27 = vrot.slane %v3026_v6, %v8020_v44 }
 0x304   : > { %v2692_v14 = vpop.f32.mrb[13].mxu1  ;;  %v6025_v2 = vsel %vm4666_vm6, %v5825_v53, %v6024_v43  ;;  %v6026_v21 = vrot.slane %v8095_v19, 7  ;;  %v2691_v48 = vadd.f32 %v2690_v42, %v8015_v7  ;;  %v5039_v55 = vrot.slane %v5032_v20, %v8020_v44 }
 0x305   : > { %v2693_v25 = vpop.f32.mrb[14].mxu1  ;;  %v3035_v11 = vcombine.high %v3033_v63, %v3033_v63  ;;  %v3049_v50 = vrot.slane %v3033_v63, %v8020_v44  ;;  %v3056_v59 = vrot.slane %v3034_v8, %v8020_v44  ;;  %v3064_v18 = vcombine.high %v3042_v27, %v3042_v27 }
 0x306   : > { %v2694_v49 = vadd.f32 %v2693_v25, %v8015_v7  ;;  %v2695_v62 = vpop.f32.mrb[15].mxu1  ;;  %v3823_v61 = vrot.slane %v3042_v27, %v8020_v44  ;;  %v2831_v34 = vmul.f32 0.2, %v2691_v48  ;;  %vm2799_vm10 = vcmp.ge.f32.partialorder %v2691_v48, 0.0 }
 0x307   : > { %v3063_v51 = vrot.slane %v3035_v11, %v8020_v44  ;;  %v3065_v54 = vcombine.high %v3049_v50, %v3049_v50  ;;  %v3066_v37 = vcombine.high %v3056_v59, %v3056_v59  ;;  %v3837_v22 = vrot.slane %v3056_v59, %v8020_v44 }
 0x308   : > { %vm2800_vm1 = vcmp.ge.f32.partialorder %v2694_v49, 0.0  ;;  %v2832_v56 = vmul.f32 0.2, %v2694_v49  ;;  %v3830_v3 = vrot.slane %v3823_v61, %v8020_v44  ;;  %v3851_v52 = vrot.slane %v3064_v18, %v8020_v44 }
 0x309   : > { %v3879_v41 = vrot.slane %v3049_v50, %v8020_v44  ;;  %v8126_v38 = vrot.slane %v3837_v22, %v8020_v44  ;;  %v3865_v9 = vrot.slane %v3066_v37, %v8020_v44  ;;  %v3067_v30 = vcombine.high %v3063_v51, %v3063_v51 }
 0x30a   : > { %v2864_v1 = vsel %vm2800_vm1, %v2694_v49, %v2832_v56  ;;  %v3858_v10 = vrot.slane %v3851_v52, %v8020_v44  ;;  %v3893_v36 = vrot.slane %v3063_v51, %v8020_v44  ;;  %v8132_v16 = vrot.slane %v3065_v54, %v8020_v44 }
 0x30b   : > { %v5889_v31 = vsel %vm4666_vm6, %v5888_v23, %v5824_v57  ;;  %v8136_v24 = vrot.slane %v3879_v41, %v8020_v44  ;;  %v4609_v60 = vunpack.c.l.b16 %v3830_v3  ;;  %v4610_v28 = vunpack.c.l.b16 %v8126_v38 }
 0x30c   : > { %v5892_v40 = vrot.slane %v8103_v5, 5  ;;  %v6028_v32 = vrot.slane %v8103_v5, 6  ;;  %v2863_v15 = vsel %vm2799_vm10, %v2691_v48, %v2831_v34  ;;  %v8141_v53 = vunpack.c.l.b16 %v5025_v0 }
 0x30d   : > { %v3872_v33 = vrot.slane %v3865_v9, %v8020_v44  ;;  %v4686_v12 = vrot.slane %v4610_v28, 7  ;;  %v2892_v19 = vpack.c.bf16 %v2864_v1, %v2863_v15  ;;  %v8146_v57 = vunpack.c.l.b16 %v5039_v55 }
 0x30e   : > { %v8149_v20 = vrot.slane %v3893_v36, %v8020_v44  ;;  %v3914_v43 = vrot.slane %v8132_v16, %v8020_v44  ;;  %v8154_v35 = vrot.slane %v3067_v30, %v8020_v44  ;;  %v8156_v6 = vunpack.c.l.b16 %v3858_v10 }
 0x30f   : > { %v4613_v42 = vunpack.c.l.b16 %v8136_v24  ;;  %v8162_v5 = vsel %vm4666_vm6, %v4686_v12, %v4609_v60  ;;  %v4806_v23 = vrot.slane %v4609_v60, 1  ;;  %v6565_v14 = vpack.c.bf16 %v2864_v1, %v2864_v1 }
 0x310   : > { %v8158_v0 = vpop.f32.mrb[16].mxu1  ;;  %v3075_v8 = vrot.slane %v2892_v19, %v8020_v44  ;;  %v5891_v27 = vsel %vm4669_vm7, %v5890_v58, %v5889_v31  ;;  %v5896_v25 = vrot.slane %v5829_v46, 3  ;;  %v5898_v48 = vrot.slane %v8141_v53, 2 }
 0x311   : > { %v2700_v63 = vpop.f32.mrb[17].mxu1  ;;  %v3082_v62 = vrot.slane %v6565_v14, %v8020_v44  ;;  %v5893_v11 = vsel %vm4672_vm8, %v5892_v40, %v5891_v27  ;;  %v5900_v50 = vrot.slane %v8146_v57, 1  ;;  %v6027_v59 = vsel %vm4669_vm7, %v6026_v21, %v6025_v2 }
 0x312   : > { %v8169_v49 = vpop.f32.mrb[18].mxu1  ;;  %v3083_v61 = vcombine.high %v3075_v8, %v3075_v8  ;;  %v3091_v56 = vrot.slane %v3075_v8, %v8020_v44  ;;  %v5895_v58 = vsel %vm4675_vm11, %v8105_v17, %v5893_v11  ;;  %v6029_v55 = vsel %vm4672_vm8, %v6028_v32, %v6027_v59 }
 0x313   : > { %v2703_v18 = vpop.f32.mrb[19].mxu1  ;;  %v3084_v51 = vcombine.high %v3082_v62, %v3082_v62  ;;  %v3098_v54 = vrot.slane %v3082_v62, %v8020_v44  ;;  %v5897_v37 = vsel %vm4678_vm14, %v5896_v25, %v5895_v58  ;;  %v6031_v22 = vsel %vm4675_vm11, %v8107_v4, %v6029_v55 }
 0x314   : > { %v3105_v3 = vrot.slane %v3083_v61, %v8020_v44  ;;  %v3113_v2 = vcombine.high %v3091_v56, %v3091_v56  ;;  %v5046_v21 = vrot.slane %v3091_v56, %v8020_v44  ;;  %v5899_v52 = vsel %vm4681_vm15, %v5898_v48, %v5897_v37 }
 0x315   : > { %v3112_v41 = vrot.slane %v3084_v51, %v8020_v44  ;;  %v3114_v17 = vcombine.high %v3098_v54, %v3098_v54  ;;  %v5102_v34 = vrot.slane %v3098_v54, %v8020_v44  ;;  %v5901_v9 = vsel %vm4684_vm9, %v5900_v50, %v5899_v52 }
 0x316   : > { %v3115_v1 = vcombine.high %v3105_v3, %v3105_v3  ;;  %v8190_v30 = vrot.slane %v5046_v21, %v8020_v44  ;;  %v5060_v4 = vrot.slane %v3105_v3, %v8020_v44  ;;  %v5074_v10 = vrot.slane %v3113_v2, %v8020_v44 }
 0x317   : > { %v8194_v36 = vunpack.c.l.b16 %v3872_v33  ;;  %v5109_v31 = vrot.slane %v5102_v34, %v8020_v44  ;;  %v5116_v24 = vrot.slane %v3112_v41, %v8020_v44  ;;  %v8199_v60 = vrot.slane %v3114_v17, %v8020_v44 }
 0x318   : > { %v3116_v40 = vcombine.high %v3112_v41, %v3112_v41  ;;  %v8202_v32 = vrot.slane %v5060_v4, %v8020_v44  ;;  %v5081_v15 = vrot.slane %v5074_v10, %v8020_v44  ;;  %v5088_v12 = vrot.slane %v3115_v1, %v8020_v44 }
 0x319   : > { %v9534_v19 = vunpack.c.l.b16 %v8149_v20  ;;  %v8208_v33 = vrot.slane %v5116_v24, %v8020_v44  ;;  %v5832_v14 = vunpack.c.l.b16 %v8190_v30  ;;  %v5836_v63 = vunpack.c.l.b16 %v5109_v31 }
 0x31a   : > { %v8212_v27 = vrot.slane %v4613_v42, 4  ;;  %v4807_v25 = vsel %vm4666_vm6, %v4610_v28, %v4806_v23  ;;  %v4808_v48 = vrot.slane %v8156_v6, 7  ;;  %v4810_v62 = vrot.slane %v8194_v36, 6 }
 0x31b   : > { %v4812_v11 = vrot.slane %v4613_v42, 5  ;;  %v5137_v50 = vrot.slane %v8199_v60, %v8020_v44  ;;  %v6000_v59 = vpack.c.b16 %v5901_v9, %v5901_v9  ;;  %v5095_v18 = vrot.slane %v5088_v12, %v8020_v44 }
 0x31c   : > { %v8223_v61 = vrot.slane %v3116_v40, %v8020_v44  ;;  %v5833_v56 = vunpack.c.l.b16 %v8202_v32  ;;  %v8226_v58 = vunpack.c.l.b16 %v5081_v15  ;;  %v5837_v38 = vunpack.c.l.b16 %v8208_v33 }
 0x31d   : > { %v8229_v28 = vrot.slane %v5836_v63, 4  ;;  %v6038_v42 = vrot.slane %v5832_v14, 1  ;;  %6008 = vrot.lane.b32.xlu0 %v6000_v59, %s6753_s9  ;;  %v6032_v23 = vrot.slane %v5829_v46, 4  ;;  %v8236_v51 = vrot.slane %v5836_v63, 5 }
 0x31e   : > { %v6034_v54 = vrot.slane %v8141_v53, 3  ;;  %v6036_v37 = vrot.slane %v8146_v57, 2  ;;  %v2699_v3 = vadd.f32 %v8158_v0, %v8015_v7  ;;  %v2702_v52 = vadd.f32 %v8169_v49, %v8015_v7 }
 0x31f   : > { %v2706_v55 = vpop.f32.mrb[20].mxu1  ;;  %v6033_v21 = vsel %vm4678_vm14, %v6032_v23, %v6031_v22  ;;  %v3928_v13 = vrot.slane %v8154_v35, %v8020_v44  ;;  %v8250_v46 = vunpack.c.l.b16 %v3914_v43  ;;  %v4809_v0 = vsel %vm4669_vm7, %v4808_v48, %v4807_v25 }
 0x320   : > { %v2708_v2 = vpop.f32.mrb[21].mxu1  ;;  %v6035_v57 = vsel %vm4681_vm15, %v6034_v54, %v6033_v21  ;;  %vm2801_vm12 = vcmp.ge.f32.partialorder %v2699_v3, 0.0  ;;  %v2833_v41 = vmul.f32 0.2, %v2699_v3  ;;  %vm2802_vm13 = vcmp.ge.f32.partialorder %v2702_v52, 0.0 }
 0x321   : > { %v2709_v53 = vpop.f32.mrb[22].mxu1  ;;  %v6037_v22 = vsel %vm4684_vm9, %v6036_v37, %v6035_v57  ;;  %v2834_v49 = vmul.f32 0.2, %v2702_v52  ;;  %v8255_v34 = vunpack.c.l.b16 %v3928_v13  ;;  %v4811_v16 = vsel %vm4672_vm8, %v4810_v62, %v4809_v0 }
 0x322   : > { %v2711_v17 = vpop.f32.mrb[23].mxu1  ;;  %v6136_v35 = vpack.c.b16 %v6037_v22, %v6037_v22  ;;  %v2865_v9 = vsel %vm2801_vm12, %v2699_v3, %v2833_v41  ;;  %v4814_v43 = vrot.slane %v9534_v19, 4  ;;  %v4813_v4 = vsel %vm4675_vm11, %v4812_v11, %v4811_v16 }
 0x323   : > { %v2866_v1 = vsel %vm2802_vm13, %v2702_v52, %v2834_v49  ;;  %v4816_v10 = vrot.slane %v8250_v46, 3  ;;  %v4818_v31 = vrot.slane %v8255_v34, 2  ;;  %v2707_v15 = vadd.f32 %v2706_v55, %v8015_v7 }
 0x324   : > { %6144 = vrot.lane.b32.xlu0 %v6136_v35, %s6751_s30  ;;  %v2893_v24 = vpack.c.bf16 %v2866_v1, %v2865_v9  ;;  %v6566_v40 = vpack.c.bf16 %v2866_v1, %v2866_v1  ;;  %v4815_v32 = vsel %vm4678_vm14, %v4814_v43, %v4813_v4  ;;  %v8266_v12 = vunpack.c.l.b16 %v5095_v18 }
 0x325   : > { %v5902_v63 = vrot.slane %v5833_v56, 7  ;;  %v4817_v25 = vsel %vm4681_vm15, %v4816_v10, %v4815_v32  ;;  %v2710_v48 = vadd.f32 %v2709_v53, %v8015_v7  ;;  %vm2803_vm0 = vcmp.ge.f32.partialorder %v2707_v15, 0.0 }
 0x326   : > { %v3124_v62 = vrot.slane %v2893_v24, %v8020_v44  ;;  %v3131_v11 = vrot.slane %v6566_v40, %v8020_v44  ;;  %v4819_v59 = vsel %vm4684_vm9, %v4818_v31, %v4817_v25  ;;  %v2835_v54 = vmul.f32 0.2, %v2707_v15 }
 0x327   : > { %v4905_v23 = vpack.c.b16 %v4819_v59, %v4819_v59  ;;  %vm2804_vm1 = vcmp.ge.f32.partialorder %v2710_v48, 0.0  ;;  %v2836_v37 = vmul.f32 0.2, %v2710_v48  ;;  %v5904_v21 = vrot.slane %v8226_v58, 6 }
 0x328   : > { %v3132_v3 = vcombine.high %v3124_v62, %v3124_v62  ;;  %v3133_v55 = vcombine.high %v3131_v11, %v3131_v11  ;;  %v3140_v18 = vrot.slane %v3124_v62, %v8020_v44  ;;  %v3147_v2 = vrot.slane %v3131_v11, %v8020_v44 }
 0x329   : > { %v8277_v52 = vsel %vm4666_vm6, %v5833_v56, %v6038_v42  ;;  %4914 = vrot.lane.b32.xlu1 %v4905_v23, %s6756_s14  ;;  %v2867_v13 = vsel %vm2803_vm0, %v2707_v15, %v2835_v54  ;;  %v2868_v53 = vsel %vm2804_vm1, %v2710_v48, %v2836_v37  ;;  %v6040_v49 = vrot.slane %v8226_v58, 7 }
 0x32a   : > { %v3154_v57 = vrot.slane %v3132_v3, %v8020_v44  ;;  %v3161_v41 = vrot.slane %v3133_v55, %v8020_v44  ;;  %v3162_v0 = vcombine.high %v3140_v18, %v3140_v18  ;;  %v3163_v17 = vcombine.high %v3147_v2, %v3147_v2 }
 0x32b   : > { %v3935_v35 = vrot.slane %v3140_v18, %v8020_v44  ;;  %v3991_v9 = vrot.slane %v3147_v2, %v8020_v44  ;;  %v2894_v56 = vpack.c.bf16 %v2868_v53, %v2867_v13  ;;  %v5903_v16 = vsel %vm4666_vm6, %v5902_v63, %v5832_v14 }
 0x32c   : > { %v8282_v22 = vpop.f32.mrb[24].mxu1  ;;  %v3164_v43 = vcombine.high %v3154_v57, %v3154_v57  ;;  %v3949_v1 = vrot.slane %v3154_v57, %v8020_v44  ;;  %v3963_v4 = vrot.slane %v3162_v0, %v8020_v44  ;;  %v3165_v31 = vcombine.high %v3161_v41, %v3161_v41 }
 0x32d   : > { %v2716_v42 = vpop.f32.mrb[25].mxu1  ;;  %v3942_v24 = vrot.slane %v3935_v35, %v8020_v44  ;;  %v4005_v40 = vrot.slane %v3161_v41, %v8020_v44  ;;  %v5151_v32 = vrot.slane %v8223_v61, %v8020_v44  ;;  %v3998_v63 = vrot.slane %v3991_v9, %v8020_v44 }
 0x32e   : > { %v8292_v10 = vpop.f32.mrb[26].mxu1  ;;  %v8299_v30 = vrot.slane %v3949_v1, %v8020_v44  ;;  %v3977_v14 = vrot.slane %v3164_v43, %v8020_v44  ;;  %v8304_v25 = vrot.slane %v3163_v17, %v8020_v44  ;;  %v5906_v48 = vrot.slane %v8266_v12, 5 }
 0x32f   : > { %v2719_v15 = vpop.f32.mrb[27].mxu1  ;;  %v6042_v62 = vrot.slane %v8266_v12, 6  ;;  %v3970_v11 = vrot.slane %v3963_v4, %v8020_v44  ;;  %v6567_v59 = vpack.c.bf16 %v2868_v53, %v2868_v53  ;;  %v8310_v61 = vrot.slane %v4005_v40, %v8020_v44 }
 0x330   : > { %v4617_v23 = vunpack.c.l.b16 %v3942_v24  ;;  %v4618_v54 = vunpack.c.l.b16 %v8299_v30  ;;  %v3173_v37 = vrot.slane %v2894_v56, %v8020_v44  ;;  %v8315_v3 = vrot.slane %v3165_v31, %v8020_v44 }
 0x331   : > { %v8320_v55 = vunpack.c.l.b16 %v5137_v50  ;;  %v8322_v18 = vunpack.c.l.b16 %v5151_v32  ;;  %v5905_v2 = vsel %vm4669_vm7, %v5904_v21, %v5903_v16  ;;  %v3984_v13 = vrot.slane %v3977_v14, %v8020_v44 }
 0x332   : > { %v4026_v53 = vrot.slane %v8304_v25, %v8020_v44  ;;  %v4621_v57 = vunpack.c.l.b16 %v3998_v63  ;;  %v4700_v41 = vrot.slane %v4618_v54, 7  ;;  %v8328_v0 = vunpack.c.l.b16 %v3970_v11 }
 0x333   : > { %v3180_v17 = vrot.slane %v6567_v59, %v8020_v44  ;;  %v3181_v35 = vcombine.high %v3173_v37, %v3173_v37  ;;  %v3189_v60 = vrot.slane %v3173_v37, %v8020_v44  ;;  %v9535_v50 = vunpack.c.l.b16 %v8310_v61 }
 0x334   : > { %v8334_v9 = vsel %vm4666_vm6, %v4700_v41, %v4617_v23  ;;  %v4820_v21 = vrot.slane %v4617_v23, 1  ;;  %v5907_v56 = vsel %vm4672_vm8, %v5906_v48, %v5905_v2  ;;  %v8339_v4 = vunpack.c.l.b16 %v3984_v13 }
 0x335   : > { %v3182_v42 = vcombine.high %v3180_v17, %v3180_v17  ;;  %v3196_v16 = vrot.slane %v3180_v17, %v8020_v44  ;;  %v3203_v43 = vrot.slane %v3181_v35, %v8020_v44  ;;  %v3211_v1 = vcombine.high %v3189_v60, %v3189_v60 }
 0x336   : > { %v5158_v31 = vrot.slane %v3189_v60, %v8020_v44  ;;  %v5909_v24 = vsel %vm4675_vm11, %v8229_v28, %v5907_v56  ;;  %v5910_v40 = vrot.slane %v5837_v38, 3  ;;  %v5912_v2 = vrot.slane %v8320_v55, 2 }
 0x337   : > { %v3210_v32 = vrot.slane %v3182_v42, %v8020_v44  ;;  %v3212_v15 = vcombine.high %v3196_v16, %v3196_v16  ;;  %v3213_v30 = vcombine.high %v3203_v43, %v3203_v43  ;;  %v5172_v14 = vrot.slane %v3203_v43, %v8020_v44 }
 0x338   : > { %v8349_v63 = vrot.slane %v5158_v31, %v8020_v44  ;;  %v5186_v48 = vrot.slane %v3211_v1, %v8020_v44  ;;  %v5214_v11 = vrot.slane %v3196_v16, %v8020_v44  ;;  %v5911_v59 = vsel %vm4678_vm14, %v5910_v40, %v5909_v24 }
 0x339   : > { %v8355_v28 = vrot.slane %v5172_v14, %v8020_v44  ;;  %v5200_v23 = vrot.slane %v3213_v30, %v8020_v44  ;;  %v5228_v37 = vrot.slane %v3210_v32, %v8020_v44  ;;  %v3214_v41 = vcombine.high %v3210_v32, %v3210_v32 }
 0x33a   : > { %v5193_v17 = vrot.slane %v5186_v48, %v8020_v44  ;;  %v8364_v35 = vrot.slane %v5214_v11, %v8020_v44  ;;  %v8367_v60 = vrot.slane %v3212_v15, %v8020_v44  ;;  %v5840_v43 = vunpack.c.l.b16 %v8349_v63 }
 0x33b   : > { %v8360_v13 = vpop.f32.mrb[28].mxu1  ;;  %v5207_v42 = vrot.slane %v5200_v23, %v8020_v44  ;;  %v8371_v16 = vrot.slane %v5228_v37, %v8020_v44  ;;  %v5841_v1 = vunpack.c.l.b16 %v8355_v28  ;;  %v8376_v40 = vrot.slane %v4621_v57, 4 }
 0x33c   : > { %v2724_v56 = vpop.f32.mrb[29].mxu1  ;;  %v4822_v32 = vrot.slane %v8328_v0, 7  ;;  %v4826_v30 = vrot.slane %v4621_v57, 5  ;;  %v4821_v14 = vsel %vm4666_vm6, %v4618_v54, %v4820_v21  ;;  %v4824_v48 = vrot.slane %v8339_v4, 6 }
 0x33d   : > { %v2725_v31 = vpop.f32.mrb[30].mxu1  ;;  %v5913_v11 = vsel %vm4681_vm15, %v5912_v2, %v5911_v59  ;;  %v5914_v23 = vrot.slane %v8322_v18, 1  ;;  %v5249_v28 = vrot.slane %v8367_v60, %v8020_v44  ;;  %v8386_v37 = vrot.slane %v3214_v41, %v8020_v44 }
 0x33e   : > { %v2727_v15 = vpop.f32.mrb[31].mxu1  ;;  %v8388_v56 = vunpack.c.l.b16 %v5193_v17  ;;  %v5844_v24 = vunpack.c.l.b16 %v8364_v35  ;;  %v8391_v57 = vunpack.c.l.b16 %v5207_v42  ;;  %v5845_v54 = vunpack.c.l.b16 %v8371_v16 }
 0x33f   : > { %v5916_v21 = vrot.slane %v5841_v1, 7  ;;  %v6052_v59 = vrot.slane %v5840_v43, 1  ;;  %v5915_v2 = vsel %vm4684_vm9, %v5914_v23, %v5913_v11  ;;  %v6041_v41 = vsel %vm4669_vm7, %v6040_v49, %v8277_v52 }
 0x340   : > { %v6046_v17 = vrot.slane %v5837_v38, 4  ;;  %v6048_v15 = vrot.slane %v8320_v55, 3  ;;  %v6001_v42 = vpack.c.b16 %v5915_v2, %v5915_v2  ;;  %v6043_v19 = vsel %vm4672_vm8, %v6042_v62, %v6041_v41 }
 0x341   : > { %v6050_v8 = vrot.slane %v8322_v18, 2  ;;  %v2715_v11 = vadd.f32 %v8282_v22, %v8015_v7  ;;  %v6045_v58 = vsel %vm4675_vm11, %v8236_v51, %v6043_v19  ;;  %v2718_v52 = vadd.f32 %v8292_v10, %v8015_v7 }
 0x342   : > { %v4040_v33 = vrot.slane %v8315_v3, %v8020_v44  ;;  %v8419_v38 = vunpack.c.l.b16 %v4026_v53  ;;  %6010 = vrot.lane.b32.xlu1 %v6001_v42, %s6753_s9  ;;  %v6047_v12 = vsel %vm4678_vm14, %v6046_v17, %v6045_v58  ;;  %v4823_v49 = vsel %vm4669_vm7, %v4822_v32, %v4821_v14 }
 0x343   : > { %vm2805_vm10 = vcmp.ge.f32.partialorder %v2715_v11, 0.0  ;;  %v2837_v22 = vmul.f32 0.2, %v2715_v11  ;;  %v6049_v19 = vsel %vm4681_vm15, %v6048_v15, %v6047_v12  ;;  %vm2806_vm12 = vcmp.ge.f32.partialorder %v2718_v52, 0.0 }
 0x344   : > { %v2838_v51 = vmul.f32 0.2, %v2718_v52  ;;  %v8425_v10 = vunpack.c.l.b16 %v4040_v33  ;;  %v6051_v62 = vsel %vm4684_vm9, %v6050_v8, %v6049_v19  ;;  %v4825_v25 = vsel %vm4672_vm8, %v4824_v48, %v4823_v49 }
 0x345   : > { %v2869_v3 = vsel %vm2805_vm10, %v2715_v11, %v2837_v22  ;;  %v4828_v55 = vrot.slane %v9535_v50, 4  ;;  %v6137_v18 = vpack.c.b16 %v6051_v62, %v6051_v62  ;;  %v4827_v23 = vsel %vm4675_vm11, %v4826_v30, %v4825_v25 }
 0x346   : > { %v2870_v53 = vsel %vm2806_vm12, %v2718_v52, %v2838_v51  ;;  %v4830_v32 = vrot.slane %v8419_v38, 3  ;;  %v4832_v8 = vrot.slane %v8425_v10, 2  ;;  %v5918_v48 = vrot.slane %v8388_v56, 6 }
 0x347   : > { %v2895_v2 = vpack.c.bf16 %v2870_v53, %v2869_v3  ;;  %v6568_v41 = vpack.c.bf16 %v2870_v53, %v2870_v53  ;;  %v4829_v17 = vsel %vm4678_vm14, %v4828_v55, %v4827_v23  ;;  %v8440_v42 = vrot.slane %v5844_v24, 4  ;;  %6146 = vrot.lane.b32.xlu1 %v6137_v18, %s6751_s30 }
 0x348   : > { %v8433_v14 = vpop.f32.mrb[32].mxu1  ;;  %v4831_v30 = vsel %vm4681_vm15, %v4830_v32, %v4829_v17  ;;  %v2726_v11 = vadd.f32 %v2725_v31, %v8015_v7  ;;  %v8448_v52 = vsel %vm4666_vm6, %v5841_v1, %v6052_v59  ;;  %v5917_v19 = vsel %vm4666_vm6, %v5916_v21, %v5840_v43 }
 0x349   : > { %v2732_v15 = vpop.f32.mrb[33].mxu1  ;;  %v3222_v33 = vrot.slane %v2895_v2, %v8020_v44  ;;  %v3229_v12 = vrot.slane %v6568_v41, %v8020_v44  ;;  %v4833_v22 = vsel %vm4684_vm9, %v4832_v8, %v4831_v30  ;;  %v6054_v51 = vrot.slane %v8388_v56, 7 }
 0x34a   : > { %v8445_v58 = vpop.f32.mrb[34].mxu1  ;;  %v4906_v62 = vpack.c.b16 %v4833_v22, %v4833_v22  ;;  %v2723_v31 = vadd.f32 %v8360_v13, %v8015_v7  ;;  %v5920_v55 = vrot.slane %v8391_v57, 5  ;;  %vm2808_vm13 = vcmp.ge.f32.partialorder %v2726_v11, 0.0 }
 0x34b   : > { %v2735_v49 = vpop.f32.mrb[35].mxu1  ;;  %v3230_v3 = vcombine.high %v3222_v33, %v3222_v33  ;;  %v3231_v1 = vcombine.high %v3229_v12, %v3229_v12  ;;  %v3238_v59 = vrot.slane %v3222_v33, %v8020_v44  ;;  %v3245_v25 = vrot.slane %v3229_v12, %v8020_v44 }
 0x34c   : > { %4916 = vrot.lane.b32.xlu0 %v4906_v62, %s6756_s14  ;;  %v2840_v63 = vmul.f32 0.2, %v2726_v11  ;;  %v5263_v43 = vrot.slane %v8386_v37, %v8020_v44  ;;  %vm2807_vm0 = vcmp.ge.f32.partialorder %v2723_v31, 0.0  ;;  %v2839_v2 = vmul.f32 0.2, %v2723_v31 }
 0x34d   : > { %v3252_v21 = vrot.slane %v3230_v3, %v8020_v44  ;;  %v3259_v18 = vrot.slane %v3231_v1, %v8020_v44  ;;  %v3260_v13 = vcombine.high %v3238_v59, %v3238_v59  ;;  %v3261_v53 = vcombine.high %v3245_v25, %v3245_v25 }
 0x34e   : > { %v4047_v23 = vrot.slane %v3238_v59, %v8020_v44  ;;  %v4103_v32 = vrot.slane %v3245_v25, %v8020_v44  ;;  %v5919_v15 = vsel %vm4669_vm7, %v5918_v48, %v5917_v19  ;;  %v2872_v12 = vsel %vm2808_vm13, %v2726_v11, %v2840_v63 }
 0x34f   : > { %v3262_v41 = vcombine.high %v3252_v21, %v3252_v21  ;;  %v4061_v17 = vrot.slane %v3252_v21, %v8020_v44  ;;  %v4075_v8 = vrot.slane %v3260_v13, %v8020_v44  ;;  %v4117_v33 = vrot.slane %v3259_v18, %v8020_v44 }
 0x350   : > { %v4054_v37 = vrot.slane %v4047_v23, %v8020_v44  ;;  %v4110_v30 = vrot.slane %v4103_v32, %v8020_v44  ;;  %v3263_v22 = vcombine.high %v3259_v18, %v3259_v18  ;;  %v8481_v3 = vrot.slane %v3261_v53, %v8020_v44 }
 0x351   : > { %v8477_v49 = vrot.slane %v4061_v17, %v8020_v44  ;;  %v4089_v62 = vrot.slane %v3262_v41, %v8020_v44  ;;  %v6056_v1 = vrot.slane %v8391_v57, 6  ;;  %v4082_v48 = vrot.slane %v4075_v8, %v8020_v44 }
 0x352   : > { %v2871_v19 = vsel %vm2807_vm0, %v2723_v31, %v2839_v2  ;;  %v5921_v59 = vsel %vm4672_vm8, %v5920_v55, %v5919_v15  ;;  %v8488_v25 = vrot.slane %v4117_v33, %v8020_v44  ;;  %v4629_v63 = vunpack.c.l.b16 %v4110_v30 }
 0x353   : > { %v4626_v11 = vunpack.c.l.b16 %v8477_v49  ;;  %v2896_v21 = vpack.c.bf16 %v2872_v12, %v2871_v19  ;;  %v8493_v18 = vrot.slane %v5844_v24, 5  ;;  %v4625_v13 = vunpack.c.l.b16 %v4054_v37 }
 0x354   : > { %v8498_v53 = vunpack.c.l.b16 %v5249_v28  ;;  %v8500_v31 = vunpack.c.l.b16 %v5263_v43  ;;  %v4096_v55 = vrot.slane %v4089_v62, %v8020_v44  ;;  %v4138_v23 = vrot.slane %v8481_v3, %v8020_v44 }
 0x355   : > { %v8506_v32 = vrot.slane %v3263_v22, %v8020_v44  ;;  %v4714_v2 = vrot.slane %v4626_v11, 7  ;;  %v8510_v24 = vunpack.c.l.b16 %v4082_v48  ;;  %v6569_v41 = vpack.c.bf16 %v2872_v12, %v2872_v12 }
 0x356   : > { %v3271_v60 = vrot.slane %v2896_v21, %v8020_v44  ;;  %v5923_v28 = vsel %vm4675_vm11, %v8440_v42, %v5921_v59  ;;  %v9536_v17 = vunpack.c.l.b16 %v8488_v25  ;;  %v8519_v15 = vrot.slane %v4629_v63, 4 }
 0x357   : > { %v8508_v35 = vpop.f32.mrb[36].mxu1  ;;  %v8517_v8 = vsel %vm4666_vm6, %v4714_v2, %v4625_v13  ;;  %v5924_v37 = vrot.slane %v5845_v54, 3  ;;  %v4834_v33 = vrot.slane %v4625_v13, 1  ;;  %v3278_v12 = vrot.slane %v6569_v41, %v8020_v44 }
 0x358   : > { %v2740_v43 = vpop.f32.mrb[37].mxu1  ;;  %9553 = vst [vmem:[#allocation3_spill] sm:$0xff] %v8519_v15  ;;  %v3279_v22 = vcombine.high %v3271_v60, %v3271_v60  ;;  %v3287_v49 = vrot.slane %v3271_v60, %v8020_v44  ;;  %v8527_v62 = vunpack.c.l.b16 %v4096_v55  ;;  %v8529_v48 = vrot.slane %v4629_v63, 5 }
 0x359   : > { %v8523_v30 = vpop.f32.mrb[38].mxu1  ;;  %v5925_v19 = vsel %vm4678_vm14, %v5924_v37, %v5923_v28  ;;  %v5926_v59 = vrot.slane %v8498_v53, 2  ;;  %v3280_v21 = vcombine.high %v3278_v12, %v3278_v12  ;;  %v3294_v2 = vrot.slane %v3278_v12, %v8020_v44 }
 0x35a   : > { %v2743_v42 = vpop.f32.mrb[39].mxu1  ;;  %9554 = vst [vmem:[#allocation4_spill] sm:$0xff] %v8527_v62  ;;  %v3301_v43 = vrot.slane %v3279_v22, %v8020_v44  ;;  %v3309_v13 = vcombine.high %v3287_v49, %v3287_v49  ;;  %v5270_v50 = vrot.slane %v3287_v49, %v8020_v44  ;;  %v5928_v55 = vrot.slane %v8500_v31, 1 }
 0x35b   : > { %v5927_v60 = vsel %vm4681_vm15, %v5926_v59, %v5925_v19  ;;  %v3308_v63 = vrot.slane %v3280_v21, %v8020_v44  ;;  %v3310_v42 = vcombine.high %v3294_v2, %v3294_v2  ;;  %v5326_v22 = vrot.slane %v3294_v2, %v8020_v44 }
 0x35c   : > { %v3311_v28 = vcombine.high %v3301_v43, %v3301_v43  ;;  %v5284_v37 = vrot.slane %v3301_v43, %v8020_v44  ;;  %v8542_v47 = vrot.slane %v5270_v50, %v8020_v44  ;;  %v5298_v12 = vrot.slane %v3309_v13, %v8020_v44 }
 0x35d   : > { %v5929_v41 = vsel %vm4684_vm9, %v5928_v55, %v5927_v60  ;;  %v5340_v59 = vrot.slane %v3308_v63, %v8020_v44  ;;  %v6055_v21 = vsel %vm4669_vm7, %v6054_v51, %v8448_v52  ;;  %v3312_v50 = vcombine.high %v3308_v63, %v3308_v63 }
 0x35e   : > { %v8548_v49 = vrot.slane %v5284_v37, %v8020_v44  ;;  %v5312_v19 = vrot.slane %v3311_v28, %v8020_v44  ;;  %v5305_v43 = vrot.slane %v5298_v12, %v8020_v44  ;;  %v8558_v13 = vrot.slane %v5326_v22, %v8020_v44 }
 0x35f   : > { %v8561_v2 = vrot.slane %v3310_v42, %v8020_v44  ;;  %v8565_v55 = vrot.slane %v5340_v59, %v8020_v44  ;;  %v5848_v28 = vunpack.c.l.b16 %v8542_v47  ;;  %v4835_v52 = vsel %vm4666_vm6, %v4626_v11, %v4834_v33 }
 0x360   : > { %v5319_v60 = vrot.slane %v5312_v19, %v8020_v44  ;;  %v5849_v56 = vunpack.c.l.b16 %v8548_v49  ;;  %v4836_v51 = vrot.slane %v8510_v24, 7  ;;  %v4838_v63 = vrot.slane %v8527_v62, 6 }
 0x361   : > { %v6060_v37 = vrot.slane %v5845_v54, 4  ;;  %v6002_v42 = vpack.c.b16 %v5929_v41, %v5929_v41  ;;  %v6057_v12 = vsel %vm4672_vm8, %v6056_v1, %v6055_v21  ;;  %v6062_v22 = vrot.slane %v8498_v53, 3 }
 0x362   : > { %v6064_v19 = vrot.slane %v8500_v31, 2  ;;  %v8584_v33 = vrot.slane %v3312_v50, %v8020_v44  ;;  %v8586_v49 = vunpack.c.l.b16 %v5305_v43  ;;  %v5852_v16 = vunpack.c.l.b16 %v8558_v13 }
 0x363   : > { %v8589_v57 = vunpack.c.l.b16 %v5319_v60  ;;  %v5930_v53 = vrot.slane %v5849_v56, 7  ;;  %v6066_v31 = vrot.slane %v5848_v28, 1  ;;  %6012 = vrot.lane.b32.xlu0 %v6002_v42, %s6753_s9  ;;  %v6059_v21 = vsel %vm4675_vm11, %v8493_v18, %v6057_v12 }
 0x364   : > { %v8579_v59 = vpop.f32.mrb[40].mxu1  ;;  %v2731_v50 = vadd.f32 %v8433_v14, %v8015_v7  ;;  %v2734_v43 = vadd.f32 %v8445_v58, %v8015_v7  ;;  %v4152_v60 = vrot.slane %v8506_v32, %v8020_v44  ;;  %v6061_v1 = vsel %vm4678_vm14, %v6060_v37, %v6059_v21 }
 0x365   : > { %v2748_v54 = vpop.f32.mrb[41].mxu1  ;;  %v8609_v42 = vunpack.c.l.b16 %v4138_v23  ;;  %v4837_v11 = vsel %vm4669_vm7, %v4836_v51, %v4835_v52  ;;  %v4842_v18 = vrot.slane %v9536_v17, 4  ;;  %v6063_v14 = vsel %vm4681_vm15, %v6062_v22, %v6061_v1 }
 0x366   : > { %v8595_v41 = vpop.f32.mrb[42].mxu1  ;;  %vm2809_vm1 = vcmp.ge.f32.partialorder %v2731_v50, 0.0  ;;  %v2841_v58 = vmul.f32 0.2, %v2731_v50  ;;  %vm2810_vm10 = vcmp.ge.f32.partialorder %v2734_v43, 0.0  ;;  %v6065_v32 = vsel %vm4684_vm9, %v6064_v19, %v6063_v14 }
 0x367   : > { %v2751_v54 = vpop.f32.mrb[43].mxu1  ;;  %v2842_v12 = vmul.f32 0.2, %v2734_v43  ;;  %v4839_v37 = vsel %vm4672_vm8, %v4838_v63, %v4837_v11  ;;  %v6138_v3 = vpack.c.b16 %v6065_v32, %v6065_v32  ;;  %v4844_v51 = vrot.slane %v8609_v42, 3 }
 0x368   : > { %v8616_v54 = vunpack.c.l.b16 %v4152_v60  ;;  %v2873_v23 = vsel %vm2809_vm1, %v2731_v50, %v2841_v58  ;;  %v4841_v52 = vsel %vm4675_vm11, %v8529_v48, %v4839_v37  ;;  %v2739_v19 = vadd.f32 %v8508_v35, %v8015_v7 }
 0x369   : > { %v2874_v21 = vsel %vm2810_vm10, %v2734_v43, %v2842_v12  ;;  %v4843_v22 = vsel %vm4678_vm14, %v4842_v18, %v4841_v52  ;;  %6148 = vrot.lane.b32.xlu0 %v6138_v3, %s6751_s30  ;;  %v2742_v11 = vadd.f32 %v8523_v30, %v8015_v7  ;;  %v5932_v48 = vrot.slane %v8586_v49, 6 }
 0x36a   : > { %9555 = vst [vmem:[#allocation5_spill] sm:$0xff] %v8616_v54  ;;  %v4846_v1 = vrot.slane %v8616_v54, 2  ;;  %v2897_v60 = vpack.c.bf16 %v2874_v21, %v2873_v23  ;;  %v6570_v14 = vpack.c.bf16 %v2874_v21, %v2874_v21  ;;  %v4845_v63 = vsel %vm4681_vm15, %v4844_v51, %v4843_v22 }
 0x36b   : > { %vm2811_vm12 = vcmp.ge.f32.partialorder %v2739_v19, 0.0  ;;  %v2843_v43 = vmul.f32 0.2, %v2739_v19  ;;  %vm2812_vm13 = vcmp.ge.f32.partialorder %v2742_v11, 0.0  ;;  %v8636_v32 = vrot.slane %v5852_v16, 4 }
 0x36c   : > { %v4847_v50 = vsel %vm4684_vm9, %v4846_v1, %v4845_v63  ;;  %v3320_v18 = vrot.slane %v2897_v60, %v8020_v44  ;;  %v3327_v58 = vrot.slane %v6570_v14, %v8020_v44  ;;  %v8639_v12 = vsel %vm4666_vm6, %v5849_v56, %v6066_v31 }
 0x36d   : > { %v4907_v35 = vpack.c.b16 %v4847_v50, %v4847_v50  ;;  %v2844_v37 = vmul.f32 0.2, %v2742_v11  ;;  %v5931_v21 = vsel %vm4666_vm6, %v5930_v53, %v5848_v28  ;;  %v5934_v22 = vrot.slane %v8589_v57, 5 }
 0x36e   : > { %v3328_v3 = vcombine.high %v3320_v18, %v3320_v18  ;;  %v3329_v23 = vcombine.high %v3327_v58, %v3327_v58  ;;  %v3336_v52 = vrot.slane %v3320_v18, %v8020_v44  ;;  %v3343_v51 = vrot.slane %v3327_v58, %v8020_v44 }
 0x36f   : > { %4918 = vrot.lane.b32.xlu1 %v4907_v35, %s6756_s14  ;;  %v2875_v56 = vsel %vm2811_vm12, %v2739_v19, %v2843_v43  ;;  %v2876_v31 = vsel %vm2812_vm13, %v2742_v11, %v2844_v37  ;;  %v5375_v28 = vrot.slane %v8584_v33, %v8020_v44  ;;  %v9558_v13 = vunpack.c.l.b16 %v8565_v55 }
 0x370   : > { %v3350_v1 = vrot.slane %v3328_v3, %v8020_v44  ;;  %v3357_v60 = vrot.slane %v3329_v23, %v8020_v44  ;;  %v3358_v14 = vcombine.high %v3336_v52, %v3336_v52  ;;  %v3359_v63 = vcombine.high %v3343_v51, %v3343_v51 }
 0x371   : > { %v4159_v18 = vrot.slane %v3336_v52, %v8020_v44  ;;  %v4215_v58 = vrot.slane %v3343_v51, %v8020_v44  ;;  %v2898_v47 = vpack.c.bf16 %v2876_v31, %v2875_v56  ;;  %v9556_v51 = vrot.slane %v8561_v2, %v8020_v44 }
 0x372   : > { %v3360_v11 = vcombine.high %v3350_v1, %v3350_v1  ;;  %v4173_v43 = vrot.slane %v3350_v1, %v8020_v44  ;;  %v4187_v35 = vrot.slane %v3358_v14, %v8020_v44  ;;  %v3361_v3 = vcombine.high %v3357_v60, %v3357_v60 }
 0x373   : > { %v8652_v50 = vpop.f32.mrb[44].mxu1  ;;  %v4222_v23 = vrot.slane %v4215_v58, %v8020_v44  ;;  %v4229_v52 = vrot.slane %v3357_v60, %v8020_v44  ;;  %v8668_v56 = vunpack.c.l.b16 %v9556_v51  ;;  %v8674_v14 = vrot.slane %v3359_v63, %v8020_v44 }
 0x374   : > { %v2756_v53 = vpop.f32.mrb[45].mxu1  ;;  %v4180_v17 = vrot.slane %v4173_v43, %v8020_v44  ;;  %v4201_v1 = vrot.slane %v3360_v11, %v8020_v44  ;;  %v8678_v58 = vrot.slane %v5852_v16, 5  ;;  %v4194_v60 = vrot.slane %v4187_v35, %v8020_v44 }
 0x375   : > { %v8661_v37 = vpop.f32.mrb[46].mxu1  ;;  %v4166_v53 = vrot.slane %v4159_v18, %v8020_v44  ;;  %v6571_v19 = vpack.c.bf16 %v2876_v31, %v2876_v31  ;;  %v8681_v2 = vunpack.c.l.b16 %v5375_v28  ;;  %v8684_v51 = vrot.slane %v4229_v52, %v8020_v44 }
 0x376   : > { %v2759_v33 = vpop.f32.mrb[47].mxu1  ;;  %v4634_v18 = vunpack.c.l.b16 %v4180_v17  ;;  %v3369_v43 = vrot.slane %v2898_v47, %v8020_v44  ;;  %v8688_v11 = vrot.slane %v3361_v3, %v8020_v44  ;;  %v5933_v63 = vsel %vm4669_vm7, %v5932_v48, %v5931_v21 }
 0x377   : > { %9557 = vst [vmem:[#allocation6_spill] sm:$0xff] %v8684_v51  ;;  %v4637_v33 = vunpack.c.l.b16 %v4222_v23  ;;  %v5938_v16 = vrot.slane %v9558_v13, 3  ;;  %v5940_v35 = vrot.slane %v8668_v56, 2  ;;  %v4208_v31 = vrot.slane %v4201_v1, %v8020_v44 }
 0x378   : > { %v4633_v52 = vunpack.c.l.b16 %v4166_v53  ;;  %v4728_v17 = vrot.slane %v4634_v18, 7  ;;  %v8697_v23 = vunpack.c.l.b16 %v4194_v60  ;;  %v3376_v47 = vrot.slane %v6571_v19, %v8020_v44 }
 0x379   : > { %v3377_v3 = vcombine.high %v3369_v43, %v3369_v43  ;;  %v3385_v30 = vrot.slane %v3369_v43, %v8020_v44  ;;  %v8705_v13 = vrot.slane %v4637_v33, 4  ;;  %v5935_v1 = vsel %vm4672_vm8, %v5934_v22, %v5933_v63 }
 0x37a   : > { %9559 = vst [vmem:[#allocation7_spill] sm:$0xff] %v8697_v23  ;;  %v8703_v21 = vsel %vm4666_vm6, %v4728_v17, %v4633_v52  ;;  %v3378_v45 = vcombine.high %v3376_v47, %v3376_v47  ;;  %v3392_v53 = vrot.slane %v3376_v47, %v8020_v44  ;;  %v8710_v15 = vunpack.c.l.b16 %v4208_v31 }
 0x37b   : > { %9560 = vst [vmem:[#allocation8_spill] sm:$0xff] %v8703_v21  ;;  %9561 = vst [vmem:[#allocation9_spill] sm:$0xff] %v8705_v13  ;;  %v3399_v60 = vrot.slane %v3377_v3, %v8020_v44  ;;  %v3407_v28 = vcombine.high %v3385_v30, %v3385_v30  ;;  %v4848_v19 = vrot.slane %v4633_v52, 1  ;;  %v5382_v43 = vrot.slane %v3385_v30, %v8020_v44 }
 0x37c   : > { %9562 = vst [vmem:[#allocation10_spill] sm:$0xff] %v8710_v15  ;;  %v5937_v48 = vsel %vm4675_vm11, %v8636_v32, %v5935_v1  ;;  %v3406_v17 = vrot.slane %v3378_v45, %v8020_v44  ;;  %v3408_v21 = vcombine.high %v3392_v53, %v3392_v53  ;;  %v5438_v52 = vrot.slane %v3392_v53, %v8020_v44 }
 0x37d   : > { %v3409_v13 = vcombine.high %v3399_v60, %v3399_v60  ;;  %v5396_v22 = vrot.slane %v3399_v60, %v8020_v44  ;;  %v8720_v47 = vrot.slane %v5382_v43, %v8020_v44  ;;  %v5410_v31 = vrot.slane %v3407_v28, %v8020_v44 }
 0x37e   : > { %v5939_v30 = vsel %vm4678_vm14, %v5938_v16, %v5937_v48  ;;  %v4854_v62 = vrot.slane %v4637_v33, 5  ;;  %v5452_v1 = vrot.slane %v3406_v17, %v8020_v44  ;;  %v3410_v54 = vcombine.high %v3406_v17, %v3406_v17 }
 0x37f   : > { %v8726_v32 = vrot.slane %v5396_v22, %v8020_v44  ;;  %v5424_v45 = vrot.slane %v3409_v13, %v8020_v44  ;;  %v5417_v43 = vrot.slane %v5410_v31, %v8020_v44  ;;  %v8734_v28 = vrot.slane %v5438_v52, %v8020_v44 }
 0x380   : > { %v8717_v63 = vpop.f32.mrb[48].mxu1  ;;  %v8737_v53 = vrot.slane %v3408_v21, %v8020_v44  ;;  %v8741_v48 = vrot.slane %v5452_v1, %v8020_v44  ;;  %v4849_v31 = vsel %vm4666_vm6, %v4634_v18, %v4848_v19  ;;  %v4850_v52 = vrot.slane %v8697_v23, 7 }
 0x381   : > { %v2764_v3 = vpop.f32.mrb[49].mxu1  ;;  %v5431_v33 = vrot.slane %v5424_v45, %v8020_v44  ;;  %v5941_v21 = vsel %vm4681_vm15, %v5940_v35, %v5939_v30  ;;  %v9563_v45 = vrot.slane %v8586_v49, 7  ;;  %v9564_v13 = vunpack.c.l.b16 %v8565_v55 }
 0x382   : > { %v8730_v60 = vpop.f32.mrb[50].mxu1  ;;  %v4852_v3 = vrot.slane %v8710_v15, 6  ;;  %v8760_v18 = vrot.slane %v3410_v54, %v8020_v44  ;;  %v8762_v19 = vunpack.c.l.b16 %v5417_v43  ;;  %v9565_v49 = vunpack.c.l.b16 %v8726_v32 }
 0x383   : > { %v2767_v16 = vpop.f32.mrb[51].mxu1  ;;  %v6069_v1 = vsel %vm4669_vm7, %v9563_v45, %v8639_v12  ;;  %v6074_v22 = vrot.slane %v9564_v13, 4  ;;  %v8765_v30 = vunpack.c.l.b16 %v5431_v33  ;;  %v9566_v55 = vunpack.c.l.b16 %v8720_v47 }
 0x384   : > { %v5942_v16 = vrot.slane %v8681_v2, 1  ;;  %v5944_v12 = vrot.slane %v9565_v49, 7  ;;  %v9567_v17 = vrot.slane %v8589_v57, 6  ;;  %v6076_v43 = vrot.slane %v8668_v56, 3  ;;  %v6736_v57 = vld [vmem:[%s9532_s4] sm:$0xff]  }
 0x385   : > { %v6080_v13 = vrot.slane %v9566_v55, 1  ;;  %v6078_v35 = vrot.slane %v8681_v2, 2  ;;  %v2747_v49 = vadd.f32 %v8579_v59, %v8015_v7  ;;  %v2750_v55 = vadd.f32 %v8595_v41, %v8015_v7  ;;  %v6737_v59 = vld [vmem:[%s9532_s4 + $0x8] sm:$0xff]   ;;  %6640 = vmatprep.subr.bf16.mxu0 %v6736_v57  ;;  %6656 = vmatprep.subr.bf16.mxu1 %v6736_v57 }
 0x386   : > { %v5943_v45 = vsel %vm4684_vm9, %v5942_v16, %v5941_v21  ;;  %v6071_v54 = vsel %vm4672_vm8, %v9567_v17, %v6069_v1  ;;  %v4264_v56 = vrot.slane %v8688_v11, %v8020_v44  ;;  %v9568_v2 = vrot.slane %v8674_v14, %v8020_v44  ;;  %6641 = vmatpush3.bf16.msra.mxu0 %v6736_v57 }
 0x387   : > { %v6003_v33 = vpack.c.b16 %v5943_v45, %v5943_v45  ;;  %v6073_v15 = vsel %vm4675_vm11, %v8678_v58, %v6071_v54  ;;  %v4851_v58 = vsel %vm4669_vm7, %v4850_v52, %v4849_v31  ;;  %vm2813_vm0 = vcmp.ge.f32.partialorder %v2747_v49, 0.0  ;;  %6660 = vmatpush3.bf16.msra.mxu1 %v6736_v57  ;;  %6642 = vmatprep.subr.bf16.mxu0 %v6737_v59 }
 0x388   : > { %v6075_v17 = vsel %vm4678_vm14, %v6074_v22, %v6073_v15  ;;  %v8793_v21 = vunpack.c.l.b16 %v9568_v2  ;;  %v2845_v15 = vmul.f32 0.2, %v2747_v49  ;;  %vm2814_vm1 = vcmp.ge.f32.partialorder %v2750_v55, 0.0  ;;  %6657 = vmatprep.subr.bf16.mxu1 %v6737_v59 }
 0x389   : > { %6014 = vrot.lane.b32.xlu1 %v6003_v33, %s6753_s9  ;;  %v6077_v41 = vsel %vm4681_vm15, %v6076_v43, %v6075_v17  ;;  %v2846_v22 = vmul.f32 0.2, %v2750_v55  ;;  %v8802_v14 = vunpack.c.l.b16 %v4264_v56  ;;  %v4853_v16 = vsel %vm4672_vm8, %v4852_v3, %v4851_v58 }
 0x38a   : > { %9569 = vst [vmem:[#allocation11_spill] sm:$0xff] %v8793_v21  ;;  %v6079_v11 = vsel %vm4684_vm9, %v6078_v35, %v6077_v41  ;;  %v5946_v31 = vrot.slane %v8762_v19, 6  ;;  %v4855_v1 = vsel %vm4675_vm11, %v4854_v62, %v4853_v16  ;;  %v9571_v45 = vunpack.c.l.b16 %v8684_v51  ;;  %v6738_v62 = vld [vmem:[%s9532_s4 + $0x10] sm:$0xff]   ;;  %6643 = vmatpush3.bf16.msra.mxu0 %v6737_v59 }
 0x38b   : > { %9570 = vst [vmem:[#allocation12_spill] sm:$0xff] %v8802_v14  ;;  %v6139_v52 = vpack.c.b16 %v6079_v11, %v6079_v11  ;;  %v2877_v43 = vsel %vm2813_vm0, %v2747_v49, %v2845_v15  ;;  %v2878_v35 = vsel %vm2814_vm1, %v2750_v55, %v2846_v22  ;;  %v4858_v33 = vrot.slane %v8793_v21, 3  ;;  %6644 = vmatprep.subr.bf16.mxu0 %v6738_v62 }
 0x38c   : > { %v4856_v54 = vrot.slane %v9571_v45, 4  ;;  %v9572_v3 = vrot.slane %v8048_v26, 2  ;;  %v2899_v57 = vpack.c.bf16 %v2878_v35, %v2877_v43  ;;  %v6572_v2 = vpack.c.bf16 %v2878_v35, %v2878_v35  ;;  %6661 = vmatpush3.bf16.msra.mxu1 %v6737_v59 }
 0x38d   : > { %6150 = vrot.lane.b32.xlu1 %v6139_v52, %s6751_s30  ;;  %v4860_v55 = vrot.slane %v8802_v14, 2  ;;  %v9573_v26 = vunpack.c.l.b16 %v8734_v28  ;;  %v2758_v22 = vadd.f32 %v8661_v37, %v8015_v7  ;;  %v9575_v43 = vunpack.c.l.b16 %v8720_v47  ;;  %6658 = vmatprep.subr.bf16.mxu1 %v6738_v62 }
 0x38e   : > { %v4682_v17 = vsel %vm4681_vm15, %v9572_v3, %v8071_v29  ;;  %v4857_v49 = vsel %vm4678_vm14, %v4856_v54, %v4855_v1  ;;  %v9574_v29 = vunpack.c.l.b16 %v8726_v32  ;;  %v3418_v1 = vrot.slane %v2899_v57, %v8020_v44  ;;  %6645 = vmatpush3.bf16.msra.mxu0 %v6738_v62 }
 0x38f   : > { %v8815_v56 = vpop.f32.mrb[52].mxu1  ;;  %v8825_v41 = vrot.slane %v9573_v26, 4  ;;  %v4859_v11 = vsel %vm4681_vm15, %v4858_v33, %v4857_v49  ;;  %v3425_v45 = vrot.slane %v6572_v2, %v8020_v44  ;;  %v8847_v37 = vsel %vm4666_vm6, %v5944_v12, %v9575_v43 }
 0x390   : > { %v2772_v58 = vpop.f32.mrb[53].mxu1  ;;  %v8830_v15 = vsel %vm4666_vm6, %v9574_v29, %v6080_v13  ;;  %v4861_v54 = vsel %vm4684_vm9, %v4860_v55, %v4859_v11  ;;  %v6739_v13 = vld [vmem:[%s9532_s4 + $0x18] sm:$0xff]   ;;  %v4683_v33 = vrot.slane %v8051_v39, 1  ;;  %v2755_v3 = vadd.f32 %v8652_v50, %v8015_v7  ;;  %6662 = vmatpush3.bf16.msra.mxu1 %v6738_v62 }
 0x391   : > { %v8835_v16 = vpop.f32.mrb[54].mxu1  ;;  %v4908_v35 = vpack.c.b16 %v4861_v54, %v4861_v54  ;;  %v3426_v57 = vcombine.high %v3418_v1, %v3418_v1  ;;  %v3427_v2 = vcombine.high %v3425_v45, %v3425_v45  ;;  %v3434_v49 = vrot.slane %v3418_v1, %v8020_v44  ;;  %6646 = vmatprep.subr.bf16.mxu0 %v6739_v13 }
 0x392   : > { %v2775_v32 = vpop.f32.mrb[55].mxu1  ;;  %v3441_v55 = vrot.slane %v3425_v45, %v8020_v44  ;;  %v5948_v58 = vrot.slane %v8765_v30, 5  ;;  %v4685_v12 = vsel %vm4684_vm9, %v4683_v33, %v4682_v17  ;;  %v2848_v39 = vmul.f32 0.2, %v2758_v22  ;;  %6659 = vmatprep.subr.bf16.mxu1 %v6739_v13  ;;  %6647 = vmatpush3.bf16.msra.mxu0 %v6739_v13 }
 0x393   : > { %4920 = vrot.lane.b32.xlu0 %v4908_v35, %s6756_s14  ;;  %v3448_v50 = vrot.slane %v3426_v57, %v8020_v44  ;;  %v3455_v59 = vrot.slane %v3427_v2, %v8020_v44  ;;  %v3456_v26 = vcombine.high %v3434_v49, %v3434_v49  ;;  %vm2816_vm10 = vcmp.ge.f32.partialorder %v2758_v22, 0.0 }
 0x394   : > { %v3457_v29 = vcombine.high %v3441_v55, %v3441_v55  ;;  %v4271_v11 = vrot.slane %v3434_v49, %v8020_v44  ;;  %v4327_v1 = vrot.slane %v3441_v55, %v8020_v44  ;;  %v2847_v45 = vmul.f32 0.2, %v2755_v3  ;;  %6663 = vmatpush3.bf16.msra.mxu1 %v6739_v13 }
 0x395   : > { %v3458_v54 = vcombine.high %v3448_v50, %v3448_v50  ;;  %v4285_v32 = vrot.slane %v3448_v50, %v8020_v44  ;;  %v4299_v17 = vrot.slane %v3456_v26, %v8020_v44  ;;  %vm2815_vm12 = vcmp.ge.f32.partialorder %v2755_v3, 0.0  ;;  %v4913_v50 = vpop.permute.xlu0 %4912 }
 0x396   : > { %v4278_v43 = vrot.slane %v4271_v11, %v8020_v44  ;;  %v8866_v35 = vrot.slane %v4327_v1, %v8020_v44  ;;  %v4341_v33 = vrot.slane %v3455_v59, %v8020_v44  ;;  %v2880_v57 = vsel %vm2816_vm10, %v2758_v22, %v2848_v39 }
 0x397   : > { %v3459_v2 = vcombine.high %v3455_v59, %v3455_v59  ;;  %v8870_v49 = vrot.slane %v4285_v32, %v8020_v44  ;;  %v4306_v62 = vrot.slane %v4299_v17, %v8020_v44  ;;  %v4313_v55 = vrot.slane %v3458_v54, %v8020_v44 }
 0x398   : > { %9576 = vst [vmem:[#allocation13_spill] sm:$0xff] %v8866_v35  ;;  %v8875_v26 = vrot.slane %v4341_v33, %v8020_v44  ;;  %v8878_v11 = vrot.slane %v3457_v29, %v8020_v44  ;;  %v4784_v1 = vpack.c.b16 %v4685_v12, %v4685_v12  ;;  %v2879_v47 = vsel %vm2815_vm12, %v2755_v3, %v2847_v45 }
 0x399   : > { %v4641_v22 = vunpack.c.l.b16 %v4278_v43  ;;  %v9542_v39 = vunpack.c.l.b16 %v8870_v49  ;;  %v9541_v59 = vunpack.c.l.b16 %v8866_v35  ;;  %v2900_v32 = vpack.c.bf16 %v2880_v57, %v2879_v47 }
 0x39a   : > { %v9577_v54 = vunpack.c.l.b16 %v8734_v28  ;;  %v8889_v33 = vsel %vm921_vm2, %v4784_v1, %v4913_v50  ;;  %v5487_v12 = vrot.slane %v8760_v18, %v8020_v44  ;;  %v9578_v13 = vrot.slane %v8737_v53, %v8020_v44 }
 0x39b   : > { %v4320_v47 = vrot.slane %v4313_v55, %v8020_v44  ;;  %v8900_v45 = vrot.slane %v3459_v2, %v8020_v44  ;;  %v8902_v28 = vunpack.c.l.b16 %v4306_v62  ;;  %v4742_v43 = vrot.slane %v9542_v39, 7 }
 0x39c   : > { %v8882_v52 = vpop.f32.mrb[56].mxu1  ;;  %v8886_v17 = vrot.slane %v9577_v54, 5  ;;  %v8896_v3 = vunpack.c.l.b16 %v9578_v13  ;;  %v6573_v1 = vpack.c.bf16 %v2880_v57, %v2880_v57  ;;  %v3467_v54 = vrot.slane %v2900_v32, %v8020_v44 }
 0x39d   : > { %v2780_v29 = vpop.f32.mrb[57].mxu1  ;;  %9579 = vst [vmem:[#allocation14_spill] sm:$0xff] %v8902_v28  ;;  %v8913_v55 = vsel %vm4666_vm6, %v4742_v43, %v4641_v22  ;;  %v4862_v2 = vrot.slane %v4641_v22, 1  ;;  %v8917_v62 = vrot.slane %v9541_v59, 5  ;;  %v8928_v43 = vunpack.c.l.b16 %v4320_v47 }
 0x39e   : > { %v8906_v50 = vpop.f32.mrb[58].mxu1  ;;  %9580 = vst [vmem:[#allocation15_spill] sm:$0xff] %v8913_v55  ;;  %v5947_v29 = vsel %vm4669_vm7, %v5946_v31, %v8847_v37  ;;  %v3474_v18 = vrot.slane %v6573_v1, %v8020_v44  ;;  %v3475_v53 = vcombine.high %v3467_v54, %v3467_v54  ;;  %v3483_v57 = vrot.slane %v3467_v54, %v8020_v44 }
 0x39f   : > { %v2783_v13 = vpop.f32.mrb[59].mxu1  ;;  %v5949_v32 = vsel %vm4672_vm8, %v5948_v58, %v5947_v29  ;;  %9581 = vst [vmem:[#allocation16_spill] sm:$0xff] %v8928_v43  ;;  %v9582_v59 = vunpack.c.l.b16 %v8741_v48  ;;  %v8938_v21 = vunpack.c.l.b16 %v5487_v12  ;;  %v5954_v47 = vrot.slane %v8896_v3, 2 }
 0x3a0   : > { %v5951_v13 = vsel %vm4675_vm11, %v8825_v41, %v5949_v32  ;;  %v3476_v31 = vcombine.high %v3474_v18, %v3474_v18  ;;  %v3490_v37 = vrot.slane %v3474_v18, %v8020_v44  ;;  %v3497_v1 = vrot.slane %v3475_v53, %v8020_v44 }
 0x3a1   : > { %v5952_v39 = vrot.slane %v9582_v59, 3  ;;  %v3505_v54 = vcombine.high %v3483_v57, %v3483_v57  ;;  %v5494_v14 = vrot.slane %v3483_v57, %v8020_v44  ;;  %v5956_v35 = vrot.slane %v8938_v21, 1 }
 0x3a2   : > { %v3504_v29 = vrot.slane %v3476_v31, %v8020_v44  ;;  %v3506_v41 = vcombine.high %v3490_v37, %v3490_v37  ;;  %v3507_v32 = vcombine.high %v3497_v1, %v3497_v1  ;;  %v5508_v59 = vrot.slane %v3497_v1, %v8020_v44 }
 0x3a3   : > { %v5953_v58 = vsel %vm4678_vm14, %v5952_v39, %v5951_v13  ;;  %v8945_v22 = vrot.slane %v5494_v14, %v8020_v44  ;;  %v5522_v18 = vrot.slane %v3505_v54, %v8020_v44  ;;  %v5550_v53 = vrot.slane %v3490_v37, %v8020_v44 }
 0x3a4   : > { %v5955_v12 = vsel %vm4681_vm15, %v5954_v47, %v5953_v58  ;;  %v3508_v57 = vcombine.high %v3504_v29, %v3504_v29  ;;  %v5515_v39 = vrot.slane %v5508_v59, %v8020_v44  ;;  %v5536_v13 = vrot.slane %v3507_v32, %v8020_v44  ;;  %v6009_v58 = vpop.permute.xlu0 %6008 }
 0x3a5   : > { %v5564_v31 = vrot.slane %v3504_v29, %v8020_v44  ;;  %v5529_v1 = vrot.slane %v5522_v18, %v8020_v44  ;;  %v8957_v14 = vrot.slane %v5550_v53, %v8020_v44  ;;  %v8960_v54 = vrot.slane %v3506_v41, %v8020_v44 }
 0x3a6   : > { %v5864_v37 = vunpack.c.l.b16 %v8945_v22  ;;  %v5543_v59 = vrot.slane %v5536_v13, %v8020_v44  ;;  %v5865_v29 = vunpack.c.l.b16 %v5515_v39  ;;  %v9583_v18 = vunpack.c.l.b16 %v8870_v49 }
 0x3a7   : > { %v8953_v51 = vpop.f32.mrb[60].mxu1  ;;  %v8965_v32 = vrot.slane %v5564_v31, %v8020_v44  ;;  %v4864_v41 = vrot.slane %v8902_v28, 7  ;;  %v8974_v23 = vunpack.c.l.b16 %v5529_v1  ;;  %v4866_v13 = vrot.slane %v8928_v43, 6 }
 0x3a8   : > { %v2788_v47 = vpop.f32.mrb[61].mxu1  ;;  %v4863_v53 = vsel %vm4666_vm6, %v9583_v18, %v4862_v2  ;;  %v5957_v31 = vsel %vm4684_vm9, %v5956_v35, %v5955_v12  ;;  %v8981_v39 = vsel %vm954_vm3, %v8889_v33, %v6009_v58  ;;  %v9584_v49 = vrot.slane %v8762_v19, 7 }
 0x3a9   : > { %v8968_v55 = vpop.f32.mrb[62].mxu1  ;;  %v8990_v18 = vrot.slane %v3508_v57, %v8020_v44  ;;  %v9585_v22 = vunpack.c.l.b16 %v8741_v48  ;;  %v8994_v35 = vunpack.c.l.b16 %v5543_v59  ;;  %v5958_v12 = vrot.slane %v5865_v29, 7 }
 0x3aa   : > { %v2791_v47 = vpop.f32.mrb[63].mxu1  ;;  %v6083_v2 = vsel %vm4669_vm7, %v9584_v49, %v8830_v15  ;;  %v5960_v58 = vrot.slane %v8974_v23, 6  ;;  %v9586_v19 = vunpack.c.l.b16 %v8957_v14  ;;  %v6004_v49 = vpack.c.b16 %v5957_v31, %v5957_v31 }
 0x3ab   : > { %v6094_v47 = vrot.slane %v5864_v37, 1  ;;  %v6088_v43 = vrot.slane %v9585_v22, 4  ;;  %v9587_v1 = vrot.slane %v8765_v30, 6  ;;  %v6090_v28 = vrot.slane %v8896_v3, 3 }
 0x3ac   : > { %v9000_v15 = vrot.slane %v9586_v19, 4  ;;  %v6092_v59 = vrot.slane %v8938_v21, 2  ;;  %v2763_v22 = vadd.f32 %v8717_v63, %v8015_v7  ;;  %v2766_v33 = vadd.f32 %v8730_v60, %v8015_v7  ;;  %6016 = vrot.lane.b32.xlu0 %v6004_v49, %s6753_s9 }
 0x3ad   : > { %v6085_v57 = vsel %vm4672_vm8, %v9587_v1, %v6083_v2  ;;  %v4376_v30 = vrot.slane %v8900_v45, %v8020_v44  ;;  %v9588_v3 = vrot.slane %v8878_v11, %v8020_v44  ;;  %v4865_v21 = vsel %vm4669_vm7, %v4864_v41, %v4863_v53 }
 0x3ae   : > { %v6087_v48 = vsel %vm4675_vm11, %v8886_v17, %v6085_v57  ;;  %vm2817_vm13 = vcmp.ge.f32.partialorder %v2763_v22, 0.0  ;;  %v2849_v63 = vmul.f32 0.2, %v2763_v22  ;;  %vm2818_vm0 = vcmp.ge.f32.partialorder %v2766_v33, 0.0 }
 0x3af   : > { %v6089_v31 = vsel %vm4678_vm14, %v6088_v43, %v6087_v48  ;;  %v9020_v2 = vunpack.c.l.b16 %v9588_v3  ;;  %v2850_v1 = vmul.f32 0.2, %v2766_v33  ;;  %v9025_v19 = vunpack.c.l.b16 %v4376_v30 }
 0x3b0   : > { %v6091_v17 = vsel %vm4681_vm15, %v6090_v28, %v6089_v31  ;;  %v4867_v43 = vsel %vm4672_vm8, %v4866_v13, %v4865_v21  ;;  %v9029_v45 = vsel %vm4666_vm6, %v5865_v29, %v6094_v47  ;;  %v9589_v53 = vunpack.c.l.b16 %v8875_v26 }
 0x3b1   : > { %v6093_v60 = vsel %vm4684_vm9, %v6092_v59, %v6091_v17  ;;  %v4869_v49 = vsel %vm4675_vm11, %v8917_v62, %v4867_v43  ;;  %v2881_v41 = vsel %vm2817_vm13, %v2763_v22, %v2849_v63  ;;  %v2882_v57 = vsel %vm2818_vm0, %v2766_v33, %v2850_v1 }
 0x3b2   : > { %v6140_v11 = vpack.c.b16 %v6093_v60, %v6093_v60  ;;  %v4870_v28 = vrot.slane %v9589_v53, 4  ;;  %v4872_v48 = vrot.slane %v9020_v2, 3  ;;  %v9590_v59 = vrot.slane %v8156_v6, 6 }
 0x3b3   : > { %v2901_v29 = vpack.c.bf16 %v2882_v57, %v2881_v41  ;;  %v6574_v13 = vpack.c.bf16 %v2882_v57, %v2882_v57  ;;  %v4874_v62 = vrot.slane %v9025_v19, 2  ;;  %v9044_v30 = vsel %vm4666_vm6, %v5958_v12, %v5864_v37 }
 0x3b4   : > { %v4689_v31 = vsel %vm4669_vm7, %v9590_v59, %v8162_v5  ;;  %6152 = vrot.lane.b32.xlu0 %v6140_v11, %s6751_s30  ;;  %v4871_v47 = vsel %vm4678_vm14, %v4870_v28, %v4869_v49  ;;  %v6096_v33 = vrot.slane %v8974_v23, 7  ;;  %v4690_v3 = vrot.slane %v8194_v36, 5 }
 0x3b5   : > { %v4873_v22 = vsel %vm4681_vm15, %v4872_v48, %v4871_v47  ;;  %v5962_v6 = vrot.slane %v8994_v35, 5  ;;  %v3516_v5 = vrot.slane %v2901_v29, %v8020_v44  ;;  %v3523_v21 = vrot.slane %v6574_v13, %v8020_v44  ;;  %v6145_v47 = vpop.permute.xlu0 %6144 }
 0x3b6   : > { %v4875_v17 = vsel %vm4684_vm9, %v4874_v62, %v4873_v22  ;;  %v6098_v63 = vrot.slane %v8994_v35, 6  ;;  %v4691_v37 = vsel %vm4672_vm8, %v4690_v3, %v4689_v31  ;;  %v2771_v12 = vadd.f32 %v8815_v56, %v8015_v7 }
 0x3b7   : > { %v4909_v60 = vpack.c.b16 %v4875_v17, %v4875_v17  ;;  %v3524_v1 = vcombine.high %v3516_v5, %v3516_v5  ;;  %v3525_v43 = vcombine.high %v3523_v21, %v3523_v21  ;;  %v3532_v36 = vrot.slane %v3516_v5, %v8020_v44 }
 0x3b8   : > { %v3539_v11 = vrot.slane %v3523_v21, %v8020_v44  ;;  %v9591_v49 = vunpack.c.l.b16 %v8149_v20  ;;  %v4696_v28 = vrot.slane %v8250_v46, 2  ;;  %v4693_v41 = vsel %vm4675_vm11, %v8212_v27, %v4691_v37 }
 0x3b9   : > { %4922 = vrot.lane.b32.xlu1 %v4909_v60, %s6756_s14  ;;  %v2774_v57 = vadd.f32 %v8835_v16, %v8015_v7  ;;  %v3546_v56 = vrot.slane %v3524_v1, %v8020_v44  ;;  %v3553_v48 = vrot.slane %v3525_v43, %v8020_v44  ;;  %v3554_v59 = vcombine.high %v3532_v36, %v3532_v36 }
 0x3ba   : > { %v4694_v53 = vrot.slane %v9591_v49, 3  ;;  %v3555_v31 = vcombine.high %v3539_v11, %v3539_v11  ;;  %v4383_v29 = vrot.slane %v3532_v36, %v8020_v44  ;;  %v4439_v13 = vrot.slane %v3539_v11, %v8020_v44 }
 0x3bb   : > { %vm2819_vm1 = vcmp.ge.f32.partialorder %v2771_v12, 0.0  ;;  %v2851_v20 = vmul.f32 0.2, %v2771_v12  ;;  %v3556_v46 = vcombine.high %v3546_v56, %v3546_v56  ;;  %v4397_v62 = vrot.slane %v3546_v56, %v8020_v44 }
 0x3bc   : > { %v4411_v27 = vrot.slane %v3554_v59, %v8020_v44  ;;  %v4695_v16 = vsel %vm4678_vm14, %v4694_v53, %v4693_v41  ;;  %v3557_v22 = vcombine.high %v3553_v48, %v3553_v48  ;;  %v4390_v3 = vrot.slane %v4383_v29, %v8020_v44 }
 0x3bd   : > { %v9076_v5 = vrot.slane %v4439_v13, %v8020_v44  ;;  %v4453_v21 = vrot.slane %v3553_v48, %v8020_v44  ;;  %v9080_v17 = vrot.slane %v4397_v62, %v8020_v44  ;;  %v4425_v37 = vrot.slane %v3556_v46, %v8020_v44 }
 0x3be   : > { %v4418_v60 = vrot.slane %v4411_v27, %v8020_v44  ;;  %v9085_v1 = vrot.slane %v3555_v31, %v8020_v44  ;;  %v9592_v43 = vunpack.c.l.b16 %v8957_v14  ;;  %v9091_v11 = vsel %vm987_vm4, %v8981_v39, %v6145_v47 }
 0x3bf   : > { %v9094_v49 = vrot.slane %v4453_v21, %v8020_v44  ;;  %v4649_v53 = vunpack.c.l.b16 %v4390_v3  ;;  %v4432_v41 = vrot.slane %v4425_v37, %v8020_v44  ;;  %v4650_v56 = vunpack.c.l.b16 %v9080_v17  ;;  %v4915_v3 = vpop.permute.xlu1 %4914 }
 0x3c0   : > { %v6100_v36 = vrot.slane %v9592_v43, 5  ;;  %v4653_v48 = vunpack.c.l.b16 %v9076_v5  ;;  %v4697_v59 = vsel %vm4681_vm15, %v4696_v28, %v4695_v16  ;;  %v4698_v31 = vrot.slane %v8255_v34, 1 }
 0x3c1   : > { %v2883_v14 = vsel %vm2819_vm1, %v2771_v12, %v2851_v20  ;;  %vm2820_vm10 = vcmp.ge.f32.partialorder %v2774_v57, 0.0  ;;  %v5599_v39 = vrot.slane %v8990_v18, %v8020_v44  ;;  %v4474_v29 = vrot.slane %v9085_v1, %v8020_v44 }
 0x3c2   : > { %v9107_v13 = vrot.slane %v3557_v22, %v8020_v44  ;;  %v9109_v47 = vunpack.c.l.b16 %v4418_v60  ;;  %v4756_v46 = vrot.slane %v4650_v56, 7  ;;  %v4654_v28 = vunpack.c.l.b16 %v9094_v49 }
 0x3c3   : > { %v4699_v34 = vsel %vm4684_vm9, %v4698_v31, %v4697_v59  ;;  %v2852_v12 = vmul.f32 0.2, %v2774_v57  ;;  %v9593_v20 = vrot.slane %v8960_v54, %v8020_v44  ;;  %v9118_v62 = vunpack.c.l.b16 %v4432_v41 }
 0x3c4   : > { %v9121_v27 = vsel %vm4666_vm6, %v4756_v46, %v4649_v53  ;;  %v9123_v16 = vrot.slane %v4649_v53, 1  ;;  %v9127_v22 = vrot.slane %v4653_v48, 5  ;;  %v4785_v21 = vpack.c.b16 %v4699_v34, %v4699_v34  ;;  %v6011_v34 = vpop.permute.xlu1 %6010 }
 0x3c5   : > { %v5870_v18 = vunpack.c.l.b16 %v9593_v20  ;;  %v2884_v60 = vsel %vm2820_vm10, %v2774_v57, %v2852_v12  ;;  %v5871_v37 = vunpack.c.l.b16 %v5599_v39  ;;  %v5961_v54 = vsel %vm4669_vm7, %v5960_v58, %v9044_v30 }
 0x3c6   : > { %v2902_v43 = vpack.c.bf16 %v2884_v60, %v2883_v14  ;;  %v6575_v41 = vpack.c.bf16 %v2884_v60, %v2884_v60  ;;  %v5963_v53 = vsel %vm4672_vm8, %v5962_v6, %v5961_v54  ;;  %v9594_v59 = vunpack.c.l.b16 %v8965_v32 }
 0x3c7   : > { %v6165_v46 = vsel %vm921_vm2, %v4785_v21, %v4915_v3  ;;  %v5965_v57 = vsel %vm4675_vm11, %v9000_v15, %v5963_v53  ;;  %v5968_v39 = vrot.slane %v5870_v18, 2  ;;  %v6097_v58 = vsel %vm4669_vm7, %v6096_v33, %v9029_v45 }
 0x3c8   : > { %v5966_v31 = vrot.slane %v9594_v59, 3  ;;  %v3565_v30 = vrot.slane %v2902_v43, %v8020_v44  ;;  %v3572_v14 = vrot.slane %v6575_v41, %v8020_v44  ;;  %v6099_v12 = vsel %vm4672_vm8, %v6098_v63, %v6097_v58 }
 0x3c9   : > { %v5970_v15 = vrot.slane %v5871_v37, 1  ;;  %v6101_v3 = vsel %vm4675_vm11, %v6100_v36, %v6099_v12  ;;  %v9595_v23 = vmov %v9594_v59  ;;  %v6187_v35 = vsel %vm954_vm3, %v6165_v46, %v6011_v34 }
 0x3ca   : > { %v5967_v6 = vsel %vm4678_vm14, %v5966_v31, %v5965_v57  ;;  %v6102_v21 = vrot.slane %v9595_v23, 4  ;;  %v3573_v45 = vcombine.high %v3565_v30, %v3565_v30  ;;  %v3574_v33 = vcombine.high %v3572_v14, %v3572_v14 }
 0x3cb   : > { %v5969_v20 = vsel %vm4681_vm15, %v5968_v39, %v5967_v6  ;;  %v3581_v60 = vrot.slane %v3565_v30, %v8020_v44  ;;  %v3588_v54 = vrot.slane %v3572_v14, %v8020_v44  ;;  %v6104_v41 = vrot.slane %v5870_v18, 3  ;;  %v6147_v18 = vpop.permute.xlu1 %6146 }
 0x3cc   : > { %v5971_v43 = vsel %vm4684_vm9, %v5970_v15, %v5969_v20  ;;  %v6103_v63 = vsel %vm4678_vm14, %v6102_v21, %v6101_v3  ;;  %v3595_v53 = vrot.slane %v3573_v45, %v8020_v44  ;;  %v3602_v36 = vrot.slane %v3574_v33, %v8020_v44 }
 0x3cd   : > { %v3603_v59 = vcombine.high %v3581_v60, %v3581_v60  ;;  %v3604_v32 = vcombine.high %v3588_v54, %v3588_v54  ;;  %v5606_v31 = vrot.slane %v3581_v60, %v8020_v44  ;;  %v5662_v57 = vrot.slane %v3588_v54, %v8020_v44 }
 0x3ce   : > { %v6005_v39 = vpack.c.b16 %v5971_v43, %v5971_v43  ;;  %v6105_v58 = vsel %vm4681_vm15, %v6104_v41, %v6103_v63  ;;  %v3605_v30 = vcombine.high %v3595_v53, %v3595_v53  ;;  %v5620_v14 = vrot.slane %v3595_v53, %v8020_v44 }
 0x3cf   : > { %v5634_v46 = vrot.slane %v3603_v59, %v8020_v44  ;;  %v6106_v6 = vrot.slane %v5871_v37, 2  ;;  %v3606_v34 = vcombine.high %v3602_v36, %v3602_v36  ;;  %v9169_v12 = vrot.slane %v5606_v31, %v8020_v44 }
 0x3d0   : > { %v5669_v20 = vrot.slane %v5662_v57, %v8020_v44  ;;  %v5676_v15 = vrot.slane %v3602_v36, %v8020_v44  ;;  %6018 = vrot.lane.b32.xlu1 %v6005_v39, %s6753_s9  ;;  %v9175_v3 = vrot.slane %v5620_v14, %v8020_v44  ;;  %v5648_v21 = vrot.slane %v3605_v30, %v8020_v44 }
 0x3d1   : > { %v5641_v23 = vrot.slane %v5634_v46, %v8020_v44  ;;  %v9180_v37 = vrot.slane %v3604_v32, %v8020_v44  ;;  %v5872_v33 = vunpack.c.l.b16 %v9169_v12  ;;  %v6203_v54 = vsel %vm987_vm4, %v6187_v35, %v6147_v18 }
 0x3d2   : > { %v9183_v45 = vrot.slane %v5676_v15, %v8020_v44  ;;  %v5876_v60 = vunpack.c.l.b16 %v5669_v20  ;;  %v5655_v43 = vrot.slane %v5648_v21, %v8020_v44  ;;  %v5873_v63 = vunpack.c.l.b16 %v9175_v3 }
 0x3d3   : > { %v9189_v41 = vunpack.c.l.b16 %v5641_v23  ;;  %v6107_v53 = vsel %vm4684_vm9, %v6106_v6, %v6105_v58  ;;  %v4877_v36 = vsel %vm4666_vm6, %v4650_v56, %v9123_v16  ;;  %v4878_v59 = vrot.slane %v9109_v47, 7 }
 0x3d4   : > { %v4880_v32 = vrot.slane %v9118_v62, 6  ;;  %v9199_v31 = vrot.slane %v3606_v34, %v8020_v44  ;;  %v5697_v35 = vrot.slane %v9180_v37, %v8020_v44  ;;  %v5877_v57 = vunpack.c.l.b16 %v9183_v45 }
 0x3d5   : > { %v9204_v39 = vrot.slane %v5876_v60, 4  ;;  %v6108_v58 = vrot.slane %v5872_v33, 1  ;;  %v9206_v30 = vrot.slane %v5876_v60, 5  ;;  %v6141_v17 = vpack.c.b16 %v6107_v53, %v6107_v53 }
 0x3d6   : > { %v6578_v56 = vcombine.low %v9091_v11, %v6203_v54  ;;  %v2779_v16 = vadd.f32 %v8882_v52, %v8015_v7  ;;  %v9211_v14 = vunpack.c.l.b16 %v5655_v43  ;;  %v5972_v46 = vrot.slane %v5873_v63, 7 }
 0x3d7   : > { %v5974_v6 = vrot.slane %v9189_v41, 6  ;;  %v2782_v18 = vadd.f32 %v8906_v50, %v8015_v7  ;;  %6154 = vrot.lane.b32.xlu1 %v6141_v17, %s6751_s30  ;;  %v4488_v11 = vrot.slane %v9107_v13, %v8020_v44  ;;  %v9223_v52 = vunpack.c.l.b16 %v4474_v29 }
 0x3d8   : > { %vm2821_vm12 = vcmp.ge.f32.partialorder %v2779_v16, 0.0  ;;  %v2853_v34 = vmul.f32 0.2, %v2779_v16  ;;  %6648 = vmatprep.mubr.msk.bf16.mxu0 %vm1020_vm5, %v6578_v56  ;;  %v4879_v20 = vsel %vm4669_vm7, %v4878_v59, %v4877_v36  ;;  %v4884_v50 = vrot.slane %v4654_v28, 4 }
 0x3d9   : > { %vm2822_vm13 = vcmp.ge.f32.partialorder %v2782_v18, 0.0  ;;  %v2854_v12 = vmul.f32 0.2, %v2782_v18  ;;  %v9228_v3 = vunpack.c.l.b16 %v4488_v11  ;;  %v4881_v23 = vsel %vm4672_vm8, %v4880_v32, %v4879_v20 }
 0x3da   : > { %v2885_v15 = vsel %vm2821_vm12, %v2779_v16, %v2853_v34  ;;  %v4886_v21 = vrot.slane %v9223_v52, 3  ;;  %v4883_v1 = vsel %vm4675_vm11, %v9127_v22, %v4881_v23  ;;  %v9596_v29 = vrot.slane %v8328_v0, 6 }
 0x3db   : > { %v2886_v13 = vsel %vm2822_vm13, %v2782_v18, %v2854_v12  ;;  %v4704_v54 = vrot.slane %v8339_v4, 5  ;;  %v4885_v36 = vsel %vm4678_vm14, %v4884_v50, %v4883_v1  ;;  %v4888_v59 = vrot.slane %v9228_v3, 2 }
 0x3dc   : > { %v4703_v60 = vsel %vm4669_vm7, %v9596_v29, %v8334_v9  ;;  %v2903_v43 = vpack.c.bf16 %v2886_v13, %v2885_v15  ;;  %v6576_v53 = vpack.c.bf16 %v2886_v13, %v2886_v13  ;;  %v6110_v32 = vrot.slane %v9189_v41, 7 }
 0x3dd   : > { %v4887_v17 = vsel %vm4681_vm15, %v4886_v21, %v4885_v36  ;;  %v4705_v56 = vsel %vm4672_vm8, %v4704_v54, %v4703_v60  ;;  %v9597_v22 = vunpack.c.l.b16 %v8310_v61  ;;  %v4710_v12 = vrot.slane %v8419_v38, 2 }
 0x3de   : > { %v3614_v0 = vrot.slane %v2903_v43, %v8020_v44  ;;  %v3621_v9 = vrot.slane %v6576_v53, %v8020_v44  ;;  %v4889_v4 = vsel %vm4684_vm9, %v4888_v59, %v4887_v17  ;;  %v4707_v18 = vsel %vm4675_vm11, %v8376_v40, %v4705_v56 }
 0x3df   : > { %v4708_v16 = vrot.slane %v9597_v22, 3  ;;  %v4910_v34 = vpack.c.b16 %v4889_v4, %v4889_v4  ;;  %v2787_v20 = vadd.f32 %v8953_v51, %v8015_v7  ;;  %v5973_v21 = vsel %vm4666_vm6, %v5972_v46, %v5872_v33 }
 0x3e0   : > { %v3622_v50 = vcombine.high %v3614_v0, %v3614_v0  ;;  %v3623_v61 = vcombine.high %v3621_v9, %v3621_v9  ;;  %v3630_v15 = vrot.slane %v3614_v0, %v8020_v44  ;;  %v3637_v23 = vrot.slane %v3621_v9, %v8020_v44 }
 0x3e1   : > { %v4709_v11 = vsel %vm4678_vm14, %v4708_v16, %v4707_v18  ;;  %v6109_v13 = vsel %vm4666_vm6, %v5873_v63, %v6108_v58  ;;  %4924 = vrot.lane.b32.xlu0 %v4910_v34, %s6756_s14  ;;  %v4712_v1 = vrot.slane %v8425_v10, 1  ;;  %vm2823_vm0 = vcmp.ge.f32.partialorder %v2787_v20, 0.0 }
 0x3e2   : > { %v4711_v40 = vsel %vm4681_vm15, %v4710_v12, %v4709_v11  ;;  %v3644_v38 = vrot.slane %v3622_v50, %v8020_v44  ;;  %v3651_v51 = vrot.slane %v3623_v61, %v8020_v44  ;;  %v3652_v29 = vcombine.high %v3630_v15, %v3630_v15 }
 0x3e3   : > { %v3653_v60 = vcombine.high %v3637_v23, %v3637_v23  ;;  %v4495_v54 = vrot.slane %v3630_v15, %v8020_v44  ;;  %v4551_v43 = vrot.slane %v3637_v23, %v8020_v44  ;;  %v2855_v33 = vmul.f32 0.2, %v2787_v20 }
 0x3e4   : > { %v3654_v46 = vcombine.high %v3644_v38, %v3644_v38  ;;  %v4509_v63 = vrot.slane %v3644_v38, %v8020_v44  ;;  %v4523_v58 = vrot.slane %v3652_v29, %v8020_v44  ;;  %v2790_v10 = vadd.f32 %v8968_v55, %v8015_v7 }
 0x3e5   : > { %v3655_v53 = vcombine.high %v3651_v51, %v3651_v51  ;;  %v4502_v36 = vrot.slane %v4495_v54, %v8020_v44  ;;  %v9272_v59 = vrot.slane %v4551_v43, %v8020_v44  ;;  %v4565_v17 = vrot.slane %v3651_v51, %v8020_v44  ;;  %v4917_v43 = vpop.permute.xlu0 %4916 }
 0x3e6   : > { %v4516_v56 = vrot.slane %v4509_v63, %v8020_v44  ;;  %v4530_v22 = vrot.slane %v4523_v58, %v8020_v44  ;;  %v4537_v16 = vrot.slane %v3654_v46, %v8020_v44  ;;  %v9279_v0 = vrot.slane %v3653_v60, %v8020_v44 }
 0x3e7   : > { %v9282_v9 = vrot.slane %v4565_v17, %v8020_v44  ;;  %v4657_v7 = vunpack.c.l.b16 %v4502_v36  ;;  %v4661_v55 = vunpack.c.l.b16 %v9272_v59  ;;  %v4713_v4 = vsel %vm4684_vm9, %v4712_v1, %v4711_v40 }
 0x3e8   : > { %v5976_v18 = vrot.slane %v9211_v14, 5  ;;  %v4544_v34 = vrot.slane %v4537_v16, %v8020_v44  ;;  %v4658_v11 = vunpack.c.l.b16 %v4516_v56  ;;  %v9288_v12 = vunpack.c.l.b16 %v4530_v22 }
 0x3e9   : > { %v6112_v50 = vrot.slane %v9211_v14, 6  ;;  %v9292_v61 = vrot.slane %v3655_v53, %v8020_v44  ;;  %v4890_v15 = vrot.slane %v4657_v7, 1  ;;  %v2887_v23 = vsel %vm2823_vm0, %v2787_v20, %v2855_v33 }
 0x3ea   : > { %v4586_v38 = vrot.slane %v9279_v0, %v8020_v44  ;;  %v4662_v40 = vunpack.c.l.b16 %v9282_v9  ;;  %v4770_v1 = vrot.slane %v4658_v11, 7  ;;  %v4786_v51 = vpack.c.b16 %v4713_v4, %v4713_v4 }
 0x3eb   : > { %v9298_v29 = vunpack.c.l.b16 %v4544_v34  ;;  %v9302_v60 = vrot.slane %v4661_v55, 5  ;;  %vm2824_vm1 = vcmp.ge.f32.partialorder %v2790_v10, 0.0  ;;  %v2856_v14 = vmul.f32 0.2, %v2790_v10 }
 0x3ec   : > { %v9305_v54 = vsel %vm4666_vm6, %v4770_v1, %v4657_v7  ;;  %v4892_v20 = vrot.slane %v9288_v12, 7  ;;  %v5711_v33 = vrot.slane %v9199_v31, %v8020_v44  ;;  %v5878_v46 = vunpack.c.l.b16 %v5697_v35 }
 0x3ed   : > { %v9314_v63 = vsel %vm4666_vm6, %v4658_v11, %v4890_v15  ;;  %v2888_v58 = vsel %vm2824_vm1, %v2790_v10, %v2856_v14  ;;  %v5975_v53 = vsel %vm4669_vm7, %v5974_v6, %v5973_v21  ;;  %v5980_v36 = vrot.slane %v5877_v57, 3 }
 0x3ee   : > { %v2904_v17 = vpack.c.bf16 %v2888_v58, %v2887_v23  ;;  %v6577_v56 = vpack.c.bf16 %v2888_v58, %v2888_v58  ;;  %v5879_v22 = vunpack.c.l.b16 %v5711_v33  ;;  %v5977_v31 = vsel %vm4672_vm8, %v5976_v18, %v5975_v53 }
 0x3ef   : > { %v9323_v16 = vsel %vm921_vm2, %v4786_v51, %v4917_v43  ;;  %v5979_v37 = vsel %vm4675_vm11, %v9204_v39, %v5977_v31  ;;  %v5982_v35 = vrot.slane %v5878_v46, 2  ;;  %v6111_v10 = vsel %vm4669_vm7, %v6110_v32, %v6109_v13 }
 0x3f0   : > { %v4894_v6 = vrot.slane %v9298_v29, 6  ;;  %v3663_v21 = vrot.slane %v2904_v17, %v8020_v44  ;;  %v3670_v7 = vrot.slane %v6577_v56, %v8020_v44  ;;  %v5981_v4 = vsel %vm4678_vm14, %v5980_v36, %v5979_v37 }
 0x3f1   : > { %v5983_v18 = vsel %vm4681_vm15, %v5982_v35, %v5981_v4  ;;  %v5984_v34 = vrot.slane %v5879_v22, 1  ;;  %v6113_v11 = vsel %vm4672_vm8, %v6112_v50, %v6111_v10  ;;  %v6116_v39 = vrot.slane %v5877_v57, 4 }
 0x3f2   : > { %v3671_v15 = vcombine.high %v3663_v21, %v3663_v21  ;;  %v3672_v41 = vcombine.high %v3670_v7, %v3670_v7  ;;  %v3679_v32 = vrot.slane %v3663_v21, %v8020_v44  ;;  %v3686_v13 = vrot.slane %v3670_v7, %v8020_v44 }
 0x3f3   : > { %v5985_v23 = vsel %vm4684_vm9, %v5984_v34, %v5983_v18  ;;  %v6115_v1 = vsel %vm4675_vm11, %v9206_v30, %v6113_v11  ;;  %v6118_v51 = vrot.slane %v5878_v46, 3  ;;  %v6120_v14 = vrot.slane %v5879_v22, 2 }
 0x3f4   : > { %v3693_v43 = vrot.slane %v3671_v15, %v8020_v44  ;;  %v3700_v50 = vrot.slane %v3672_v41, %v8020_v44  ;;  %v3701_v33 = vcombine.high %v3679_v32, %v3679_v32  ;;  %v3702_v45 = vcombine.high %v3686_v13, %v3686_v13 }
 0x3f5   : > { %v5718_v57 = vrot.slane %v3679_v32, %v8020_v44  ;;  %v5774_v58 = vrot.slane %v3686_v13, %v8020_v44  ;;  %v6006_v53 = vpack.c.b16 %v5985_v23, %v5985_v23  ;;  %v6117_v36 = vsel %vm4678_vm14, %v6116_v39, %v6115_v1 }
 0x3f6   : > { %v3703_v17 = vcombine.high %v3693_v43, %v3693_v43  ;;  %v3704_v56 = vcombine.high %v3700_v50, %v3700_v50  ;;  %v5732_v31 = vrot.slane %v3693_v43, %v8020_v44  ;;  %v5746_v30 = vrot.slane %v3701_v33, %v8020_v44 }
 0x3f7   : > { %v5725_v46 = vrot.slane %v5718_v57, %v8020_v44  ;;  %v9352_v22 = vrot.slane %v5774_v58, %v8020_v44  ;;  %v5788_v37 = vrot.slane %v3700_v50, %v8020_v44  ;;  %v5802_v35 = vrot.slane %v3702_v45, %v8020_v44  ;;  %6020 = vrot.lane.b32.xlu0 %v6006_v53, %s6753_s9 }
 0x3f8   : > { %v5739_v10 = vrot.slane %v5732_v31, %v8020_v44  ;;  %v5753_v21 = vrot.slane %v5746_v30, %v8020_v44  ;;  %v5760_v7 = vrot.slane %v3703_v17, %v8020_v44  ;;  %v4600_v4 = vrot.slane %v9292_v61, %v8020_v44 }
 0x3f9   : > { %v9363_v18 = vrot.slane %v5788_v37, %v8020_v44  ;;  %v5816_v34 = vrot.slane %v3704_v56, %v8020_v44  ;;  %v5880_v11 = vunpack.c.l.b16 %v5725_v46  ;;  %v5884_v39 = vunpack.c.l.b16 %v9352_v22 }
 0x3fa   : > { %v5767_v15 = vrot.slane %v5760_v7, %v8020_v44  ;;  %v5881_v41 = vunpack.c.l.b16 %v5739_v10  ;;  %v5882_v32 = vunpack.c.l.b16 %v5753_v21  ;;  %v6119_v13 = vsel %vm4681_vm15, %v6118_v51, %v6117_v36 }
 0x3fb   : > { %v5809_v23 = vrot.slane %v5802_v35, %v8020_v44  ;;  %v5885_v1 = vunpack.c.l.b16 %v9363_v18  ;;  %v5992_v43 = vrot.slane %v5884_v39, 4  ;;  %v6122_v61 = vrot.slane %v5880_v11, 1 }
 0x3fc   : > { %v5883_v50 = vunpack.c.l.b16 %v5767_v15  ;;  %v5986_v33 = vrot.slane %v5881_v41, 7  ;;  %v5988_v45 = vrot.slane %v5882_v32, 6  ;;  %v6124_v57 = vrot.slane %v5882_v32, 7 }
 0x3fd   : > { %v6123_v58 = vsel %vm4666_vm6, %v5881_v41, %v6122_v61  ;;  %v6121_v53 = vsel %vm4684_vm9, %v6120_v14, %v6119_v13  ;;  %v9376_v17 = vunpack.c.l.b16 %v4586_v38  ;;  %v9378_v51 = vunpack.c.l.b16 %v4600_v4  ;;  %v4919_v38 = vpop.permute.xlu1 %4918  ;;  %v9600_v4 = vld [vmem:[#allocation5_spill] sm:$0xff]  ;;  %v6013_v13 = vpop.permute.xlu0 %6012 }
 0x3fe   : > { %v5987_v36 = vsel %vm4666_vm6, %v5986_v33, %v5880_v11  ;;  %v5990_v56 = vrot.slane %v5883_v50, 5  ;;  %v6126_v31 = vrot.slane %v5883_v50, 6  ;;  %v6142_v30 = vpack.c.b16 %v6121_v53, %v6121_v53  ;;  %v9601_v11 = vld [vmem:[#allocation4_spill] sm:$0xff]  ;;  %v9602_v53 = vld [vmem:[#allocation3_spill] sm:$0xff] }
 0x3ff   : > { %v4893_v46 = vsel %vm4669_vm7, %v4892_v20, %v9314_v63  ;;  %v4898_v14 = vrot.slane %v4662_v40, 4  ;;  %v4900_v22 = vrot.slane %v9376_v17, 3  ;;  %v4902_v0 = vrot.slane %v9378_v51, 2 }
 0x400   : > { %6156 = vrot.lane.b32.xlu0 %v6142_v30, %s6751_s30  ;;  %v4895_v37 = vsel %vm4672_vm8, %v4894_v6, %v4893_v46  ;;  %v9598_v35 = vrot.slane %v8510_v24, 6  ;;  %v9599_v20 = vunpack.c.l.b16 %v8488_v25  ;;  %v4724_v21 = vrot.slane %v8609_v42, 2 }
 0x401   : > { %v4897_v7 = vsel %vm4675_vm11, %v9302_v60, %v4895_v37  ;;  %v4726_v18 = vrot.slane %v9600_v4, 1  ;;  %v4718_v15 = vrot.slane %v9601_v11, 5  ;;  %v5823_v41 = vrot.slane %v5816_v34, %v8020_v44  ;;  %v6015_v50 = vpop.permute.xlu1 %6014  ;;  %v6149_v4 = vpop.permute.xlu0 %6148 }
 0x402   : > { %v4717_v10 = vsel %vm4669_vm7, %v9598_v35, %v8517_v8  ;;  %v4722_v63 = vrot.slane %v9599_v20, 3  ;;  %v4899_v6 = vsel %vm4678_vm14, %v4898_v14, %v4897_v7  ;;  %v5886_v32 = vunpack.c.l.b16 %v5809_v23 }
 0x403   : > { %v5989_v24 = vsel %vm4669_vm7, %v5988_v45, %v5987_v36  ;;  %v5994_v8 = vrot.slane %v5885_v1, 3  ;;  %v4901_v25 = vsel %vm4681_vm15, %v4900_v22, %v4899_v6  ;;  %v4719_v42 = vsel %vm4672_vm8, %v4718_v15, %v4717_v10  ;;  %v9606_v6 = vld [vmem:[#allocation10_spill] sm:$0xff] }
 0x404   : > { %v5887_v61 = vunpack.c.l.b16 %v5823_v41  ;;  %v5991_v60 = vsel %vm4672_vm8, %v5990_v56, %v5989_v24  ;;  %v4903_v33 = vsel %vm4684_vm9, %v4902_v0, %v4901_v25  ;;  %v4721_v44 = vsel %vm4675_vm11, %v9602_v53, %v4719_v42 }
 0x405   : > { %v5993_v34 = vsel %vm4675_vm11, %v5992_v43, %v5991_v60  ;;  %v5996_v23 = vrot.slane %v5886_v32, 2  ;;  %v4911_v30 = vpack.c.b16 %v4903_v33, %v4903_v33  ;;  %v4723_v45 = vsel %vm4678_vm14, %v4722_v63, %v4721_v44  ;;  %v6151_v15 = vpop.permute.xlu1 %6150  ;;  %v9607_v60 = vld [vmem:[#allocation15_spill] sm:$0xff]  ;;  %v9608_v33 = vld [vmem:[#allocation14_spill] sm:$0xff] }
 0x406   : > { %v5995_v36 = vsel %vm4678_vm14, %v5994_v8, %v5993_v34  ;;  %v5998_v46 = vrot.slane %v5887_v61, 1  ;;  %v6128_v14 = vrot.slane %v5884_v39, 5  ;;  %v4725_v22 = vsel %vm4681_vm15, %v4724_v21, %v4723_v45  ;;  %v9611_v45 = vld [vmem:[#allocation16_spill] sm:$0xff] }
 0x407   : > { %v5997_v56 = vsel %vm4681_vm15, %v5996_v23, %v5995_v36  ;;  %v6125_v37 = vsel %vm4669_vm7, %v6124_v57, %v6123_v58  ;;  %4926 = vrot.lane.b32.xlu1 %v4911_v30, %s6756_s14  ;;  %v4727_v0 = vsel %vm4684_vm9, %v4726_v18, %v4725_v22  ;;  %v6130_v10 = vrot.slane %v5885_v1, 4  ;;  %v9603_v57 = vld [vmem:[#allocation8_spill] sm:$0xff]  ;;  %v9604_v58 = vld [vmem:[#allocation7_spill] sm:$0xff]  ;;  %s6600_s14 = sshll.u32 %s9621_s19, 5 }
 0x408   : > { %v5999_v43 = vsel %vm4684_vm9, %v5998_v46, %v5997_v56  ;;  %v6127_v35 = vsel %vm4672_vm8, %v6126_v31, %v6125_v37  ;;  %v4787_v20 = vpack.c.b16 %v4727_v0, %v4727_v0  ;;  %v6132_v39 = vrot.slane %v5886_v32, 3  ;;  %s9519_s22 = scalar_lea.vmem %s9533_s5, %s6600_s14 }
 0x409   : > { %v6007_v63 = vpack.c.b16 %v5999_v43, %v5999_v43  ;;  %v6129_v7 = vsel %vm4675_vm11, %v6128_v14, %v6127_v35  ;;  %v6134_v11 = vrot.slane %v5887_v61, 2  ;;  %v9605_v41 = vrot.slane %v9604_v58, 6  ;;  %v9612_v14 = vld [vmem:[#allocation13_spill] sm:$0xff]  ;;  %v9617_v58 = vld [vmem:[#allocation11_spill] sm:$0xff] }
 0x40a   : > { %v6131_v21 = vsel %vm4678_vm14, %v6130_v10, %v6129_v7  ;;  %v4732_v24 = vrot.slane %v9606_v6, 5  ;;  %v4758_v31 = vrot.slane %v9109_v47, 6  ;;  %v6189_v1 = vsel %vm954_vm3, %v9323_v16, %v6013_v13  ;;  %v9610_v13 = vld [vmem:[#allocation9_spill] sm:$0xff] }
 0x40b   : > { %v4731_v18 = vsel %vm4669_vm7, %v9605_v41, %v9603_v57  ;;  %v6171_v8 = vsel %vm921_vm2, %v4787_v20, %v4919_v38  ;;  %v6133_v32 = vsel %vm4681_vm15, %v6132_v39, %v6131_v21  ;;  %6022 = vrot.lane.b32.xlu1 %v6007_v63, %s6753_s9  ;;  %v9609_v53 = vrot.slane %v9608_v33, 6  ;;  %v4921_v57 = vpop.permute.xlu0 %4920 }
 0x40c   : > { %v6135_v25 = vsel %vm4684_vm9, %v6134_v11, %v6133_v32  ;;  %v6191_v42 = vsel %vm954_vm3, %v6171_v8, %v6015_v50  ;;  %v4733_v61 = vsel %vm4672_vm8, %v4732_v24, %v4731_v18  ;;  %v4772_v44 = vrot.slane %v9288_v12, 6 }
 0x40d   : > { %v4745_v47 = vsel %vm4669_vm7, %v9609_v53, %v9607_v60  ;;  %v6205_v16 = vsel %vm987_vm4, %v6189_v1, %v6149_v4  ;;  %v6207_v38 = vsel %vm987_vm4, %v6191_v42, %v6151_v15  ;;  %v4735_v34 = vsel %vm4675_vm11, %v9610_v13, %v4733_v61 }
 0x40e   : > { %v6143_v23 = vpack.c.b16 %v6135_v25, %v6135_v25  ;;  %v6579_v30 = vcombine.low %v6205_v16, %v6207_v38  ;;  %v4746_v50 = vrot.slane %v9611_v45, 5  ;;  %v4759_v36 = vsel %vm4669_vm7, %v4758_v31, %v9121_v27  ;;  %v9618_v31 = vld [vmem:[#allocation12_spill] sm:$0xff] }
 0x40f   : > { %v4760_v46 = vrot.slane %v9118_v62, 5  ;;  %v9613_v22 = vunpack.c.l.b16 %v9612_v14  ;;  %v4762_v12 = vrot.slane %v4653_v48, 4  ;;  %v4764_v43 = vrot.slane %v4654_v28, 3 }
 0x410   : > { %6158 = vrot.lane.b32.xlu1 %v6143_v23, %s6751_s30  ;;  %6649 = vmatmul.mubr.msk.bf16.vlgmr.msra.gmra.mrb[64].mxu0 %vm1020_vm5, %v6579_v30  ;;  %v4747_v37 = vsel %vm4672_vm8, %v4746_v50, %v4745_v47  ;;  %v4773_v62 = vsel %vm4669_vm7, %v4772_v44, %v9305_v54  ;;  %v4766_v5 = vrot.slane %v9223_v52, 2  ;;  %v4768_v10 = vrot.slane %v9228_v3, 1 }
 0x411   : > { %v4748_v56 = vrot.slane %v9613_v22, 4  ;;  %v4761_v0 = vsel %vm4672_vm8, %v4760_v46, %v4759_v36  ;;  %v4774_v63 = vrot.slane %v9298_v29, 5  ;;  %v4776_v49 = vrot.slane %v4661_v55, 4  ;;  %v9614_v55 = vld [vmem:[#allocation6_spill] sm:$0xff] }
 0x412   : > { %v4763_v35 = vsel %vm4675_vm11, %v4762_v12, %v4761_v0  ;;  %v4778_v54 = vrot.slane %v4662_v40, 3  ;;  %v4780_v52 = vrot.slane %v9376_v17, 2  ;;  %v4782_v3 = vrot.slane %v9378_v51, 1 }
 0x413   : > { %v4749_v27 = vsel %vm4675_vm11, %v4748_v56, %v4747_v37  ;;  %v4765_v48 = vsel %vm4678_vm14, %v4764_v43, %v4763_v35  ;;  %v4775_v7 = vsel %vm4672_vm8, %v4774_v63, %v4773_v62  ;;  %v9615_v21 = vunpack.c.l.b16 %v9614_v55 }
 0x414   : > { %v4767_v20 = vsel %vm4681_vm15, %v4766_v5, %v4765_v48  ;;  %v4777_v39 = vsel %vm4675_vm11, %v4776_v49, %v4775_v7  ;;  %v9616_v9 = vunpack.c.l.b16 %v8875_v26  ;;  %v4738_v41 = vrot.slane %v9617_v58, 2  ;;  %v6741_v5 = vld [vmem:[%s9529_s1] sm:$0x7] }
 0x415   : > { %v4769_v28 = vsel %vm4684_vm9, %v4768_v10, %v4767_v20  ;;  %v4779_v4 = vsel %vm4678_vm14, %v4778_v54, %v4777_v39  ;;  %v4736_v11 = vrot.slane %v9615_v21, 3  ;;  %v4752_v51 = vrot.slane %v9020_v2, 2 }
 0x416   : > { %v4781_v29 = vsel %vm4681_vm15, %v4780_v52, %v4779_v4  ;;  %v4750_v40 = vrot.slane %v9616_v9, 3  ;;  %v4740_v1 = vrot.slane %v9618_v31, 1  ;;  %v4754_v26 = vrot.slane %v9025_v19, 1 }
 0x417   : > { %v4783_v59 = vsel %vm4684_vm9, %v4782_v3, %v4781_v29  ;;  %v4737_v15 = vsel %vm4678_vm14, %v4736_v11, %v4735_v34  ;;  %v4790_v50 = vpack.c.b16 %v4769_v28, %v4769_v28 }
 0x418   : > { %v4751_v17 = vsel %vm4678_vm14, %v4750_v40, %v4749_v27  ;;  %v4739_v6 = vsel %vm4681_vm15, %v4738_v41, %v4737_v15  ;;  %v4791_v36 = vpack.c.b16 %v4783_v59, %v4783_v59  ;;  %v9619_v27 = vld [vmem:[#allocation2_spill] sm:$0xff] }
 0x419   : > { %v4753_v24 = vsel %vm4681_vm15, %v4752_v51, %v4751_v17  ;;  %v4741_v32 = vsel %vm4684_vm9, %v4740_v1, %v4739_v6  ;;  %v6226_v35 = vsub.s32 2, %v9619_v27 }
 0x41a   : > { %v4755_v25 = vsel %vm4684_vm9, %v4754_v26, %v4753_v24  ;;  %v4788_v61 = vpack.c.b16 %v4741_v32, %v4741_v32 }
 0x41b   : > { %v4789_v60 = vpack.c.b16 %v4755_v25, %v4755_v25  ;;  %v6227_v48 = vrot.slane %v6741_v5, %v6226_v35 }
 0x41c   : > { %v6174_v2 = vsel %vm921_vm2, %v4788_v61, %v4921_v57 }
 0x41e   : > { %v6017_v8 = vpop.permute.xlu0 %6016 }
 0x41f   : > { %v6193_v47 = vsel %vm954_vm3, %v6174_v2, %v6017_v8 }
 0x426   : > { %v6153_v33 = vpop.permute.xlu0 %6152 }
 0x427   : > { %v6209_v38 = vsel %vm987_vm4, %v6193_v47, %v6153_v33 }
 0x42b   : > { %v4923_v18 = vpop.permute.xlu1 %4922 }
 0x42c   : > { %v6177_v53 = vsel %vm921_vm2, %v4789_v60, %v4923_v18 }
 0x442   : > { %v6019_v42 = vpop.permute.xlu1 %6018 }
 0x443   : > { %v6195_v44 = vsel %vm954_vm3, %v6177_v53, %v6019_v42 }
 0x449   : > { %v6155_v16 = vpop.permute.xlu1 %6154 }
 0x44a   : > { %v6211_v19 = vsel %vm987_vm4, %v6195_v44, %v6155_v16 }
 0x44b   : > { %v6580_v13 = vcombine.low %v6209_v38, %v6211_v19 }
 0x44d   : > { %6652 = vmatprep.mubr.msk.bf16.mxu1 %vm1020_vm5, %v6580_v13 }
 0x453   : > { %v4925_v34 = vpop.permute.xlu0 %4924 }
 0x454   : > { %v6180_v14 = vsel %vm921_vm2, %v4790_v50, %v4925_v34 }
 0x469   : > { %v6021_v23 = vpop.permute.xlu0 %6020 }
 0x46a   : > { %v6197_v56 = vsel %vm954_vm3, %v6180_v14, %v6021_v23 }
 0x472   : > { %v6157_v46 = vpop.permute.xlu0 %6156 }
 0x473   : > { %v6213_v0 = vsel %vm987_vm4, %v6197_v56, %v6157_v46 }
 0x479   : > { %v4927_v30 = vpop.permute.xlu1 %4926 }
 0x47a   : > { %v6183_v22 = vsel %vm921_vm2, %v4791_v36, %v4927_v30 }
 0x47d   : > { %v6023_v45 = vpop.permute.xlu1 %6022 }
 0x47e   : > { %v6199_v12 = vsel %vm954_vm3, %v6183_v22, %v6023_v45 }
 0x482   : > { %v6159_v37 = vpop.permute.xlu1 %6158 }
 0x483   : > { %v6215_v43 = vsel %vm987_vm4, %v6199_v12, %v6159_v37 }
 0x484   : > { %v6581_v62 = vcombine.low %v6213_v0, %v6215_v43 }
 0x486   : > { %6653 = vmatmul.mubr.msk.bf16.vlgmr.msra.gmra.mrb[64].mxu1 %vm1020_vm5, %v6581_v62 }
 0x4e3   : > { %v6650_v10 = vpop.f32.mrb[64].mxu0 }
 0x4e4   : > { %v6327_v20 = vadd.f32 %v6650_v10, %v6227_v48  ;;  %v6318_v63 = vpop.f32.mrb[65].mxu0 }
 0x4e5   : > { %v6319_v49 = vadd.f32 %v6318_v63, %v6227_v48  ;;  %v6651_v28 = vpop.f32.mrb[66].mxu0 }
 0x4e6   : > { %v6359_v54 = vmul.f32 0.2, %v6327_v20  ;;  %v6330_v7 = vadd.f32 %v6651_v28, %v6227_v48  ;;  %v6321_v52 = vpop.f32.mrb[67].mxu0  ;;  %vm6351_vm2 = vcmp.ge.f32.partialorder %v6327_v20, 0.0 }
 0x4e7   : > { %v6357_v39 = vmul.f32 0.2, %v6319_v49  ;;  %v6322_v3 = vadd.f32 %v6321_v52, %v6227_v48  ;;  %vm6349_vm3 = vcmp.ge.f32.partialorder %v6319_v49, 0.0 }
 0x4e8   : > { %vm6352_vm4 = vcmp.ge.f32.partialorder %v6330_v7, 0.0  ;;  %v6360_v4 = vmul.f32 0.2, %v6330_v7  ;;  %v6367_v59 = vsel %vm6351_vm2, %v6327_v20, %v6359_v54 }
 0x4e9   : > { %vm6350_vm5 = vcmp.ge.f32.partialorder %v6322_v3, 0.0  ;;  %v6358_v29 = vmul.f32 0.2, %v6322_v3  ;;  %v6365_v21 = vsel %vm6349_vm3, %v6319_v49, %v6357_v39 }
 0x4ea   : > { %v6368_v55 = vsel %vm6352_vm4, %v6330_v7, %v6360_v4 }
 0x4eb   : > { %v6617_v11 = vpack.c.bf16 %v6368_v55, %v6367_v59  ;;  %v6366_v9 = vsel %vm6350_vm5, %v6322_v3, %v6358_v29 }
 0x4ec   : > { %v6612_v40 = vpack.c.bf16 %v6366_v9, %v6365_v21 }
 0x4ed   : > { %6629 = vst [vmem:[%s9519_s22 + $0x8] sm:$0xff] %v6617_v11  }
 0x4ee   : > { %6613 = vst [vmem:[%s9519_s22] sm:$0xff] %v6612_v40  }
 0x559   : > { %v6654_v15 = vpop.f32.mrb[64].mxu1 }
 0x55a   : > { %v6343_v57 = vadd.f32 %v6654_v15, %v6227_v48  ;;  %v6334_v17 = vpop.f32.mrb[65].mxu1 }
 0x55b   : > { %v6335_v58 = vadd.f32 %v6334_v17, %v6227_v48  ;;  %v6655_v41 = vpop.f32.mrb[66].mxu1 }
 0x55c   : > { %v6363_v51 = vmul.f32 0.2, %v6343_v57  ;;  %v6346_v18 = vadd.f32 %v6655_v41, %v6227_v48  ;;  %v6337_v6 = vpop.f32.mrb[67].mxu1  ;;  %vm6355_vm6 = vcmp.ge.f32.partialorder %v6343_v57, 0.0 }
 0x55d   : > { %v6361_v24 = vmul.f32 0.2, %v6335_v58  ;;  %v6338_v31 = vadd.f32 %v6337_v6, %v6227_v48  ;;  %vm6353_vm7 = vcmp.ge.f32.partialorder %v6335_v58, 0.0 }
 0x55e   : > { %vm6356_vm8 = vcmp.ge.f32.partialorder %v6346_v18, 0.0  ;;  %v6364_v1 = vmul.f32 0.2, %v6346_v18  ;;  %v6371_v26 = vsel %vm6355_vm6, %v6343_v57, %v6363_v51 }
 0x55f   : > { %vm6354_vm11 = vcmp.ge.f32.partialorder %v6338_v31, 0.0  ;;  %v6362_v8 = vmul.f32 0.2, %v6338_v31  ;;  %v6369_v25 = vsel %vm6353_vm7, %v6335_v58, %v6361_v24 }
 0x560   : > { %v6372_v32 = vsel %vm6356_vm8, %v6346_v18, %v6364_v1 }
 0x561   : > { %v6627_v42 = vpack.c.bf16 %v6372_v32, %v6371_v26  ;;  %v6370_v61 = vsel %vm6354_vm11, %v6338_v31, %v6362_v8 }
 0x562   : > { %v6622_v60 = vpack.c.bf16 %v6370_v61, %v6369_v25 }
 0x563   : > { %6631 = vst [vmem:[%s9519_s22 + $0x18] sm:$0xff] %v6627_v42  }
 0x564   : > { %6630 = vst [vmem:[%s9519_s22 + $0x10] sm:$0xff] %v6622_v60  }
 0x565 PF: > { %s15_s18 = sadd.s32 1, %s6748_s18  }
 0x566   : > { %p12_p4 = scmp.ge.s32.totalorder %s15_s18, 4  }
 0x568   :  { %14 = sbr.rel (!%p12_p4) target bundleno = 1 (0x1), region = 70 }

</bundles_post_ra>
